<compile_context>
chip_gen: v5e
topology: v5e:2x2
jax: 0.10.0
libtpu: 0.0.40
codegen_flags: <defaults>
</compile_context>

<pallas_src>
import functools

import jax
import jax.numpy as jnp
from jax.experimental import pallas as pl
from jax.experimental.pallas import tpu as pltpu


def _act(x, activation):
    if activation == "tanh":
        return jnp.tanh(x)
    if activation == "sigmoid":
        return jax.nn.sigmoid(x)
    if activation == "relu":
        return jnp.maximum(x, 0.0)
    if activation == "swish":
        return x * jax.nn.sigmoid(x)
    raise ValueError(f"Unknown activation function: {activation}")


def _wrf_mdnn_kernel(*refs, activation, hidden_dim, num_rest_layers):
    """Feature-major fused forward.

    refs = (xp_ref, masks_ref, wf_ref, wuvh_ref, wh_1..wh_{L-1}, wo_ref, b_ref, o_ref)

      xp_ref    : (F_pe, tn)   pre-gathered + pre-scaled input (batch on lanes)
      masks_ref : (F_pe, 2)    [cos_mask, sin_mask] columns; passthrough = 1 - cos - sin
      wf_ref    : (half, F_pe) Fourier kernel, transposed
      wuvh_ref  : (3H, 2*half) [Wu; Wv; Wh0]^T, consumes the stacked [cos; sin] block
      wh_i_ref  : (H, H)       later hidden layers, transposed
      wo_ref    : (out, H)     output layer, transposed
      b_ref     : (3H + (L-1)H + out, 1)  packed biases [bu; bv; bh0; bh1..; bo]
      o_ref     : (out, tn)    lane-dense output tile
    """
    xp_ref, masks_ref, wf_ref, wuvh_ref = refs[:4]
    wh_refs = refs[4:4 + num_rest_layers]
    wo_ref, b_ref, o_ref = refs[4 + num_rest_layers:]

    f32 = jnp.float32
    H = hidden_dim
    # NOTE(v5e): precision could be dropped to HIGH (bf16_3x) here to halve MXU passes;
    # kept at HIGHEST to stay bit-comparable with the f32 reference.
    HI = jax.lax.Precision.HIGHEST

    def mm(w_ref, a):
        return jnp.dot(w_ref[...], a, preferred_element_type=f32, precision=HI)

    # ---- PeriodEmbs (gather/scale already done in wrapper): cos/sin + masks -------
    xp = xp_ref[...].astype(f32)                    # (F_pe, tn)
    cm = masks_ref[:, 0:1]                          # (F_pe, 1)
    sm = masks_ref[:, 1:2]
    pm = 1.0 - cm - sm
    x_pe = cm * jnp.cos(xp) + sm * jnp.sin(xp) + pm * xp

    # ---- FourierEmbs: stacked [cos; sin] block (sublane-aligned, half % 8 == 0) ---
    t = mm(wf_ref, x_pe)                            # (half, tn)
    cs = jnp.concatenate([jnp.cos(t), jnp.sin(t)], axis=0)   # (2*half, tn)

    # ---- fused u / v / hidden-layer-0 projection -----------------------------------
    uvh = _act(mm(wuvh_ref, cs) + b_ref[0:3 * H, :], activation)   # (3H, tn)
    u = uvh[0:H, :]
    v = uvh[H:2 * H, :]
    h = uvh[2 * H:3 * H, :]
    h = h * u + (1.0 - h) * v

    # ---- remaining hidden layers ----------------------------------------------------
    for layer in range(num_rest_layers):
        off = 3 * H + layer * H
        h = _act(mm(wh_refs[layer], h) + b_ref[off:off + H, :], activation)
        h = h * u + (1.0 - h) * v

    # ---- output layer (lane-dense (out_dim, tn) store) ------------------------------
    bo = b_ref[3 * H + num_rest_layers * H:, :]     # (out_dim, 1)
    o_ref[...] = (mm(wo_ref, h) + bo).astype(o_ref.dtype)


def wrf_mdnn_forward(x, params, *, period, axis, activation="tanh", block_n=256):
    """Fused WRF_MDNN forward. x: (N, F_in) float32 -> (N, out_dim) float32.

    params:
      wf: (F_pe, embed_dim//2), wu/wv: (embed_dim, H), bu/bv: (H,),
      wh: list of kernels [(embed_dim, H), (H, H), ...], bh: list of (H,),
      wo: (H, out_dim), bo: (out_dim,)
    (effective kernels; the weight_fact reparam kernel = g*v is folded by the caller)
    """
    N, F_in = x.shape
    period = tuple(float(p) for p in period)
    axis = tuple(int(a) for a in axis)
    f32 = jnp.float32

    # ---- static PeriodEmbs metadata; gather + scale done here (bit-exact) ----------
    g_idx, scale, is_cos, is_sin = [], [], [], []
    for i in range(F_in):
        if i in axis:
            p = period[axis.index(i)]
            g_idx += [i, i]; scale += [p, p]; is_cos += [1.0, 0.0]; is_sin += [0.0, 1.0]
        else:
            g_idx += [i]; scale += [1.0]; is_cos += [0.0]; is_sin += [0.0]
    F_pe = len(g_idx)

    # feature-major input, pre-duplicated and pre-scaled: (F_pe, N)
    xp = x.astype(f32).T[jnp.asarray(g_idx), :] * jnp.asarray(scale, f32)[:, None]
    masks = jnp.stack([jnp.asarray(is_cos, f32), jnp.asarray(is_sin, f32)], axis=1)  # (F_pe, 2)

    # ---- weights, transposed / fused ------------------------------------------------
    wf_t = params["wf"].T.astype(f32)                       # (half, F_pe)
    half = wf_t.shape[0]
    wh_list = list(params["wh"])
    bh_list = list(params["bh"])
    assert len(wh_list) >= 1 and len(wh_list) == len(bh_list)
    H = params["wu"].shape[1]
    out_dim = params["wo"].shape[1]

    wuvh_t = jnp.concatenate(
        [params["wu"].T, params["wv"].T, wh_list[0].T], axis=0).astype(f32)   # (3H, 2*half)
    wh_rest_t = [w.T.astype(f32) for w in wh_list[1:]]                        # (H, H) each
    wo_t = params["wo"].T.astype(f32)                                         # (out_dim, H)
    b_packed = jnp.concatenate(
        [params["bu"], params["bv"], bh_list[0]] + bh_list[1:] + [params["bo"]]
    ).astype(f32).reshape(-1, 1)                                              # (3H+(L-1)H+out, 1)

    # ---- batch tiling on the lane axis (pad N so any batch size works) --------------
    assert block_n % 128 == 0, "block_n must be a multiple of 128 (lane width)"
    tn = block_n
    n_pad = (-N) % tn
    if n_pad:
        xp = jnp.pad(xp, ((0, 0), (0, n_pad)))
    N_pad = N + n_pad
    grid = (N_pad // tn,)

    def resident(shape):  # full-array block, same block every grid step (stays in VMEM)
        return pl.BlockSpec(shape, lambda i: (0,) * len(shape))

    in_specs = [
        pl.BlockSpec((F_pe, tn), lambda i: (0, i)),          # xp: tiled over the lane (batch) axis
        resident(masks.shape),
        resident(wf_t.shape),
        resident(wuvh_t.shape),
        *[resident(w.shape) for w in wh_rest_t],
        resident(wo_t.shape),
        resident(b_packed.shape),
    ]

    kernel = functools.partial(
        _wrf_mdnn_kernel, activation=activation, hidden_dim=H,
        num_rest_layers=len(wh_rest_t))

    out_t = pl.pallas_call(
        kernel,
        out_shape=jax.ShapeDtypeStruct((out_dim, N_pad), x.dtype),
        grid=grid,
        in_specs=in_specs,
        out_specs=pl.BlockSpec((out_dim, tn), lambda i: (0, i)),
        compiler_params=pltpu.CompilerParams(dimension_semantics=("parallel",)),
    )(xp, masks, wf_t, wuvh_t, *wh_rest_t, wo_t, b_packed)

    return out_t[:, :N].T                                     # back to (N, out_dim)


def wrf_mdnn_ref(x, params, *, period, axis, activation="tanh"):
    """Pure-JAX reference mirroring the PyTorch forward literally."""
    HI = jax.lax.Precision.HIGHEST
    act = lambda z: _act(z, activation)
    # PeriodEmbs
    cols = []
    for i in range(x.shape[1]):
        xi = x[:, i]
        if i in axis:
            p = period[axis.index(i)]
            cols.append(jnp.cos(p * xi)[:, None])
            cols.append(jnp.sin(p * xi)[:, None])
        else:
            cols.append(xi[:, None])
    xp = jnp.concatenate(cols, axis=-1)
    # FourierEmbs
    t = jnp.dot(xp, params["wf"], precision=HI)
    y = jnp.concatenate([jnp.cos(t), jnp.sin(t)], axis=-1)
    # ModifiedDNN
    u = act(jnp.dot(y, params["wu"], precision=HI) + params["bu"])
    v = act(jnp.dot(y, params["wv"], precision=HI) + params["bv"])
    h = y
    for w, b in zip(params["wh"], params["bh"]):
        h = act(jnp.dot(h, w, precision=HI) + b)
        h = h * u + (1.0 - h) * v
    return jnp.dot(h, params["wo"], precision=HI) + params["bo"]


if __name__ == "__main__":
    key = jax.random.PRNGKey(0)
    ks = jax.random.split(key, 12)

    # Small WRF_MDNN config (num_layers=2, period_emb + fourier_emb on, WRF output):
    N, F_in = 1024, 3
    period, axis = (2.0, 3.5), (0, 2)        # PeriodEmbs config
    F_pe = F_in + len(axis)                   # 5
    embed_dim, embed_scale = 32, 1.0          # FourierEmbs
    half = embed_dim // 2
    hidden, out_dim = 32, 1

    def dense_init(k, fan_in, fan_out):
        # xavier-uniform; with reparam='weight_fact' the forward kernel is g*v == w,
        # so passing the effective kernel directly is equivalent.
        lim = (6.0 / (fan_in + fan_out)) ** 0.5
        return jax.random.uniform(k, (fan_in, fan_out), jnp.float32, -lim, lim)

    params = {
        "wf": embed_scale * jax.random.normal(ks[1], (F_pe, half), jnp.float32),
        "wu": dense_init(ks[2], embed_dim, hidden),
        "bu": 0.1 * jax.random.normal(ks[3], (hidden,), jnp.float32),
        "wv": dense_init(ks[4], embed_dim, hidden),
        "bv": 0.1 * jax.random.normal(ks[5], (hidden,), jnp.float32),
        "wh": [dense_init(ks[6], embed_dim, hidden),
               dense_init(ks[7], hidden, hidden)],
        "bh": [0.1 * jax.random.normal(ks[8], (hidden,), jnp.float32),
               0.1 * jax.random.normal(ks[9], (hidden,), jnp.float32)],
        "wo": dense_init(ks[10], hidden, out_dim),
        "bo": 0.1 * jax.random.normal(ks[11], (out_dim,), jnp.float32),
    }
    x = jax.random.normal(ks[0], (N, F_in), dtype=jnp.float32)

    out = wrf_mdnn_forward(x, params, period=period, axis=axis, block_n=256)
    out = jax.block_until_ready(out)

    expected = wrf_mdnn_ref(x, params, period=period, axis=axis)
    assert out.shape == (N, out_dim), out.shape
    max_err = float(jnp.max(jnp.abs(out - expected)))
    assert jnp.allclose(out, expected, atol=5e-4, rtol=1e-3), (
        f"mismatch vs reference, max abs err = {max_err}")

    print("KERNEL_OK")
</pallas_src>

<mosaic_0001>
module attributes {stable_mosaic.version = 11 : i64} {
  func.func @_wrf_mdnn_kernel(%arg0: i32, %arg1: memref<5x256xf32, #tpu.memory_space<vmem>>, %arg2: memref<5x2xf32, #tpu.memory_space<vmem>>, %arg3: memref<16x5xf32, #tpu.memory_space<vmem>>, %arg4: memref<96x32xf32, #tpu.memory_space<vmem>>, %arg5: memref<32x32xf32, #tpu.memory_space<vmem>>, %arg6: memref<1x32xf32, #tpu.memory_space<vmem>>, %arg7: memref<129x1xf32, #tpu.memory_space<vmem>>, %arg8: memref<1x256xf32, #tpu.memory_space<vmem>>) attributes {dimension_semantics = [#tpu.dimension_semantics<parallel>], iteration_bounds = array<i64: 4>, scalar_prefetch = 0 : i64, scratch_operands = 0 : i64, tpu.core_type = #tpu.core_type<tc>, window_params = [{transform_indices = @transform_0, window_bounds = array<i64: 5, 256>}, {pipeline_mode = #tpu.pipeline_mode<synchronous>, transform_indices = @transform_1, window_bounds = array<i64: 5, 2>}, {pipeline_mode = #tpu.pipeline_mode<synchronous>, transform_indices = @transform_2, window_bounds = array<i64: 16, 5>}, {pipeline_mode = #tpu.pipeline_mode<synchronous>, transform_indices = @transform_3, window_bounds = array<i64: 96, 32>}, {pipeline_mode = #tpu.pipeline_mode<synchronous>, transform_indices = @transform_4, window_bounds = array<i64: 32, 32>}, {pipeline_mode = #tpu.pipeline_mode<synchronous>, transform_indices = @transform_5, window_bounds = array<i64: 1, 32>}, {pipeline_mode = #tpu.pipeline_mode<synchronous>, transform_indices = @transform_6, window_bounds = array<i64: 129, 1>}, {transform_indices = @transform_7, window_bounds = array<i64: 1, 256>}]} {
    %c0 = arith.constant 0 : index
    %c0_0 = arith.constant 0 : index
    %0 = vector.load %arg1[%c0, %c0_0] : memref<5x256xf32, #tpu.memory_space<vmem>>, vector<5x256xf32>
    %c0_1 = arith.constant 0 : index
    %c0_2 = arith.constant 0 : index
    %1 = vector.load %arg2[%c0_1, %c0_2] : memref<5x2xf32, #tpu.memory_space<vmem>>, vector<5x1xf32>
    %c0_3 = arith.constant 0 : index
    %c1 = arith.constant 1 : index
    %2 = vector.load %arg2[%c0_3, %c1] : memref<5x2xf32, #tpu.memory_space<vmem>>, vector<5x1xf32>
    %cst = arith.constant 1.000000e+00 : f32
    %3 = vector.broadcast %cst : f32 to vector<5x1xf32>
    %4 = arith.subf %3, %1 : vector<5x1xf32>
    %5 = arith.subf %4, %2 : vector<5x1xf32>
    %6 = math.cos %0 : vector<5x256xf32>
    %7 = vector.broadcast %1 : vector<5x1xf32> to vector<5x256xf32>
    %8 = arith.mulf %7, %6 : vector<5x256xf32>
    %9 = math.sin %0 : vector<5x256xf32>
    %10 = vector.broadcast %2 : vector<5x1xf32> to vector<5x256xf32>
    %11 = arith.mulf %10, %9 : vector<5x256xf32>
    %12 = arith.addf %8, %11 : vector<5x256xf32>
    %13 = vector.broadcast %5 : vector<5x1xf32> to vector<5x256xf32>
    %14 = arith.mulf %13, %0 : vector<5x256xf32>
    %15 = arith.addf %12, %14 : vector<5x256xf32>
    %c0_4 = arith.constant 0 : index
    %c0_5 = arith.constant 0 : index
    %16 = vector.load %arg3[%c0_4, %c0_5] : memref<16x5xf32, #tpu.memory_space<vmem>>, vector<16x5xf32>
    %cst_6 = arith.constant dense<0.000000e+00> : vector<16x256xf32>
    %17 = tpu.matmul %16, %15, %cst_6 {dimension_numbers = #tpu.dot_dimension_numbers<[1], [0], [0], [1], [0, 0, 1, 1], [], []>, precision = #tpu.contract_precision<fp32>} : vector<16x5xf32>, vector<5x256xf32>, vector<16x256xf32> -> vector<16x256xf32>
    %18 = math.cos %17 : vector<16x256xf32>
    %19 = math.sin %17 : vector<16x256xf32>
    %20 = tpu.concatenate %18, %19 in 0 : vector<16x256xf32>, vector<16x256xf32> -> vector<32x256xf32>
    %c0_7 = arith.constant 0 : index
    %c0_8 = arith.constant 0 : index
    %21 = vector.load %arg4[%c0_7, %c0_8] : memref<96x32xf32, #tpu.memory_space<vmem>>, vector<96x32xf32>
    %cst_9 = arith.constant dense<0.000000e+00> : vector<96x256xf32>
    %22 = tpu.matmul %21, %20, %cst_9 {dimension_numbers = #tpu.dot_dimension_numbers<[1], [0], [0], [1], [0, 0, 1, 1], [], []>, precision = #tpu.contract_precision<fp32>} : vector<96x32xf32>, vector<32x256xf32>, vector<96x256xf32> -> vector<96x256xf32>
    %c0_10 = arith.constant 0 : index
    %c0_11 = arith.constant 0 : index
    %23 = vector.load %arg7[%c0_10, %c0_11] : memref<129x1xf32, #tpu.memory_space<vmem>>, vector<96x1xf32>
    %24 = vector.broadcast %23 : vector<96x1xf32> to vector<96x256xf32>
    %25 = arith.addf %22, %24 : vector<96x256xf32>
    %26 = math.tanh %25 : vector<96x256xf32>
    %27 = vector.extract_strided_slice %26 {offsets = [0, 0], sizes = [32, 256], strides = [1, 1]} : vector<96x256xf32> to vector<32x256xf32>
    %28 = vector.extract_strided_slice %26 {offsets = [32, 0], sizes = [32, 256], strides = [1, 1]} : vector<96x256xf32> to vector<32x256xf32>
    %29 = vector.extract_strided_slice %26 {offsets = [64, 0], sizes = [32, 256], strides = [1, 1]} : vector<96x256xf32> to vector<32x256xf32>
    %30 = arith.mulf %29, %27 : vector<32x256xf32>
    %cst_12 = arith.constant 1.000000e+00 : f32
    %31 = vector.broadcast %cst_12 : f32 to vector<32x256xf32>
    %32 = arith.subf %31, %29 : vector<32x256xf32>
    %33 = arith.mulf %32, %28 : vector<32x256xf32>
    %34 = arith.addf %30, %33 : vector<32x256xf32>
    %c0_13 = arith.constant 0 : index
    %c0_14 = arith.constant 0 : index
    %35 = vector.load %arg5[%c0_13, %c0_14] : memref<32x32xf32, #tpu.memory_space<vmem>>, vector<32x32xf32>
    %cst_15 = arith.constant dense<0.000000e+00> : vector<32x256xf32>
    %36 = tpu.matmul %35, %34, %cst_15 {dimension_numbers = #tpu.dot_dimension_numbers<[1], [0], [0], [1], [0, 0, 1, 1], [], []>, precision = #tpu.contract_precision<fp32>} : vector<32x32xf32>, vector<32x256xf32>, vector<32x256xf32> -> vector<32x256xf32>
    %c96 = arith.constant 96 : index
    %c0_16 = arith.constant 0 : index
    %37 = vector.load %arg7[%c96, %c0_16] : memref<129x1xf32, #tpu.memory_space<vmem>>, vector<32x1xf32>
    %38 = vector.broadcast %37 : vector<32x1xf32> to vector<32x256xf32>
    %39 = arith.addf %36, %38 : vector<32x256xf32>
    %40 = math.tanh %39 : vector<32x256xf32>
    %41 = arith.mulf %40, %27 : vector<32x256xf32>
    %cst_17 = arith.constant 1.000000e+00 : f32
    %42 = vector.broadcast %cst_17 : f32 to vector<32x256xf32>
    %43 = arith.subf %42, %40 : vector<32x256xf32>
    %44 = arith.mulf %43, %28 : vector<32x256xf32>
    %45 = arith.addf %41, %44 : vector<32x256xf32>
    %c128 = arith.constant 128 : index
    %c0_18 = arith.constant 0 : index
    %46 = vector.load %arg7[%c128, %c0_18] : memref<129x1xf32, #tpu.memory_space<vmem>>, vector<1x1xf32>
    %c0_19 = arith.constant 0 : index
    %c0_20 = arith.constant 0 : index
    %47 = vector.load %arg6[%c0_19, %c0_20] : memref<1x32xf32, #tpu.memory_space<vmem>>, vector<1x32xf32>
    %cst_21 = arith.constant dense<0.000000e+00> : vector<1x256xf32>
    %48 = tpu.matmul %47, %45, %cst_21 {dimension_numbers = #tpu.dot_dimension_numbers<[1], [0], [0], [1], [0, 0, 1, 1], [], []>, precision = #tpu.contract_precision<fp32>} : vector<1x32xf32>, vector<32x256xf32>, vector<1x256xf32> -> vector<1x256xf32>
    %49 = vector.broadcast %46 : vector<1x1xf32> to vector<1x256xf32>
    %50 = arith.addf %48, %49 : vector<1x256xf32>
    %c0_22 = arith.constant 0 : index
    %c0_23 = arith.constant 0 : index
    %51 = vector.load %arg8[%c0_22, %c0_23] : memref<1x256xf32, #tpu.memory_space<vmem>>, vector<1x256xf32>
    tpu.vector_store %arg8[%c0_22, %c0_23], %50 {strides = array<i32>} : memref<1x256xf32, #tpu.memory_space<vmem>>, vector<1x256xf32>,
    return
  }
  func.func @transform_0(%arg0: i32) -> (i32, i32) {
    %c0_i32 = arith.constant 0 : i32
    %c0_i32_0 = arith.constant 0 : i32
    return %c0_i32, %arg0 : i32, i32
  }
  func.func @transform_1(%arg0: i32) -> (i32, i32) {
    %c0_i32 = arith.constant 0 : i32
    %c0_i32_0 = arith.constant 0 : i32
    %c0_i32_1 = arith.constant 0 : i32
    return %c0_i32, %c0_i32_0 : i32, i32
  }
  func.func @transform_2(%arg0: i32) -> (i32, i32) {
    %c0_i32 = arith.constant 0 : i32
    %c0_i32_0 = arith.constant 0 : i32
    %c0_i32_1 = arith.constant 0 : i32
    return %c0_i32, %c0_i32_0 : i32, i32
  }
  func.func @transform_3(%arg0: i32) -> (i32, i32) {
    %c0_i32 = arith.constant 0 : i32
    %c0_i32_0 = arith.constant 0 : i32
    %c0_i32_1 = arith.constant 0 : i32
    return %c0_i32, %c0_i32_0 : i32, i32
  }
  func.func @transform_4(%arg0: i32) -> (i32, i32) {
    %c0_i32 = arith.constant 0 : i32
    %c0_i32_0 = arith.constant 0 : i32
    %c0_i32_1 = arith.constant 0 : i32
    return %c0_i32, %c0_i32_0 : i32, i32
  }
  func.func @transform_5(%arg0: i32) -> (i32, i32) {
    %c0_i32 = arith.constant 0 : i32
    %c0_i32_0 = arith.constant 0 : i32
    %c0_i32_1 = arith.constant 0 : i32
    return %c0_i32, %c0_i32_0 : i32, i32
  }
  func.func @transform_6(%arg0: i32) -> (i32, i32) {
    %c0_i32 = arith.constant 0 : i32
    %c0_i32_0 = arith.constant 0 : i32
    %c0_i32_1 = arith.constant 0 : i32
    return %c0_i32, %c0_i32_0 : i32, i32
  }
  func.func @transform_7(%arg0: i32) -> (i32, i32) {
    %c0_i32 = arith.constant 0 : i32
    %c0_i32_0 = arith.constant 0 : i32
    return %c0_i32, %arg0 : i32, i32
  }
}

</mosaic_0001>

<bundles_post_ra>
// kernel: tpu_custom_call.1
= control target key start
LH: loop header
LB: loop body
LE: loop exit
PB: predicated region body
PF: predicated region fallthrough
CT: control target
= control target key end

     0   :  { %12 = vsyncpa [#allocation3], 0  ;;  %s6800_s0 = inlined_call_operand.vmem [shape: f32[5,1024], index: 0, kind: input, shape index: {}]   ;;  %s6801_s1 = inlined_call_operand.vmem [shape: f32[5,2], index: 1, kind: input, shape index: {}]   ;;  %s6802_s2 = inlined_call_operand.vmem [shape: f32[16,5], index: 2, kind: input, shape index: {}]   ;;  %s6803_s3 = inlined_call_operand.vmem [shape: f32[96,32], index: 3, kind: input, shape index: {}]   ;;  %s6804_s4 = inlined_call_operand.vmem [shape: f32[32,32], index: 4, kind: input, shape index: {}]   ;;  %s6805_s5 = inlined_call_operand.vmem [shape: f32[1,32], index: 5, kind: input, shape index: {}]   ;;  %s6806_s6 = inlined_call_operand.vmem [shape: f32[129,1], index: 6, kind: input, shape index: {}]   ;;  %s6807_s7 = inlined_call_operand.hbm [shape: f32[1,1024], index: 7, kind: output, shape index: {}]  }
   0x1   :  { %14 = vsyncpa [#allocation3 + $0x1], 0  ;;  %s5143_s24 = smov 0   ;;  %s5145_s25 = smov 0  }
   0x2   :  { %s5147_s26 = smov 0   ;;  %s5149_s27 = smov 0  }
   0x3 LB: > { %s4866_s28 = sadd.s32 4294967295, %s5092_s27   ;;  %s4867_s29 = sadd.s32 4294967294, %s5092_s27   ;;  %s5092_s27 = sphi %s5149_s27, %s6909_s27   ;;  %s5088_s26 = sphi %s5147_s26, %s6908_s26   ;;  %s5084_s25 = sphi %s5145_s25, %s6907_s25   ;;  %s5080_s24 = sphi %s5143_s24, %s6906_s24  }
   0x4   : > { %s5166_s30 = sadd.s32 1, %s5092_s27   ;;  %s179_s8 = sadd.s32 1, %s5088_s26 }
   0x5   : > { %s176_s9 = ssub.s32 %s5092_s27, %s5166_s30  ;;  %p189_p0 = scmp.ne.s32.totalorder %s5088_s26, %s5084_s25 }
   0x6   : > { %p177_p1 = scmp.eq.s32.totalorder %s176_s9, 0  ;;  %p190_p2 = scmp.eq.s32.totalorder %s4866_s28, 3 }
   0x7   : > { %p195_p3 = scmp.ne.s32.totalorder %s5084_s25, %s5080_s24  ;;  %p196_p4 = scmp.eq.s32.totalorder %s4867_s29, 3 }
   0x8   : > { %s5178_s10 = scalar_select %p177_p1, %s5088_s26, %s179_s8  }
   0x9   : > { %p5180_p5 = por %p190_p2, %p189_p0  ;;  %p5184_p6 = por %p196_p4, %p195_p3 }
   0xa   : > { %p4870_p7 = scmp.ge.s32.totalorder %s5092_s27, 1  ;;  %p241_p8 = scmp.lt.s32.totalorder %s5092_s27, 5 }
   0xc   : > { %p242_p9 = pnand %p4870_p7, %p241_p8 }
   0xe   : > { %245 = sbr.rel (%p242_p9) target bundleno = 1381 (0x565), region = 48 }
  0x13   : > { %v5193_v0 = vld [vmem:[%s6801_s1] sm:$0x1f]  ;;  %s5094_s15 = smov 127   ;;  %v5095_v1 = vmov 0   ;;  %v5096_v2 = vmov 1   ;;  %v2550_v3 = vld [vmem:[%s6806_s6 + $0x10] sm:$0xff] }
  0x14   : > { %285 = vrot.lane.b32.xlu0 %v5193_v0, %s5094_s15  ;;  %4965 = vset.pattern.permute.xlu2 %v5095_v1  ;;  %v2549_v4 = vld [vmem:[%s6806_s6 + $0x8] sm:$0xff]  ;;  %v2548_v5 = vld [vmem:[%s6806_s6] sm:$0xff]  ;;  %v3771_v6 = vld [vmem:[%s6806_s6 + $0x70] sm:$0xff]  ;;  %s5215_s29 = sshll.u32 %s4866_s28, 1  ;;  %v283_v21 = vsub.f32 1.0, %v5193_v0  ;;  %s270_s23 = sand.u32 1, %s5084_s25  }
  0x15   : > { %4962 = vset.pattern.permute.xlu0 %v5095_v1  ;;  %4963 = vset.pattern.permute.xlu1 %v5096_v2  ;;  %p274_p10 = scmp.lt.s32.totalorder %s5215_s29, 7  ;;  %v4401_v7 = vld [vmem:[%s6806_s6 + $0x80] sm:$0x1]  ;;  %v5097_v25 = vmov 2102212464   ;;  %s4871_s8 = sshll.u32 %s270_s23, 1 }
  0x16   : > { %914 = vperm.xlu1 %4963, %v5193_v0   ;;  %v5098_v27 = vmov 920167782   ;;  %v5099_v30 = vmov 683565275   ;;  %v5100_v33 = vmov 2475754826  }
  0x17   : > { %s275_s13 = scalar_select %p274_p10, %s5215_s29, 7  ;;  %v5101_v36 = vmov 2131351028   ;;  %v5102_v45 = vmov 1326507024  }
  0x18   : > { %s272_s15 = scalar_lea.vmem [#allocation2], %s4871_s8  ;;  %s4793_s28 = scalar_lea.sflag [#allocation3], %s270_s23 }
  0x19   : > { %s4873_s14 = sshll.u32 %s275_s13, 3  ;;  %s4805_s16 = sshll.u32 %s272_s15, 4  ;;  %s4806_s16 = int_to_ptr.vmem [resolvable:$true] %s4805_s16 }
  0x1a   : > { %s277_s17 = scalar_lea.vmem %s6800_s0, %s4873_s14  ;;  %s4803_s14 = scalar_lea.hbm %s6807_s7, %s5215_s29 }
  0x1b   : > { %v5225_v8 = vld [vmem:[%s277_s17] sm:$0x1f]  ;;  %v5227_v9 = vld [vmem:[%s277_s17 + $0x8] sm:$0x1f]  ;;  %s4807_s17 = sshll.u32 %s4803_s14, 4  ;;  %s5050_s21 = scalar_lea.hbm %s6807_s7, 8  ;;  %s4808_s17 = int_to_ptr.hbm [resolvable:$true] %s4807_s17 }
  0x1c   : > { %598 = vperm.xlu0 %4962, %v5193_v0   ;;  %v292_v10 = vand.u32 2139095040, %v5225_v8  ;;  %v446_v11 = vand.u32 2139095040, %v5227_v9  ;;  %v289_v24 = vand.u32 2147483647, %v5225_v8  ;;  %v443_v55 = vand.u32 2147483647, %v5227_v9 }
  0x1d   : > { %s5044_s18 = sshra.s32 %s4808_s17, 4  ;;  %s5045_s18 = int_to_ptr.hbm [resolvable:$true] %s5044_s18 }
  0x1e   : > { %4964 = vset.pattern.permute.xlu1 %v5095_v1  ;;  %v293_v12 = vshrl.u32 %v292_v10, 23  ;;  %v447_v13 = vshrl.u32 %v446_v11, 23  ;;  %v296_v29 = vand.u32 8388607, %v289_v24  ;;  %v2555_v11 = vld [vmem:[%s6806_s6 + $0x38] sm:$0xff]  ;;  %s5046_s29 = scalar_lea.hbm %s5045_s18, 2  ;;  %p5051_p0 = scmp.lt.s32.totalorder %s5045_s18, %s6807_s7 }
  0x1f   : > { %p5047_p11 = scmp.ne.s32.totalorder %s5045_s18, %s5046_s29  ;;  %p5052_p1 = scmp.lt.s32.totalorder %s5050_s21, %s5046_s29 }
  0x20   : > { %v4874_v14 = vadd.s32 4294967169, %v293_v12  ;;  %v4877_v15 = vadd.s32 4294967169, %v447_v13  ;;  %v297_v38 = vor.u32 8388608, %v296_v29 }
  0x21   : > { %p5048_p12 = pnand %p5047_p11, %p5180_p5  ;;  %p5053_p2 = por %p5052_p1, %p5051_p0 }
  0x22   : > { %v299_v16 = vadd.s32 1, %v4874_v14  ;;  %v453_v17 = vadd.s32 1, %v4877_v15  ;;  %v5269_v54 = vshll.u32 %v297_v38, 8 }
  0x23   : > { %p5049_p13 = pneg %p5048_p12 }
  0x24   : > { %2572 = vperm.xlu0 %4962, %v2550_v3   ;;  %vm300_vm0 = vcmp.gt.s32.totalorder %v299_v16, 0  ;;  %vm454_vm1 = vcmp.gt.s32.totalorder %v453_v17, 0  ;;  %v338_v61 = vand.u32 65535, %v5269_v54  ;;  %v339_v62 = vshrl.u32 %v5269_v54, 16 }
  0x25   : > { %v301_v18 = vsel %vm300_vm0, %v299_v16, 0  ;;  %v5231_v19 = vsel %vm454_vm1, %v453_v17, 0  ;;  %v5289_v3 = vand.u32 8388607, %v443_v55  ;;  %p5054_p3 = pnand %p5053_p2, %p5049_p13 }
  0x26   : > { %v303_v20 = vand.u32 31, %v301_v18  ;;  %v5237_v23 = vand.u32 31, %v5231_v19  ;;  %v5246_v32 = vshrl.u32 %v301_v18, 5  ;;  %v5302_v18 = vshrl.u32 %v5231_v19, 5 }
  0x27   : > { %v451_v17 = vor.u32 8388608, %v5289_v3 }
  0x28   : > { %v5234_v22 = vsub.s32 32, %v303_v20  ;;  %v315_v26 = vshll.u32 %v5097_v25, %v303_v20  ;;  %v306_v31 = vshll.u32 %v5099_v30, %v303_v20  ;;  %v309_v35 = vshll.u32 %v5100_v33, %v303_v20 }
  0x29   : > { %v312_v39 = vshll.u32 %v5101_v36, %v303_v20  ;;  %v318_v44 = vshll.u32 %v5098_v27, %v303_v20  ;;  %vm321_vm2 = vcmp.lt.s32.totalorder %v5246_v32, 1  ;;  %vm322_vm3 = vcmp.lt.s32.totalorder %v5246_v32, 2 }
  0x2a   : > { %v316_v28 = vshrl.u32 %v5098_v27, %v5234_v22  ;;  %v307_v34 = vshrl.u32 %v5100_v33, %v5234_v22  ;;  %v310_v37 = vshrl.u32 %v5101_v36, %v5234_v22  ;;  %v313_v40 = vshrl.u32 %v5097_v25, %v5234_v22 }
  0x2b   : > { %v319_v46 = vshrl.u32 %v5102_v45, %v5234_v22  ;;  %vm323_vm4 = vcmp.lt.s32.totalorder %v5246_v32, 3  ;;  %vm324_vm5 = vcmp.lt.s32.totalorder %v5246_v32, 4  ;;  %v5277_v58 = vsub.s32 32, %v5237_v23 }
  0x2c   : > { %2567 = vperm.xlu0 %4962, %v2549_v4   ;;  %v317_v41 = vor.u32 %v316_v28, %v315_v26  ;;  %v308_v42 = vor.u32 %v307_v34, %v306_v31  ;;  %v311_v43 = vor.u32 %v310_v37, %v309_v35  ;;  %v314_v48 = vor.u32 %v313_v40, %v312_v39 }
  0x2d   : > { %v320_v50 = vor.u32 %v319_v46, %v318_v44  ;;  %v460_v10 = vshll.u32 %v5099_v30, %v5237_v23  ;;  %v461_v15 = vshrl.u32 %v5100_v33, %v5277_v58  ;;  %v463_v20 = vshll.u32 %v5100_v33, %v5237_v23 }
  0x2e   : > { %v329_v51 = vsel %vm321_vm2, %v308_v42, %v311_v43  ;;  %v330_v52 = vsel %vm324_vm5, %v317_v41, 920167782  ;;  %v333_v53 = vsel %vm321_vm2, %v311_v43, %v314_v48  ;;  %v305_v31 = vshrl.u32 %v5099_v30, %v5234_v22 }
  0x2f   : > { %v331_v56 = vsel %vm323_vm4, %v314_v48, %v330_v52  ;;  %v334_v57 = vsel %vm324_vm5, %v320_v50, 1326507024  ;;  %v326_v34 = vsel %vm324_vm5, %v314_v48, 2102212464  ;;  %v5311_v19 = vor.u32 %v461_v15, %v460_v10  ;;  %v2554_v52 = vld [vmem:[%s6806_s6 + $0x30] sm:$0xff] }
  0x30   : > { %v332_v59 = vsel %vm322_vm3, %v329_v51, %v331_v56  ;;  %v335_v60 = vsel %vm323_vm4, %v317_v41, %v334_v57  ;;  %v464_v38 = vshrl.u32 %v5101_v36, %v5277_v58  ;;  %v466_v39 = vshll.u32 %v5101_v36, %v5237_v23 }
  0x31   : > { %v336_v63 = vsel %vm322_vm3, %v333_v53, %v335_v60  ;;  %v362_v0 = vand.u32 65535, %v332_v59  ;;  %v363_v2 = vshrl.u32 %v332_v59, 16  ;;  %v325_v40 = vsel %vm321_vm2, %v305_v31, %v308_v42 }
  0x32   : > { %v340_v4 = vand.u32 65535, %v336_v63  ;;  %v327_v22 = vsel %vm323_vm4, %v311_v43, %v326_v34  ;;  %v5330_v59 = vor.u32 %v464_v38, %v463_v20  ;;  %v467_v60 = vshrl.u32 %v5097_v25, %v5277_v58 }
  0x33   : > { %v364_v16 = vmul.u32 %v362_v0, %v338_v61  ;;  %v367_v28 = vmul.u32 %v363_v2, %v339_v62  ;;  %v328_v42 = vsel %vm322_vm3, %v325_v40, %v327_v22  ;;  %v470_v32 = vshrl.u32 %v5098_v27, %v5277_v58 }
  0x34   : > { %2562 = vperm.xlu0 %4962, %v2548_v5   ;;  %v341_v5 = vshrl.u32 %v336_v63, 16  ;;  %v342_v12 = vmul.u32 %v340_v4, %v338_v61  ;;  %v344_v14 = vmul.u32 %v340_v4, %v339_v62  ;;  %v472_v63 = vshll.u32 %v5098_v27, %v5237_v23 }
  0x35   : > { %vm475_vm10 = vcmp.lt.s32.totalorder %v5302_v18, 1  ;;  %vm477_vm11 = vcmp.lt.s32.totalorder %v5302_v18, 3  ;;  %vm478_vm12 = vcmp.lt.s32.totalorder %v5302_v18, 4  ;;  %vm476_vm13 = vcmp.lt.s32.totalorder %v5302_v18, 2 }
  0x36   : > { %v343_v13 = vmul.u32 %v341_v5, %v338_v61  ;;  %v348_v35 = vshll.u32 %v344_v14, 16  ;;  %v382_v15 = vmul.u32 %v5269_v54, %v328_v42  ;;  %v5376_v31 = vshll.u32 %v451_v17, 8 }
  0x38   : > { %v346_v26 = vshll.u32 %v343_v13, 16  ;;  %v347_v46 = vshrl.u32 %v343_v13, 16  ;;  %v493_v40 = vshrl.u32 %v5376_v31, 16 }
  0x3a   : > { %vm350_vm6 = vc.u32 %v342_v12, %v346_v26  ;;  %v352_v44 = vadd.s32 %v346_v26, %v342_v12 }
  0x3b   : > { %v351_v41 = vsel %vm350_vm6, 1, %v5095_v1  ;;  %vm291_vm6 = vcmp.lt.s32.totalorder %v5225_v8, 0 }
  0x3c   : > { %3785 = vperm.xlu0 %4962, %v3771_v6   ;;  %v365_v6 = vmul.u32 %v363_v2, %v338_v61  ;;  %vm354_vm8 = vc.u32 %v352_v44, %v348_v35 }
  0x3d   : > { %v355_v43 = vsel %vm354_vm8, 1, %v5095_v1  ;;  %vm5413_vm8 = vcmp.le.f32.partialorder %v289_v24, 0.7853982 }
  0x3e   : > { %v368_v29 = vshll.u32 %v365_v6, 16 }
  0x40   : > { %vm372_vm7 = vc.u32 %v364_v16, %v368_v29  ;;  %v374_v51 = vadd.s32 %v368_v29, %v364_v16  ;;  %v2553_v16 = vld [vmem:[%s6806_s6 + $0x28] sm:$0xff] }
  0x41   : > { %v373_v50 = vsel %vm372_vm7, 1, %v5095_v1 }
  0x42   : > { %v375_v56 = vadd.s32 %v373_v50, %v367_v28 }
  0x44   : > { %4405 = vperm.xlu0 %4962, %v4401_v7   ;;  %v5291_v7 = vmul.u32 %v362_v0, %v339_v62 }
  0x46   : > { %v370_v37 = vshll.u32 %v5291_v7, 16  ;;  %v371_v53 = vshrl.u32 %v5291_v7, 16 }
  0x48   : > { %vm376_vm9 = vc.u32 %v374_v51, %v370_v37  ;;  %v5341_v2 = vadd.s32 %v374_v51, %v370_v37 }
  0x49   : > { %v377_v61 = vsel %vm376_vm9, 1, %v5095_v1 }
  0x4a   : > { %v379_v4 = vadd.s32 %v377_v61, %v375_v56 }
  0x86   : > { %v286_v47 = vpop.permute.xlu0 %285 }
  0x87   : > { %v288_v49 = vsub.f32 %v283_v21, %v286_v47  ;;  %v345_v21 = vmul.u32 %v341_v5, %v339_v62  ;;  %v349_v47 = vshrl.u32 %v344_v14, 16  ;;  %v469_v62 = vshll.u32 %v5097_v25, %v5237_v23 }
  0x88   : > { %v473_v5 = vshrl.u32 %v5102_v45, %v5277_v58  ;;  %v483_v23 = vsel %vm475_vm10, %v5311_v19, %v5330_v59 }
  0x89   : > { %923 = vperm.xlu1 %4964, %v288_v49   ;;  %v353_v48 = vadd.s32 %v351_v41, %v345_v21  ;;  %v369_v49 = vshrl.u32 %v365_v6, 16  ;;  %v468_v6 = vor.u32 %v467_v60, %v466_v39  ;;  %v471_v7 = vor.u32 %v470_v32, %v469_v62 }
  0x8a   : > { %v474_v12 = vor.u32 %v473_v5, %v472_v63  ;;  %v492_v39 = vand.u32 65535, %v5376_v31  ;;  %v459_v32 = vshrl.u32 %v5099_v30, %v5277_v58 }
  0x8b   : > { %v357_v57 = vadd.s32 %v355_v43, %v353_v48  ;;  %v484_v13 = vsel %vm478_vm12, %v471_v7, 920167782  ;;  %v487_v21 = vsel %vm475_vm10, %v5330_v59, %v468_v6 }
  0x8c   : > { %v485_v20 = vsel %vm477_vm11, %v468_v6, %v484_v13  ;;  %v488_v26 = vsel %vm478_vm12, %v474_v12, 1326507024 }
  0x8d   : > { %v358_v0 = vadd.s32 %v357_v57, %v347_v46  ;;  %v486_v54 = vsel %vm476_vm13, %v483_v23, %v485_v20  ;;  %v489_v29 = vsel %vm477_vm11, %v471_v7, %v488_v26 }
  0x8e   : > { %v490_v34 = vsel %vm476_vm13, %v487_v21, %v489_v29  ;;  %v516_v35 = vand.u32 65535, %v486_v54  ;;  %v517_v37 = vshrl.u32 %v486_v54, 16  ;;  %v3770_v54 = vld [vmem:[%s6806_s6 + $0x68] sm:$0xff] }
  0x8f   : > { %v5347_v10 = vadd.s32 %v358_v0, %v349_v47  ;;  %v494_v22 = vand.u32 65535, %v490_v34  ;;  %v495_v44 = vshrl.u32 %v490_v34, 16  ;;  %v480_v0 = vsel %vm478_vm12, %v468_v6, 2102212464 }
  0x90   : > { %v518_v47 = vmul.u32 %v516_v35, %v492_v39  ;;  %v519_v48 = vmul.u32 %v517_v37, %v492_v39  ;;  %v520_v50 = vmul.u32 %v516_v35, %v493_v40  ;;  %v521_v57 = vmul.u32 %v517_v37, %v493_v40 }
  0x91   : > { %2597 = vperm.xlu1 %4964, %v2555_v11   ;;  %v380_v11 = vadd.s32 %v379_v4, %v369_v49  ;;  %vm384_vm14 = vc.u32 %v5347_v10, %v5341_v2  ;;  %v498_v46 = vmul.u32 %v494_v22, %v493_v40  ;;  %v496_v17 = vmul.u32 %v494_v22, %v492_v39 }
  0x92   : > { %v497_v49 = vmul.u32 %v495_v44, %v492_v39  ;;  %v522_v51 = vshll.u32 %v519_v48, 16  ;;  %v499_v43 = vmul.u32 %v495_v44, %v493_v40  ;;  %v524_v60 = vshll.u32 %v520_v50, 16 }
  0x93   : > { %v381_v14 = vadd.s32 %v380_v11, %v371_v53  ;;  %v502_v56 = vshll.u32 %v498_v46, 16  ;;  %v523_v13 = vshrl.u32 %v519_v48, 16  ;;  %v479_v6 = vsel %vm475_vm10, %v459_v32, %v5311_v19 }
  0x94   : > { %v500_v53 = vshll.u32 %v497_v49, 16  ;;  %vm526_vm15 = vc.u32 %v518_v47, %v522_v51  ;;  %v528_v61 = vadd.s32 %v522_v51, %v518_v47  ;;  %v501_v11 = vshrl.u32 %v497_v49, 16 }
  0x95   : > { %v385_v28 = vadd.s32 1, %v381_v14  ;;  %v527_v5 = vsel %vm526_vm15, 1, %v5095_v1  ;;  %v481_v21 = vsel %vm477_vm11, %v5330_v59, %v480_v0  ;;  %v525_v26 = vshrl.u32 %v520_v50, 16 }
  0x96   : > { %vm504_vm0 = vc.u32 %v496_v17, %v500_v53  ;;  %v506_v63 = vadd.s32 %v500_v53, %v496_v17  ;;  %vm530_vm1 = vc.u32 %v528_v61, %v524_v60  ;;  %v532_v37 = vadd.s32 %v528_v61, %v524_v60 }
  0x97   : > { %v386_v38 = vsel %vm384_vm14, %v385_v28, %v381_v14  ;;  %v505_v4 = vsel %vm504_vm0, 1, %v5095_v1  ;;  %v529_v14 = vadd.s32 %v527_v5, %v521_v57  ;;  %v531_v58 = vsel %vm530_vm1, 1, %v5095_v1 }
  0x98   : > { %v387_v41 = vadd.s32 %v386_v38, %v382_v15  ;;  %v507_v12 = vadd.s32 %v505_v4, %v499_v43  ;;  %vm508_vm2 = vc.u32 %v506_v63, %v502_v56  ;;  %v482_v39 = vsel %vm476_vm13, %v479_v6, %v481_v21 }
  0x99   : > { %2592 = vperm.xlu1 %4964, %v2554_v52   ;;  %v2552_v52 = vld [vmem:[%s6806_s6 + $0x20] sm:$0xff]  ;;  %v509_v23 = vsel %vm508_vm2, 1, %v5095_v1  ;;  %v533_v28 = vadd.s32 %v531_v58, %v529_v14  ;;  %v383_v59 = vadd.s32 %v5341_v2, %v5347_v10  ;;  %vm445_vm10 = vcmp.lt.s32.totalorder %v5227_v9, 0 }
  0x9a   : > { %v388_v3 = vadd.s32 536870912, %v387_v41  ;;  %v511_v20 = vadd.s32 %v509_v23, %v507_v12  ;;  %vm5425_vm11 = vcmp.le.f32.partialorder %v443_v55, 0.7853982  ;;  %vm932_vm12 = vcmask 39936  }
  0x9b   : > { %v534_v38 = vadd.s32 %v533_v28, %v523_v13 }
  0x9c   : > { %v5385_v42 = vshrl.u32 %v388_v3, 30  ;;  %v512_v34 = vadd.s32 %v511_v20, %v501_v11 }
  0x9d   : > { %v535_v22 = vadd.s32 %v534_v38, %v525_v26 }
  0x9e   : > { %v390_v62 = vshll.u32 %v5385_v42, 30 }
  0x9f   : > { %v539_v44 = vadd.s32 1, %v535_v22 }
  0xa0   : > { %v391_v7 = vsub.s32 %v387_v41, %v390_v62  ;;  %v536_v41 = vmul.u32 %v5376_v31, %v482_v39 }
  0xa1   : > { %2587 = vperm.xlu1 %4964, %v2553_v16   ;;  %v503_v16 = vshrl.u32 %v498_v46, 16 }
  0xa2   : > { %vm392_vm3 = vcmp.lt.s32.totalorder %v391_v7, 0  ;;  %v393_v15 = vsub.s32 0, %v391_v7 }
  0xa3   : > { %v513_v40 = vadd.s32 %v512_v34, %v503_v16 }
  0xa4   : > { %v394_v29 = vsel %vm392_vm3, %v393_v15, %v391_v7 }
  0xa5   : > { %v395_v35 = vclz %v394_v29  ;;  %vm538_vm5 = vc.u32 %v513_v40, %v532_v37  ;;  %v537_v11 = vadd.s32 %v532_v37, %v513_v40  ;;  %v413_v40 = vsub.s32 4, %v5385_v42 }
  0xa6   : > { %v540_v17 = vsel %vm538_vm5, %v539_v44, %v535_v22 }
  0xa7   : > { %v4875_v19 = vadd.s32 4294967294, %v395_v35  ;;  %v541_v50 = vadd.s32 %v540_v17, %v536_v41 }
  0xa9   : > { %2582 = vperm.xlu1 %4964, %v2552_v52   ;;  %vm4876_vm4 = vcmp.lt.s32.totalorder %v4875_v19, 0  ;;  %v542_v43 = vadd.s32 536870912, %v541_v50 }
  0xaa   : > { %v398_v46 = vsel %vm4876_vm4, 0, %v4875_v19 }
  0xab   : > { %v399_v47 = vsub.s32 32, %v398_v46  ;;  %v400_v48 = vshll.u32 %v391_v7, %v398_v46  ;;  %v403_v3 = vsub.s32 4294967266, %v398_v46  ;;  %v543_v57 = vshrl.u32 %v542_v43, 30 }
  0xad   : > { %v401_v49 = vshrl.u32 %v383_v59, %v399_v47  ;;  %v404_v18 = vadd.s32 127, %v403_v3  ;;  %v544_v10 = vshll.u32 %v543_v57, 30  ;;  %v567_v41 = vsub.s32 4, %v543_v57 }
  0xae   : > { %v414_v47 = vsel %vm291_vm6, %v413_v40, %v5385_v42 }
  0xaf   : > { %v402_v51 = vor.u32 %v401_v49, %v400_v48  ;;  %v405_v52 = vshll.u32 %v404_v18, 23  ;;  %v545_v31 = vsub.s32 %v541_v50, %v544_v10  ;;  %v568_v3 = vsel %vm445_vm10, %v567_v41, %v543_v57 }
  0xb0   : > { %v416_v18 = vsel %vm5413_vm8, 0, %v414_v47  ;;  %v570_v43 = vsel %vm5425_vm11, 0, %v568_v3 }
  0xb1   : > { %3780 = vperm.xlu1 %4964, %v3770_v54   ;;  %v406_v53 = vor.u32 4788187, %v405_v52  ;;  %v409_v56 = vcvt.s32.f32 %v402_v51  ;;  %vm546_vm7 = vcmp.lt.s32.totalorder %v545_v31, 0  ;;  %v547_v62 = vsub.s32 0, %v545_v31 }
  0xb2   : > { %v747_v10 = vadd.s32 3, %v416_v18  ;;  %v433_v57 = vand.u32 3, %v416_v18  ;;  %v587_v32 = vand.u32 3, %v570_v43 }
  0xb3   : > { %v407_v2 = vand.u32 2147483647, %v406_v53  ;;  %v548_v0 = vsel %vm546_vm7, %v547_v62, %v545_v31 }
  0xb4   : > { %v549_v4 = vclz %v548_v0  ;;  %vm434_vm13 = vcmp.lt.s32.totalorder %v433_v57, 2  ;;  %vm435_vm14 = vcmp.eq.s32.totalorder %v433_v57, 0  ;;  %vm438_vm15 = vcmp.eq.s32.totalorder %v433_v57, 2 }
  0xb5   : > { %v410_v60 = vmul.f32 %v409_v56, %v407_v2  ;;  %vm589_vm0 = vcmp.eq.s32.totalorder %v587_v32, 0  ;;  %vm592_vm3 = vcmp.eq.s32.totalorder %v587_v32, 2 }
  0xb6   : > { %v4878_v7 = vadd.s32 4294967294, %v549_v4  ;;  %v748_v4 = vand.u32 3, %v747_v10 }
  0xb7   : > { %v411_v61 = vxor.u32 2147483648, %v410_v60 }
  0xb8   : > { %vm4879_vm9 = vcmp.lt.s32.totalorder %v4878_v7, 0  ;;  %vm750_vm1 = vcmp.eq.s32.totalorder %v748_v4, 0  ;;  %vm753_vm2 = vcmp.eq.s32.totalorder %v748_v4, 2  ;;  %vm749_vm7 = vcmp.lt.s32.totalorder %v748_v4, 2 }
  0xb9   : > { %v412_v63 = vsel %vm291_vm6, %v411_v61, %v410_v60  ;;  %v552_v23 = vsel %vm4879_vm9, 0, %v4878_v7  ;;  %vm588_vm6 = vcmp.lt.s32.totalorder %v587_v32, 2  ;;  %vm432_vm9 = vweird.f32 %v5225_v8 }
  0xba   : > { %v415_v5 = vsel %vm5413_vm8, %v5225_v8, %v412_v63  ;;  %v553_v13 = vsub.s32 32, %v552_v23  ;;  %v554_v14 = vshll.u32 %v545_v31, %v552_v23  ;;  %v557_v24 = vsub.s32 4294967266, %v552_v23  ;;  %v930_v23 = vld [vmem:[%s6802_s2] sm:$0xff] }
  0xbb   : > { %v417_v12 = vmul.f32 %v415_v5, %v415_v5  ;;  %v902_v31 = vadd.s32 3, %v570_v43 }
  0xbc   : > { %v555_v58 = vshrl.u32 %v537_v11, %v553_v13  ;;  %v558_v16 = vadd.s32 127, %v557_v24 }
  0xbd   : > { %v425_v15 = vmul.f32 -0.00019511016, %v417_v12  ;;  %v418_v21 = vmul.f32 -0.001358992, %v417_v12 }
  0xbe   : > { %v556_v20 = vor.u32 %v555_v58, %v554_v14  ;;  %v559_v6 = vshll.u32 %v558_v16, 23  ;;  %v934_v58 = vsel %vm932_vm12, %v930_v23, 0 }
  0xbf   : > { %v426_v26 = vadd.f32 0.008332121, %v425_v15  ;;  %v419_v34 = vadd.f32 0.041655596, %v418_v21 }
  0xc0   : > { %v560_v28 = vor.u32 4788187, %v559_v6  ;;  %v563_v54 = vcvt.s32.f32 %v556_v20 }
  0xc1   : > { %v427_v35 = vmul.f32 %v426_v26, %v417_v12  ;;  %v420_v19 = vmul.f32 %v419_v34, %v417_v12  ;;  %v5445_v26 = vand.u32 4294901760, %v934_v58 }
  0xc2   : > { %v561_v29 = vand.u32 2147483647, %v560_v28 }
  0xc3   : > { %v428_v22 = vadd.f32 -0.16666654, %v427_v35  ;;  %v421_v55 = vadd.f32 -0.4999988, %v420_v19  ;;  %v931_v19 = vld [vmem:[%s6802_s2 + $0x8] sm:$0xff] }
  0xc4   : > { %v564_v38 = vmul.f32 %v563_v54, %v561_v29  ;;  %v937_v47 = vsel %vm932_vm12, %v931_v19, 0 }
  0xc5   : > { %v429_v48 = vmul.f32 %v428_v22, %v417_v12  ;;  %v422_v52 = vmul.f32 %v421_v55, %v417_v12  ;;  %v903_v12 = vand.u32 3, %v902_v31  ;;  %v5456_v22 = vsub.f32 %v934_v58, %v5445_v26  ;;  %v599_v55 = vpop.permute.xlu0 %598 }
  0xc6   : > { %v565_v39 = vxor.u32 2147483648, %v564_v38 }
  0xc7   : > { %v430_v53 = vadd.f32 1.0, %v429_v48  ;;  %v423_v61 = vadd.f32 1.0, %v422_v52  ;;  %vm905_vm4 = vcmp.eq.s32.totalorder %v903_v12, 0  ;;  %vm908_vm5 = vcmp.eq.s32.totalorder %v903_v12, 2 }
  0xc8   : > { %v566_v59 = vsel %vm445_vm10, %v565_v39, %v564_v38  ;;  %vm904_vm8 = vcmp.lt.s32.totalorder %v903_v12, 2  ;;  %v915_v38 = vpop.permute.xlu1 %914  ;;  %vm586_vm10 = vweird.f32 %v5227_v9 }
  0xc9   : > { %v569_v44 = vsel %vm5425_vm11, %v5227_v9, %v566_v59  ;;  %v431_v62 = vmul.f32 %v430_v53, %v415_v5  ;;  %v439_v13 = vxor.u32 2147483648, %v423_v61  ;;  %vm939_vm11 = vcmask 1044480  }
  0xca   : > { %v571_v46 = vmul.f32 %v569_v44, %v569_v44 }
  0xcb   : > { %v436_v14 = vxor.u32 2147483648, %v431_v62  ;;  %v440_v16 = vsel %vm438_vm15, %v439_v13, %v431_v62  ;;  %v755_v21 = vsel %vm753_vm2, %v439_v13, %v431_v62 }
  0xcc   : > { %v572_v17 = vmul.f32 -0.001358992, %v571_v46  ;;  %v579_v49 = vmul.f32 -0.00019511016, %v571_v46 }
  0xcd   : > { %v437_v20 = vsel %vm435_vm14, %v423_v61, %v436_v14  ;;  %v752_v6 = vsel %vm750_vm1, %v423_v61, %v436_v14 }
  0xce   : > { %v573_v50 = vadd.f32 0.041655596, %v572_v17  ;;  %v580_v51 = vadd.f32 0.008332121, %v579_v49  ;;  %v441_v35 = vsel %vm434_vm13, %v437_v20, %v440_v16  ;;  %v756_v37 = vsel %vm749_vm7, %v752_v6, %v755_v21 }
  0xcf   : > { %v442_v59 = vsel %vm432_vm9, nan, %v441_v35  ;;  %v757_v41 = vsel %vm432_vm9, nan, %v756_v37  ;;  %v965_v17 = vand.u32 4294901760, %v5456_v22 }
  0xd0   : > { %v574_v56 = vmul.f32 %v573_v50, %v571_v46  ;;  %v581_v2 = vmul.f32 %v580_v51, %v571_v46  ;;  %v601_v48 = vmul.f32 %v599_v55, %v442_v59  ;;  %v917_v3 = vmul.f32 %v915_v38, %v757_v41 }
  0xd1   : > { %v971_v50 = vand.u32 4294901760, %v937_v47  ;;  %v966_v43 = vsub.f32 %v5456_v22, %v965_v17 }
  0xd2   : > { %v575_v60 = vadd.f32 -0.4999988, %v574_v56  ;;  %v582_v42 = vadd.f32 -0.16666654, %v581_v2  ;;  %v919_v51 = vadd.f32 %v917_v3, %v601_v48 }
  0xd3   : > { %v972_v10 = vsub.f32 %v937_v47, %v971_v50  ;;  %v967_v57 = vand.u32 4294901760, %v966_v43 }
  0xd4   : > { %v576_v63 = vmul.f32 %v575_v60, %v571_v46  ;;  %v583_v0 = vmul.f32 %v582_v42, %v571_v46 }
  0xd5   : > { %v973_v62 = vand.u32 4294901760, %v972_v10 }
  0xd6   : > { %v577_v7 = vadd.f32 1.0, %v576_v63  ;;  %v584_v11 = vadd.f32 1.0, %v583_v0 }
  0xd8   : > { %v585_v24 = vmul.f32 %v584_v11, %v569_v44  ;;  %v593_v5 = vxor.u32 2147483648, %v577_v7 }
  0xda   : > { %v590_v15 = vxor.u32 2147483648, %v585_v24  ;;  %v594_v54 = vsel %vm592_vm3, %v593_v5, %v585_v24  ;;  %v910_v34 = vsel %vm908_vm5, %v593_v5, %v585_v24 }
  0xdc   : > { %v591_v28 = vsel %vm589_vm0, %v577_v7, %v590_v15  ;;  %v907_v29 = vsel %vm905_vm4, %v577_v7, %v590_v15  ;;  %v974_v7 = vsub.f32 %v972_v10, %v973_v62 }
  0xdd   : > { %v595_v39 = vsel %vm588_vm6, %v591_v28, %v594_v54  ;;  %v911_v40 = vsel %vm904_vm8, %v907_v29, %v910_v34 }
  0xde   : > { %v596_v44 = vsel %vm586_vm10, nan, %v595_v39  ;;  %v912_v46 = vsel %vm586_vm10, nan, %v911_v40  ;;  %v975_v23 = vand.u32 4294901760, %v974_v7 }
  0xdf   : > { %v602_v49 = vmul.f32 %v599_v55, %v596_v44  ;;  %v918_v18 = vmul.f32 %v915_v38, %v912_v46 }
  0xe1   : > { %v920_v53 = vadd.f32 %v918_v18, %v602_v49 }
  0xfb   : > { %v924_v52 = vpop.permute.xlu1 %923 }
  0xfc   : > { %v926_v56 = vmul.f32 %v924_v52, %v5225_v8  ;;  %v927_v2 = vmul.f32 %v924_v52, %v5227_v9 }
  0xfe   : > { %v928_v60 = vadd.f32 %v926_v56, %v919_v51  ;;  %v929_v42 = vadd.f32 %v927_v2, %v920_v53 }
 0x100   : > { %v941_v31 = vsel %vm939_vm11, %v928_v60, 0  ;;  %v944_v61 = vsel %vm939_vm11, %v929_v42, 0 }
 0x101   : > { %v961_v63 = vand.u32 4294901760, %v941_v31  ;;  %v1138_v0 = vand.u32 4294901760, %v944_v61 }
 0x103   : > { %v1173_v32 = vsub.f32 %v944_v61, %v1138_v0  ;;  %962 = vmatpush.msra.mxu0 %v961_v63  ;;  %1055 = vmatpush.msra.mxu3 %v961_v63  ;;  %v996_v4 = vsub.f32 %v941_v31, %v961_v63 }
 0x104   : > { %968 = vmatmul.f32.vlgmr.msra.gmra.mxu0 %v967_v57  ;;  %1059 = vmatmul.f32.vlgmr.msra.gmra.mxu3 %v965_v17 }
 0x105   : > { %1027 = vmatpush.msra.mxu2 %v996_v4  ;;  %v997_v8 = vand.u32 4294901760, %v996_v4  ;;  %v1174_v9 = vand.u32 4294901760, %v1173_v32 }
 0x106   : > { %1030 = vmatmul.f32.vlgmr.msra.gmra.mxu2 %v5456_v22 }
 0x107   : > { %1139 = vmatpush.msrb.mxu2 %v1138_v0  ;;  %1087 = vmatpush.msrb.mxu0 %v997_v8  ;;  %v998_v11 = vsub.f32 %v996_v4, %v997_v8  ;;  %v1175_v12 = vsub.f32 %v1173_v32, %v1174_v9 }
 0x109   : > { %1264 = vmatpush.msra.mxu2 %v1174_v9  ;;  %1204 = vmatpush.msra.mxu0 %v1173_v32  ;;  %v999_v13 = vand.u32 4294901760, %v998_v11  ;;  %v1176_v14 = vand.u32 4294901760, %v1175_v12 }
 0x10b   : > { %1000 = vmatpush.msra.mxu1 %v999_v13  ;;  %1177 = vmatpush.msrb.mxu3 %v1176_v14 }
 0x10c   : > { %976 = vmatmul.f32.gmra.mxu0 %v975_v23  ;;  %1002 = vmatmul.f32.vlgmr.msra.gmra.mxu1 %v5445_v26 }
 0x10d   : > { %1113 = vmatpush.msrb.mxu1 %v961_v63  ;;  %1290 = vmatpush.msra.mxu3 %v1138_v0 }
 0x10e   : > { %1065 = vmatmul.f32.gmra.mxu3 %v973_v62  ;;  %1035 = vmatmul.f32.gmra.mxu2 %v972_v10 }
 0x10f   : > { %1232 = vmatpush.msra.mxu1 %v1138_v0 }
 0x114   : > { %1006 = vmatmul.f32.gmra.mxu1 %v971_v50  ;;  %1089 = vmatmul.f32.vlgmr.msrb.gmra.mxu0 %v5445_v26 }
 0x116   : > { %1179 = vmatmul.f32.vlgmr.msrb.gmra.mxu3 %v5445_v26  ;;  %1145 = vmatmul.f32.vlgmr.msrb.gmra.mxu2 %v967_v57 }
 0x11c   : > { %1093 = vmatmul.f32.gmra.mxu0 %v971_v50  ;;  %1115 = vmatmul.f32.vlgmr.msrb.gmra.mxu1 %v5445_v26 }
 0x11e   : > { %1183 = vmatmul.f32.gmra.mxu3 %v971_v50  ;;  %1153 = vmatmul.f32.gmra.mxu2 %v975_v23 }
 0x124   : > { %1119 = vmatmul.f32.gmra.mxu1 %v971_v50  ;;  %1207 = vmatmul.f32.vlgmr.msra.gmra.mxu0 %v5456_v22 }
 0x126   : > { %1292 = vmatmul.f32.vlgmr.msra.gmra.mxu3 %v5445_v26  ;;  %1266 = vmatmul.f32.vlgmr.msra.gmra.mxu2 %v5445_v26 }
 0x12c   : > { %1236 = vmatmul.f32.vlgmr.msra.gmra.mxu1 %v965_v17  ;;  %1212 = vmatmul.f32.gmra.mxu0 %v972_v10 }
 0x12e   : > { %1296 = vmatmul.f32.gmra.mxu3 %v971_v50  ;;  %1270 = vmatmul.f32.gmra.mxu2 %v971_v50 }
 0x134   : > { %1242 = vmatmul.f32.gmra.mxu1 %v973_v62 }
 0x181   : > { %v969_v24 = vpop.f32.mrf.mxu0 }
 0x187   : > { %v1060_v20 = vpop.f32.mrf.mxu3 }
 0x189   : > { %v977_v5 = vpop.f32.mrf.mxu0  ;;  %v1003_v58 = vpop.f32.mrf.mxu1 }
 0x18a   : > { %v1031_v15 = vpop.f32.mrf.mxu2  ;;  %v1004_v16 = vadd.f32 %v1003_v58, %v969_v24 }
 0x18c   : > { %v1032_v21 = vadd.f32 %v1031_v15, %v1004_v16 }
 0x18e   : > { %v1061_v54 = vadd.f32 %v1060_v20, %v1032_v21 }
 0x191   : > { %v1007_v6 = vpop.f32.mrf.mxu1  ;;  %v1090_v28 = vpop.f32.mrf.mxu0 }
 0x192   : > { %v1008_v29 = vadd.f32 %v1007_v6, %v977_v5  ;;  %v1036_v34 = vpop.f32.mrf.mxu2  ;;  %v1091_v35 = vadd.f32 %v1090_v28, %v1061_v54  ;;  %v1066_v38 = vpop.f32.mrf.mxu3 }
 0x194   : > { %v1037_v37 = vadd.f32 %v1036_v34, %v1008_v29 }
 0x196   : > { %v1067_v59 = vadd.f32 %v1066_v38, %v1037_v37 }
 0x199   : > { %v1116_v26 = vpop.f32.mrf.mxu1  ;;  %v1094_v40 = vpop.f32.mrf.mxu0 }
 0x19a   : > { %v5471_v39 = vadd.f32 %v1116_v26, %v1091_v35  ;;  %v1095_v46 = vadd.f32 %v1094_v40, %v1067_v59  ;;  %v1146_v17 = vpop.f32.mrf.mxu2  ;;  %v1180_v49 = vpop.f32.mrf.mxu3 }
 0x19b   : > { %v1181_v50 = vadd.f32 %v1180_v49, %v1146_v17 }
 0x19c   : > { %v1300_v19 = vand.u32 2147483647, %v5471_v39  ;;  %v1303_v22 = vand.u32 2139095040, %v5471_v39 }
 0x19e   : > { %v1304_v41 = vshrl.u32 %v1303_v22, 23  ;;  %v1307_v44 = vand.u32 8388607, %v1300_v19 }
 0x1a0   : > { %v4886_v47 = vadd.s32 4294967169, %v1304_v41  ;;  %v1308_v55 = vor.u32 8388608, %v1307_v44 }
 0x1a1   : > { %v1120_v48 = vpop.f32.mrf.mxu1  ;;  %v1208_v43 = vpop.f32.mrf.mxu0 }
 0x1a2   : > { %v1310_v3 = vadd.s32 1, %v4886_v47  ;;  %v5477_v18 = vadd.f32 %v1120_v48, %v1095_v46  ;;  %v5479_v51 = vshll.u32 %v1308_v55, 8  ;;  %v1209_v60 = vadd.f32 %v1208_v43, %v1181_v50 }
 0x1a4   : > { %vm1311_vm12 = vcmp.gt.s32.totalorder %v1310_v3, 0  ;;  %v1608_v52 = vand.u32 2147483647, %v5477_v18  ;;  %v1611_v56 = vand.u32 2139095040, %v5477_v18  ;;  %v1349_v31 = vand.u32 65535, %v5479_v51 }
 0x1a5   : > { %v1312_v53 = vsel %vm1311_vm12, %v1310_v3, 0  ;;  %v1350_v59 = vshrl.u32 %v5479_v51, 16 }
 0x1a6   : > { %v1314_v2 = vand.u32 31, %v1312_v53  ;;  %v1313_v10 = vshrl.u32 %v1312_v53, 5  ;;  %v1612_v61 = vshrl.u32 %v1611_v56, 23  ;;  %v1615_v57 = vand.u32 8388607, %v1608_v52 }
 0x1a8   : > { %v1315_v42 = vsub.s32 32, %v1314_v2  ;;  %v1317_v62 = vshll.u32 %v5099_v30, %v1314_v2  ;;  %v1320_v63 = vshll.u32 %v5100_v33, %v1314_v2  ;;  %v1323_v0 = vshll.u32 %v5101_v36, %v1314_v2 }
 0x1a9   : > { %v1326_v32 = vshll.u32 %v5097_v25, %v1314_v2  ;;  %v1329_v9 = vshll.u32 %v5098_v27, %v1314_v2  ;;  %vm1332_vm13 = vcmp.lt.s32.totalorder %v1313_v10, 1  ;;  %vm1333_vm14 = vcmp.lt.s32.totalorder %v1313_v10, 2  ;;  %v1237_v37 = vpop.f32.mrf.mxu1 }
 0x1aa   : > { %v1318_v4 = vshrl.u32 %v5100_v33, %v1315_v42  ;;  %v1321_v7 = vshrl.u32 %v5101_v36, %v1315_v42  ;;  %v1324_v8 = vshrl.u32 %v5097_v25, %v1315_v42  ;;  %v1327_v11 = vshrl.u32 %v5098_v27, %v1315_v42 }
 0x1ab   : > { %v1330_v12 = vshrl.u32 %v5102_v45, %v1315_v42  ;;  %v4892_v24 = vadd.s32 4294967169, %v1612_v61  ;;  %v1316_v5 = vshrl.u32 %v5099_v30, %v1315_v42  ;;  %vm1335_vm15 = vcmp.lt.s32.totalorder %v1313_v10, 4 }
 0x1ac   : > { %v1319_v23 = vor.u32 %v1318_v4, %v1317_v62  ;;  %v1322_v13 = vor.u32 %v1321_v7, %v1320_v63  ;;  %v1325_v14 = vor.u32 %v1324_v8, %v1323_v0  ;;  %v1328_v58 = vor.u32 %v1327_v11, %v1326_v32  ;;  %v5510_v63 = vpop.f32.mrf.mxu2 }
 0x1ad   : > { %v1331_v15 = vor.u32 %v1330_v12, %v1329_v9  ;;  %vm1334_vm0 = vcmp.lt.s32.totalorder %v1313_v10, 3  ;;  %v1616_v54 = vor.u32 8388608, %v1615_v57  ;;  %v1618_v29 = vadd.s32 1, %v4892_v24 }
 0x1ae   : > { %v1337_v16 = vsel %vm1335_vm15, %v1325_v14, 2102212464  ;;  %v1340_v20 = vsel %vm1332_vm13, %v1319_v23, %v1322_v13  ;;  %v1344_v6 = vsel %vm1332_vm13, %v1322_v13, %v1325_v14  ;;  %v1341_v21 = vsel %vm1335_vm15, %v1328_v58, 920167782 }
 0x1af   : > { %v1345_v28 = vsel %vm1335_vm15, %v1331_v15, 1326507024  ;;  %v1336_v34 = vsel %vm1332_vm13, %v1316_v5, %v1319_v23  ;;  %v1338_v35 = vsel %vm1334_vm0, %v1322_v13, %v1337_v16  ;;  %v1342_v38 = vsel %vm1334_vm0, %v1325_v14, %v1341_v21 }
 0x1b0   : > { %v1346_v26 = vsel %vm1334_vm0, %v1328_v58, %v1345_v28  ;;  %v1343_v40 = vsel %vm1333_vm14, %v1340_v20, %v1342_v38  ;;  %vm1619_vm1 = vcmp.gt.s32.totalorder %v1618_v29, 0  ;;  %v5504_v55 = vsel %vm1333_vm14, %v1336_v34, %v1338_v35  ;;  %v5517_v58 = vpop.f32.mrf.mxu3 }
 0x1b1   : > { %v1347_v22 = vsel %vm1333_vm14, %v1344_v6, %v1346_v26  ;;  %v1373_v46 = vand.u32 65535, %v1343_v40  ;;  %v1374_v47 = vshrl.u32 %v1343_v40, 16  ;;  %v5506_v48 = vadd.f32 %v1237_v37, %v1209_v60 }
 0x1b2   : > { %v1351_v41 = vand.u32 65535, %v1347_v22  ;;  %v1352_v44 = vshrl.u32 %v1347_v22, 16  ;;  %v1620_v49 = vsel %vm1619_vm1, %v1618_v29, 0  ;;  %v5508_v50 = vshll.u32 %v1616_v54, 8 }
 0x1b3   : > { %v1376_v56 = vmul.u32 %v1374_v47, %v1349_v31  ;;  %v1377_v2 = vmul.u32 %v1373_v46, %v1350_v59  ;;  %v1375_v57 = vmul.u32 %v1373_v46, %v1349_v31  ;;  %v1378_v62 = vmul.u32 %v1374_v47, %v1350_v59 }
 0x1b4   : > { %v1354_v3 = vmul.u32 %v1352_v44, %v1349_v31  ;;  %v1355_v17 = vmul.u32 %v1351_v41, %v1350_v59  ;;  %v1353_v43 = vmul.u32 %v1351_v41, %v1349_v31  ;;  %v1356_v53 = vmul.u32 %v1352_v44, %v1350_v59 }
 0x1b5   : > { %v1379_v32 = vshll.u32 %v1376_v56, 16  ;;  %v1380_v60 = vshrl.u32 %v1376_v56, 16  ;;  %v1381_v7 = vshll.u32 %v1377_v2, 16  ;;  %v1622_v8 = vand.u32 31, %v1620_v49 }
 0x1b6   : > { %v1357_v42 = vshll.u32 %v1354_v3, 16  ;;  %v1358_v61 = vshrl.u32 %v1354_v3, 16  ;;  %v1359_v10 = vshll.u32 %v1355_v17, 16  ;;  %v1360_v0 = vshrl.u32 %v1355_v17, 16  ;;  %v1267_v3 = vpop.f32.mrf.mxu2 }
 0x1b7   : > { %v1382_v11 = vshrl.u32 %v1377_v2, 16  ;;  %vm1383_vm3 = vc.u32 %v1375_v57, %v1379_v32  ;;  %v1385_v12 = vadd.s32 %v1379_v32, %v1375_v57  ;;  %v1623_v13 = vsub.s32 32, %v1622_v8 }
 0x1b8   : > { %vm1361_vm2 = vc.u32 %v1353_v43, %v1357_v42  ;;  %v1363_v4 = vadd.s32 %v1357_v42, %v1353_v43  ;;  %v1384_v31 = vsel %vm1383_vm3, 1, %v5095_v1  ;;  %v5515_v5 = vshrl.u32 %v1620_v49, 5 }
 0x1b9   : > { %v1362_v9 = vsel %vm1361_vm2, 1, %v5095_v1  ;;  %v1386_v24 = vadd.s32 %v1384_v31, %v1378_v62  ;;  %vm1387_vm5 = vc.u32 %v1385_v12, %v1381_v7  ;;  %v5520_v20 = vadd.s32 %v1385_v12, %v1381_v7 }
 0x1ba   : > { %v1364_v23 = vadd.s32 %v1362_v9, %v1356_v53  ;;  %vm1365_vm4 = vc.u32 %v1363_v4, %v1359_v10  ;;  %v1388_v16 = vsel %vm1387_vm5, 1, %v5095_v1  ;;  %v1625_v6 = vshll.u32 %v5099_v30, %v1622_v8 }
 0x1bb   : > { %v1366_v14 = vsel %vm1365_vm4, 1, %v5095_v1  ;;  %v1390_v21 = vadd.s32 %v1388_v16, %v1386_v24  ;;  %v1626_v28 = vshrl.u32 %v5100_v33, %v1623_v13  ;;  %v1628_v54 = vshll.u32 %v5100_v33, %v1622_v8 }
 0x1bc   : > { %v1368_v15 = vadd.s32 %v1366_v14, %v1364_v23  ;;  %v1629_v29 = vshrl.u32 %v5101_v36, %v1623_v13  ;;  %v1631_v35 = vshll.u32 %v5101_v36, %v1622_v8  ;;  %v1632_v38 = vshrl.u32 %v5097_v25, %v1623_v13 }
 0x1bd   : > { %v1634_v26 = vshll.u32 %v5097_v25, %v1622_v8  ;;  %v1391_v37 = vadd.s32 %v1390_v21, %v1380_v60  ;;  %v5529_v40 = vor.u32 %v1626_v28, %v1625_v6  ;;  %v1635_v59 = vshrl.u32 %v5098_v27, %v1623_v13 }
 0x1be   : > { %v1369_v34 = vadd.s32 %v1368_v15, %v1358_v61  ;;  %v5531_v22 = vor.u32 %v1629_v29, %v1628_v54  ;;  %v1633_v44 = vor.u32 %v1632_v38, %v1631_v35  ;;  %v1637_v46 = vshll.u32 %v5098_v27, %v1622_v8 }
 0x1bf   : > { %v1638_v47 = vshrl.u32 %v5102_v45, %v1623_v13  ;;  %v1392_v17 = vadd.s32 %v1391_v37, %v1382_v11  ;;  %v1393_v49 = vmul.u32 %v5479_v51, %v5504_v55  ;;  %v1636_v43 = vor.u32 %v1635_v59, %v1634_v26 }
 0x1c0   : > { %v5534_v41 = vadd.s32 %v1369_v34, %v1360_v0  ;;  %vm1640_vm7 = vcmp.lt.s32.totalorder %v5515_v5, 1  ;;  %v1657_v56 = vand.u32 65535, %v5508_v50  ;;  %vm1643_vm8 = vcmp.lt.s32.totalorder %v5515_v5, 4  ;;  %v1293_v0 = vpop.f32.mrf.mxu3 }
 0x1c1   : > { %v1639_v53 = vor.u32 %v1638_v47, %v1637_v46  ;;  %v1396_v2 = vadd.s32 1, %v1392_v17  ;;  %v1648_v42 = vsel %vm1640_vm7, %v5529_v40, %v5531_v22  ;;  %v1268_v61 = vadd.f32 %v1267_v3, %v5506_v48 }
 0x1c2   : > { %vm1395_vm6 = vc.u32 %v5534_v41, %v5520_v20  ;;  %vm1642_vm9 = vcmp.lt.s32.totalorder %v5515_v5, 3  ;;  %v1649_v51 = vsel %vm1643_vm8, %v1636_v43, 920167782  ;;  %v1652_v55 = vsel %vm1640_vm7, %v5531_v22, %v1633_v44 }
 0x1c3   : > { %v1653_v57 = vsel %vm1643_vm8, %v1639_v53, 1326507024  ;;  %v1397_v62 = vsel %vm1395_vm6, %v1396_v2, %v1392_v17  ;;  %vm1641_vm10 = vcmp.lt.s32.totalorder %v5515_v5, 2  ;;  %v1650_v10 = vsel %vm1642_vm9, %v1633_v44, %v1649_v51 }
 0x1c4   : > { %v1654_v48 = vsel %vm1642_vm9, %v1636_v43, %v1653_v57  ;;  %v1398_v32 = vadd.s32 %v1397_v62, %v1393_v49  ;;  %v1651_v60 = vsel %vm1641_vm10, %v1648_v42, %v1650_v10  ;;  %v1658_v7 = vshrl.u32 %v5508_v50, 16 }
 0x1c5   : > { %v1655_v4 = vsel %vm1641_vm10, %v1652_v55, %v1654_v48  ;;  %v1681_v11 = vand.u32 65535, %v1651_v60  ;;  %v1682_v12 = vshrl.u32 %v1651_v60, 16  ;;  %v5568_v31 = vadd.f32 %v1293_v0, %v1268_v61 }
 0x1c6   : > { %v1659_v8 = vand.u32 65535, %v1655_v4  ;;  %v1660_v9 = vshrl.u32 %v1655_v4, 16  ;;  %v1399_v23 = vadd.s32 536870912, %v1398_v32  ;;  %v1624_v16 = vshrl.u32 %v5099_v30, %v1623_v13 }
 0x1c7   : > { %v1684_v6 = vmul.u32 %v1682_v12, %v1657_v56  ;;  %v1645_v21 = vsel %vm1643_vm8, %v1633_v44, 2102212464  ;;  %v1685_v29 = vmul.u32 %v1681_v11, %v1658_v7  ;;  %v1457_v26 = vand.u32 2139095040, %v5568_v31 }
 0x1c8   : > { %v1662_v14 = vmul.u32 %v1660_v9, %v1657_v56  ;;  %v1663_v24 = vmul.u32 %v1659_v8, %v1658_v7  ;;  %v5570_v15 = vshrl.u32 %v1399_v23, 30  ;;  %v1661_v28 = vmul.u32 %v1659_v8, %v1657_v56 }
 0x1c9   : > { %v1664_v35 = vmul.u32 %v1660_v9, %v1658_v7  ;;  %v1687_v38 = vshll.u32 %v1684_v6, 16  ;;  %v1683_v46 = vmul.u32 %v1681_v11, %v1657_v56  ;;  %v1686_v17 = vmul.u32 %v1682_v12, %v1658_v7 }
 0x1ca   : > { %v1665_v54 = vshll.u32 %v1662_v14, 16  ;;  %v1401_v34 = vshll.u32 %v5570_v15, 30  ;;  %v1667_v37 = vshll.u32 %v1663_v24, 16  ;;  %v1666_v3 = vshrl.u32 %v1662_v14, 16 }
 0x1cb   : > { %v1689_v44 = vshll.u32 %v1685_v29, 16  ;;  %vm1691_vm13 = vc.u32 %v1683_v46, %v1687_v38  ;;  %v1693_v61 = vadd.s32 %v1687_v38, %v1683_v46  ;;  %v1458_v55 = vshrl.u32 %v1457_v26, 23 }
 0x1cc   : > { %vm1669_vm11 = vc.u32 %v1661_v28, %v1665_v54  ;;  %v1671_v59 = vadd.s32 %v1665_v54, %v1661_v28  ;;  %v1402_v47 = vsub.s32 %v1398_v32, %v1401_v34  ;;  %v1692_v2 = vsel %vm1691_vm13, 1, %v5095_v1 }
 0x1cd   : > { %v1670_v13 = vsel %vm1669_vm11, 1, %v5095_v1  ;;  %v1694_v51 = vadd.s32 %v1692_v2, %v1686_v17  ;;  %v1644_v57 = vsel %vm1640_vm7, %v1624_v16, %v5529_v40  ;;  %v1646_v10 = vsel %vm1642_vm9, %v5531_v22, %v1645_v21  ;;  %v1213_v22 = vpop.f32.mrf.mxu0 }
 0x1ce   : > { %v1672_v49 = vadd.s32 %v1670_v13, %v1664_v35  ;;  %vm1673_vm12 = vc.u32 %v1671_v59, %v1667_v37  ;;  %vm1403_vm14 = vcmp.lt.s32.totalorder %v1402_v47, 0  ;;  %v1404_v43 = vsub.s32 0, %v1402_v47 }
 0x1cf   : > { %v1674_v53 = vsel %vm1673_vm12, 1, %v5095_v1  ;;  %vm1695_vm15 = vc.u32 %v1693_v61, %v1689_v44  ;;  %v1668_v0 = vshrl.u32 %v1663_v24, 16  ;;  %v1454_v60 = vand.u32 2147483647, %v5568_v31 }
 0x1d0   : > { %v1676_v42 = vadd.s32 %v1674_v53, %v1672_v49  ;;  %v1405_v56 = vsel %vm1403_vm14, %v1404_v43, %v1402_v47  ;;  %v1696_v32 = vsel %vm1695_vm15, 1, %v5095_v1  ;;  %v4889_v4 = vadd.s32 4294967169, %v1458_v55 }
 0x1d1   : > { %v1406_v62 = vclz %v1405_v56  ;;  %v1688_v8 = vshrl.u32 %v1684_v6, 16  ;;  %v1698_v9 = vadd.s32 %v1696_v32, %v1694_v51  ;;  %v1185_v11 = vadd.f32 %v5517_v58, %v5510_v63 }
 0x1d2   : > { %v1677_v48 = vadd.s32 %v1676_v42, %v1666_v3  ;;  %v1394_v40 = vadd.s32 %v5520_v20, %v5534_v41  ;;  %v1464_v23 = vadd.s32 1, %v4889_v4  ;;  %v1647_v14 = vsel %vm1641_vm10, %v1644_v57, %v1646_v10  ;;  %v1243_v41 = vpop.f32.mrf.mxu1  ;;  %v1271_v57 = vpop.f32.mrf.mxu2 }
 0x1d3   : > { %v4887_v7 = vadd.s32 4294967294, %v1406_v62  ;;  %v1690_v24 = vshrl.u32 %v1685_v29, 16  ;;  %v1699_v16 = vadd.s32 %v1698_v9, %v1688_v8  ;;  %v1697_v28 = vadd.s32 %v1693_v61, %v1689_v44 }
 0x1d4   : > { %v1678_v12 = vadd.s32 %v1677_v48, %v1668_v0  ;;  %v1461_v6 = vand.u32 8388607, %v1454_v60  ;;  %vm1465_vm1 = vcmp.gt.s32.totalorder %v1464_v23, 0  ;;  %v1214_v34 = vadd.f32 %v1213_v22, %v1185_v11 }
 0x1d5   : > { %vm4888_vm0 = vcmp.lt.s32.totalorder %v4887_v7, 0  ;;  %v1700_v58 = vadd.s32 %v1699_v16, %v1690_v24  ;;  %v1466_v20 = vsel %vm1465_vm1, %v1464_v23, 0  ;;  %v1701_v29 = vmul.u32 %v5508_v50, %v1647_v14 }
 0x1d6   : > { %v1409_v21 = vsel %vm4888_vm0, 0, %v4887_v7  ;;  %vm1703_vm2 = vc.u32 %v1678_v12, %v1697_v28  ;;  %v1462_v37 = vor.u32 8388608, %v1461_v6  ;;  %v1468_v59 = vand.u32 31, %v1466_v20 }
 0x1d7   : > { %v1410_v54 = vsub.s32 32, %v1409_v21  ;;  %v1414_v63 = vsub.s32 4294967266, %v1409_v21  ;;  %v1411_v35 = vshll.u32 %v1402_v47, %v1409_v21  ;;  %v1704_v5 = vadd.s32 1, %v1700_v58 }
 0x1d8   : > { %v1244_v17 = vadd.f32 %v1243_v41, %v1214_v34  ;;  %vm1302_vm3 = vcmp.lt.s32.totalorder %v5471_v39, 0  ;;  %v5598_v44 = vshrl.u32 %v1466_v20, 5  ;;  %v1469_v43 = vsub.s32 32, %v1468_v59 }
 0x1d9   : > { %v1412_v38 = vshrl.u32 %v1394_v40, %v1410_v54  ;;  %v1415_v26 = vadd.s32 127, %v1414_v63  ;;  %v1705_v13 = vsel %vm1703_vm2, %v1704_v5, %v1700_v58  ;;  %v1471_v53 = vshll.u32 %v5099_v30, %v1468_v59 }
 0x1da   : > { %v1706_v49 = vadd.s32 %v1705_v13, %v1701_v29  ;;  %v1474_v42 = vshll.u32 %v5100_v33, %v1468_v59  ;;  %v1477_v50 = vshll.u32 %v5101_v36, %v1468_v59  ;;  %v1472_v51 = vshrl.u32 %v5100_v33, %v1469_v43 }
 0x1db   : > { %v1413_v46 = vor.u32 %v1412_v38, %v1411_v35  ;;  %v1416_v3 = vshll.u32 %v1415_v26, 23  ;;  %v1475_v55 = vshrl.u32 %v5101_v36, %v1469_v43  ;;  %v1480_v56 = vshll.u32 %v5097_v25, %v1468_v59 }
 0x1dc   : > { %v1707_v61 = vadd.s32 536870912, %v1706_v49  ;;  %v1478_v10 = vshrl.u32 %v5097_v25, %v1469_v43  ;;  %v1481_v48 = vshrl.u32 %v5098_v27, %v1469_v43  ;;  %v1483_v0 = vshll.u32 %v5098_v27, %v1468_v59 }
 0x1dd   : > { %v1417_v47 = vor.u32 4788187, %v1416_v3  ;;  %v1420_v2 = vcvt.s32.f32 %v1413_v46  ;;  %vm5611_vm4 = vcmp.le.f32.partialorder %v1300_v19, 0.7853982  ;;  %v1484_v7 = vshrl.u32 %v5102_v45, %v1469_v43  ;;  %v1297_v19 = vpop.f32.mrf.mxu3 }
 0x1de   : > { %v5615_v4 = vshrl.u32 %v1707_v61, 30  ;;  %v5618_v8 = vshll.u32 %v1462_v37, 8  ;;  %v1424_v11 = vsub.s32 4, %v5570_v15  ;;  %v5621_v40 = vadd.s32 %v1697_v28, %v1678_v12 }
 0x1df   : > { %v1418_v62 = vand.u32 2147483647, %v1417_v47  ;;  %v1272_v23 = vadd.f32 %v1271_v57, %v1244_v17  ;;  %v1473_v14 = vor.u32 %v1472_v51, %v1471_v53  ;;  %v1476_v24 = vor.u32 %v1475_v55, %v1474_v42 }
 0x1e0   : > { %v1709_v22 = vshll.u32 %v5615_v4, 30  ;;  %vm1486_vm5 = vcmp.lt.s32.totalorder %v5598_v44, 1  ;;  %v1479_v21 = vor.u32 %v1478_v10, %v1477_v50  ;;  %v1482_v6 = vor.u32 %v1481_v48, %v1480_v56 }
 0x1e1   : > { %v1421_v9 = vmul.f32 %v1420_v2, %v1418_v62  ;;  %v1485_v54 = vor.u32 %v1484_v7, %v1483_v0  ;;  %vm1489_vm6 = vcmp.lt.s32.totalorder %v5598_v44, 4  ;;  %v1503_v58 = vand.u32 65535, %v5618_v8 }
 0x1e2   : > { %v1710_v63 = vsub.s32 %v1706_v49, %v1709_v22  ;;  %v1504_v12 = vshrl.u32 %v5618_v8, 16  ;;  %vm1487_vm7 = vcmp.lt.s32.totalorder %v5598_v44, 2  ;;  %vm1488_vm8 = vcmp.lt.s32.totalorder %v5598_v44, 3 }
 0x1e3   : > { %v1422_v16 = vxor.u32 2147483648, %v1421_v9  ;;  %v5632_v34 = vadd.f32 %v1297_v19, %v1272_v23  ;;  %v1494_v35 = vsel %vm1486_vm5, %v1473_v14, %v1476_v24  ;;  %v1495_v26 = vsel %vm1489_vm6, %v1482_v6, 920167782 }
 0x1e4   : > { %vm1711_vm9 = vcmp.lt.s32.totalorder %v1710_v63, 0  ;;  %v1712_v41 = vsub.s32 0, %v1710_v63  ;;  %v1498_v5 = vsel %vm1486_vm5, %v1476_v24, %v1479_v21  ;;  %v1499_v29 = vsel %vm1489_vm6, %v1485_v54, 1326507024 }
 0x1e5   : > { %v1423_v28 = vsel %vm1302_vm3, %v1422_v16, %v1421_v9  ;;  %v1496_v59 = vsel %vm1488_vm8, %v1479_v21, %v1495_v26  ;;  %v1500_v46 = vsel %vm1488_vm8, %v1482_v6, %v1499_v29  ;;  %v1762_v3 = vand.u32 2147483647, %v5632_v34 }
 0x1e6   : > { %v5637_v20 = vsel %vm5611_vm4, %v5471_v39, %v1423_v28  ;;  %v1713_v37 = vsel %vm1711_vm9, %v1712_v41, %v1710_v63  ;;  %v1470_v17 = vshrl.u32 %v5099_v30, %v1469_v43  ;;  %v1497_v49 = vsel %vm1487_vm7, %v1494_v35, %v1496_v59 }
 0x1e7   : > { %v5643_v38 = vmul.f32 %v5637_v20, %v5637_v20  ;;  %v1714_v13 = vclz %v1713_v37  ;;  %v1501_v53 = vsel %vm1487_vm7, %v1498_v5, %v1500_v46  ;;  %v1491_v47 = vsel %vm1489_vm6, %v1479_v21, 2102212464 }
 0x1e8   : > { %v1505_v2 = vand.u32 65535, %v1501_v53  ;;  %v1506_v42 = vshrl.u32 %v1501_v53, 16  ;;  %v1528_v50 = vshrl.u32 %v1497_v49, 16  ;;  %vm1610_vm10 = vcmp.lt.s32.totalorder %v5477_v18, 0 }
 0x1e9   : > { %v1436_v61 = vmul.f32 -0.00019511016, %v5643_v38  ;;  %v4893_v51 = vadd.s32 4294967294, %v1714_v13  ;;  %v1732_v55 = vsub.s32 4, %v5615_v4  ;;  %v1765_v43 = vand.u32 2139095040, %v5632_v34 }
 0x1ea   : > { %v1507_v56 = vmul.u32 %v1505_v2, %v1503_v58  ;;  %v1508_v57 = vmul.u32 %v1506_v42, %v1503_v58  ;;  %v1509_v62 = vmul.u32 %v1505_v2, %v1504_v12  ;;  %v1527_v10 = vand.u32 65535, %v1497_v49 }
 0x1eb   : > { %vm4894_vm11 = vcmp.lt.s32.totalorder %v4893_v51, 0  ;;  %v1490_v48 = vsel %vm1486_vm5, %v1470_v17, %v1473_v14  ;;  %v1492_v0 = vsel %vm1488_vm8, %v1476_v24, %v1491_v47  ;;  %v1510_v7 = vmul.u32 %v1506_v42, %v1504_v12 }
 0x1ec   : > { %v1717_v9 = vsel %vm4894_vm11, 0, %v4893_v51  ;;  %v1511_v23 = vshll.u32 %v1508_v57, 16  ;;  %v1513_v22 = vshll.u32 %v1509_v62, 16  ;;  %v1530_v19 = vmul.u32 %v1528_v50, %v1503_v58 }
 0x1ed   : > { %v1437_v16 = vadd.f32 0.008332121, %v1436_v61  ;;  %v1718_v21 = vsub.s32 32, %v1717_v9  ;;  %v1722_v6 = vsub.s32 4294967266, %v1717_v9  ;;  %v1766_v54 = vshrl.u32 %v1765_v43, 23 }
 0x1ee   : > { %vm1515_vm12 = vc.u32 %v1507_v56, %v1511_v23  ;;  %v1517_v28 = vadd.s32 %v1511_v23, %v1507_v56  ;;  %v1529_v41 = vmul.u32 %v1527_v10, %v1503_v58  ;;  %v1531_v35 = vmul.u32 %v1527_v10, %v1504_v12 }
 0x1ef   : > { %v1719_v26 = vshll.u32 %v1710_v63, %v1717_v9  ;;  %v1720_v5 = vshrl.u32 %v5621_v40, %v1718_v21  ;;  %v1723_v14 = vadd.s32 127, %v1722_v6  ;;  %v1516_v29 = vsel %vm1515_vm12, 1, %v5095_v1 }
 0x1f0   : > { %v1512_v24 = vshrl.u32 %v1508_v57, 16  ;;  %v1518_v37 = vadd.s32 %v1516_v29, %v1510_v7  ;;  %vm1519_vm13 = vc.u32 %v1517_v28, %v1513_v22  ;;  %v1533_v59 = vshll.u32 %v1530_v19, 16 }
 0x1f1   : > { %v1721_v46 = vor.u32 %v1720_v5, %v1719_v26  ;;  %v1724_v13 = vshll.u32 %v1723_v14, 23  ;;  %v1520_v17 = vsel %vm1519_vm13, 1, %v5095_v1  ;;  %v1532_v49 = vmul.u32 %v1528_v50, %v1504_v12 }
 0x1f2   : > { %v1438_v53 = vmul.f32 %v1437_v16, %v5643_v38  ;;  %v1733_v63 = vsel %vm1610_vm10, %v1732_v55, %v5615_v4  ;;  %v1522_v58 = vadd.s32 %v1520_v17, %v1518_v37  ;;  %v1535_v40 = vshll.u32 %v1531_v35, 16 }
 0x1f3   : > { %v1725_v47 = vor.u32 4788187, %v1724_v13  ;;  %v1493_v2 = vsel %vm1487_vm7, %v1490_v48, %v1492_v0  ;;  %v1514_v42 = vshrl.u32 %v1509_v62, 16  ;;  %vm1537_vm14 = vc.u32 %v1529_v41, %v1533_v59 }
 0x1f4   : > { %v1523_v61 = vadd.s32 %v1522_v58, %v1512_v24  ;;  %v1538_v51 = vsel %vm1537_vm14, 1, %v5095_v1  ;;  %v1539_v43 = vadd.s32 %v1533_v59, %v1529_v41  ;;  %v4895_v56 = vadd.s32 4294967169, %v1766_v54 }
 0x1f5   : > { %v1726_v12 = vand.u32 2147483647, %v1725_v47  ;;  %v1728_v50 = vcvt.s32.f32 %v1721_v46  ;;  %v1540_v57 = vadd.s32 %v1538_v51, %v1532_v49  ;;  %v1769_v10 = vand.u32 8388607, %v1762_v3 }
 0x1f6   : > { %v1439_v4 = vadd.f32 -0.16666654, %v1438_v53  ;;  %v1534_v55 = vshrl.u32 %v1530_v19, 16  ;;  %vm1541_vm15 = vc.u32 %v1539_v43, %v1535_v40  ;;  %v1772_v7 = vadd.s32 1, %v4895_v56 }
 0x1f7   : > { %v1729_v9 = vmul.f32 %v1728_v50, %v1726_v12  ;;  %v1524_v44 = vadd.s32 %v1523_v61, %v1514_v42  ;;  %v1542_v62 = vsel %vm1541_vm15, 1, %v5095_v1  ;;  %v1543_v48 = vadd.s32 %v1539_v43, %v1535_v40 }
 0x1f8   : > { %v1536_v0 = vshrl.u32 %v1531_v35, 16  ;;  %v1544_v23 = vadd.s32 %v1542_v62, %v1540_v57  ;;  %vm1773_vm0 = vcmp.gt.s32.totalorder %v1772_v7, 0  ;;  %v1425_v22 = vsel %vm1302_vm3, %v1424_v11, %v5570_v15 }
 0x1f9   : > { %vm1609_vm1 = vcmp.le.f32.partialorder %v1608_v52, 0.7853982  ;;  %v1730_v19 = vxor.u32 2147483648, %v1729_v9  ;;  %v1774_v16 = vsel %vm1773_vm0, %v1772_v7, 0  ;;  %v1547_v54 = vmul.u32 %v5618_v8, %v1493_v2 }
 0x1fa   : > { %v5691_v21 = vsel %vm1609_vm1, 0, %v1733_v63  ;;  %v1545_v6 = vadd.s32 %v1544_v23, %v1534_v55  ;;  %v1776_v28 = vand.u32 31, %v1774_v16  ;;  %v1440_v41 = vmul.f32 %v1439_v4, %v5643_v38 }
 0x1fb   : > { %v1731_v35 = vsel %vm1610_vm10, %v1730_v19, %v1729_v9  ;;  %vm1549_vm2 = vc.u32 %v1524_v44, %v1543_v48  ;;  %v1770_v26 = vor.u32 8388608, %v1769_v10  ;;  %v5700_v52 = vshrl.u32 %v1774_v16, 5 }
 0x1fc   : > { %v5698_v15 = vsel %vm1609_vm1, %v5477_v18, %v1731_v35  ;;  %v1546_v11 = vadd.s32 %v1545_v6, %v1536_v0  ;;  %v1777_v5 = vsub.s32 32, %v1776_v28  ;;  %v1779_v8 = vshll.u32 %v5099_v30, %v1776_v28 }
 0x1fd   : > { %v5704_v14 = vmul.f32 %v5698_v15, %v5698_v15  ;;  %v1782_v29 = vshll.u32 %v5100_v33, %v1776_v28  ;;  %v1785_v24 = vshll.u32 %v5101_v36, %v1776_v28  ;;  %v1788_v13 = vshll.u32 %v5097_v25, %v1776_v28 }
 0x1fe   : > { %v1550_v37 = vadd.s32 1, %v1546_v11  ;;  %v1780_v59 = vshrl.u32 %v5100_v33, %v1777_v5  ;;  %v1783_v46 = vshrl.u32 %v5101_v36, %v1777_v5  ;;  %v1786_v49 = vshrl.u32 %v5097_v25, %v1777_v5 }
 0x1ff   : > { %v1744_v17 = vmul.f32 -0.00019511016, %v5704_v14  ;;  %v1789_v53 = vshrl.u32 %v5098_v27, %v1777_v5  ;;  %v1791_v63 = vshll.u32 %v5098_v27, %v1776_v28  ;;  %v1441_v58 = vadd.f32 1.0, %v1440_v41 }
 0x200   : > { %v1551_v40 = vsel %vm1549_vm2, %v1550_v37, %v1546_v11  ;;  %v1792_v47 = vshrl.u32 %v5102_v45, %v1777_v5  ;;  %v2370_v2 = vadd.s32 3, %v5691_v21  ;;  %v5721_v33 = vsel %vm5611_vm4, 0, %v1425_v22 }
 0x201   : > { %v1745_v36 = vadd.f32 0.008332121, %v1744_v17  ;;  %v1552_v42 = vadd.s32 %v1551_v40, %v1547_v54  ;;  %v5723_v61 = vshll.u32 %v1770_v26, 8  ;;  %v1781_v25 = vor.u32 %v1780_v59, %v1779_v8 }
 0x202   : > { %v1784_v51 = vor.u32 %v1783_v46, %v1782_v29  ;;  %v1790_v43 = vor.u32 %v1789_v53, %v1788_v13  ;;  %v1793_v56 = vor.u32 %v1792_v47, %v1791_v63  ;;  %v1787_v50 = vor.u32 %v1786_v49, %v1785_v24 }
 0x203   : > { %v1746_v27 = vmul.f32 %v1745_v36, %v5704_v14  ;;  %v1553_v12 = vadd.s32 536870912, %v1552_v42  ;;  %vm1794_vm3 = vcmp.lt.s32.totalorder %v5700_v52, 1  ;;  %v5728_v45 = vmul.f32 %v1441_v58, %v5637_v20 }
 0x204   : > { %vm1797_vm4 = vcmp.lt.s32.totalorder %v5700_v52, 4  ;;  %v5731_v32 = vand.u32 3, %v2370_v2  ;;  %v2060_v57 = vadd.s32 3, %v5721_v33  ;;  %v1778_v55 = vshrl.u32 %v5099_v30, %v1777_v5 }
 0x205   : > { %v1747_v10 = vadd.f32 -0.16666654, %v1746_v27  ;;  %v5734_v4 = vshrl.u32 %v1553_v12, 30  ;;  %vm1796_vm5 = vcmp.lt.s32.totalorder %v5700_v52, 3  ;;  %vm1795_vm6 = vcmp.lt.s32.totalorder %v5700_v52, 2 }
 0x206   : > { %v1802_v7 = vsel %vm1794_vm3, %v1781_v25, %v1784_v51  ;;  %v1803_v20 = vsel %vm1797_vm4, %v1790_v43, 920167782  ;;  %v1807_v9 = vsel %vm1797_vm4, %v1793_v56, 1326507024  ;;  %v1548_v62 = vadd.s32 %v1543_v48, %v1524_v44 }
 0x207   : > { %v1555_v0 = vshll.u32 %v5734_v4, 30  ;;  %v1806_v23 = vsel %vm1794_vm3, %v1784_v51, %v1787_v50  ;;  %v1811_v22 = vand.u32 65535, %v5723_v61  ;;  %v1799_v19 = vsel %vm1797_vm4, %v1787_v50, 2102212464 }
 0x208   : > { %v1804_v30 = vsel %vm1796_vm5, %v1787_v50, %v1803_v20  ;;  %v1808_v16 = vsel %vm1796_vm5, %v1790_v43, %v1807_v9  ;;  %v1812_v6 = vshrl.u32 %v5723_v61, 16  ;;  %v1748_v54 = vmul.f32 %v1747_v10, %v5704_v14 }
 0x209   : > { %v1556_v28 = vsub.s32 %v1552_v42, %v1555_v0  ;;  %v1798_v44 = vsel %vm1794_vm3, %v1778_v55, %v1781_v25  ;;  %v1805_v48 = vsel %vm1795_vm6, %v1802_v7, %v1804_v30  ;;  %v1809_v41 = vsel %vm1795_vm6, %v1806_v23, %v1808_v16 }
 0x20a   : > { %v1835_v35 = vand.u32 65535, %v1805_v48  ;;  %v1836_v26 = vshrl.u32 %v1805_v48, 16  ;;  %v5757_v11 = vand.u32 3, %v2060_v57  ;;  %v1800_v8 = vsel %vm1796_vm5, %v1784_v51, %v1799_v19 }
 0x20b   : > { %vm1557_vm7 = vcmp.lt.s32.totalorder %v1556_v28, 0  ;;  %v1558_v5 = vsub.s32 0, %v1556_v28  ;;  %v1813_v29 = vand.u32 65535, %v1809_v41  ;;  %v1814_v24 = vshrl.u32 %v1809_v41, 16 }
 0x20c   : > { %v1838_v37 = vmul.u32 %v1836_v26, %v1811_v22  ;;  %v1839_v59 = vmul.u32 %v1835_v35, %v1812_v6  ;;  %v1429_v46 = vmul.f32 -0.001358992, %v5643_v38  ;;  %v1749_v13 = vadd.f32 1.0, %v1748_v54 }
 0x20d   : > { %v1559_v17 = vsel %vm1557_vm7, %v1558_v5, %v1556_v28  ;;  %v1817_v49 = vmul.u32 %v1813_v29, %v1812_v6  ;;  %v1837_v53 = vmul.u32 %v1835_v35, %v1811_v22  ;;  %v1815_v58 = vmul.u32 %v1813_v29, %v1811_v22 }
 0x20e   : > { %v1560_v63 = vclz %v1559_v17  ;;  %v1816_v40 = vmul.u32 %v1814_v24, %v1811_v22  ;;  %v1841_v47 = vshll.u32 %v1838_v37, 16  ;;  %v1818_v2 = vmul.u32 %v1814_v24, %v1812_v6 }
 0x20f   : > { %v1821_v36 = vshll.u32 %v1817_v49, 16  ;;  %v1840_v42 = vmul.u32 %v1836_v26, %v1812_v6  ;;  %v1843_v25 = vshll.u32 %v1839_v59, 16  ;;  %v1842_v27 = vshrl.u32 %v1838_v37, 16 }
 0x210   : > { %v4890_v43 = vadd.s32 4294967294, %v1560_v63  ;;  %v1819_v51 = vshll.u32 %v1816_v40, 16  ;;  %v1820_v56 = vshrl.u32 %v1816_v40, 16  ;;  %vm1845_vm8 = vc.u32 %v1837_v53, %v1841_v47 }
 0x211   : > { %v1847_v12 = vadd.s32 %v1841_v47, %v1837_v53  ;;  %v1737_v50 = vmul.f32 -0.001358992, %v5704_v14  ;;  %v1430_v57 = vadd.f32 0.041655596, %v1429_v46  ;;  %v1846_v55 = vsel %vm1845_vm8, 1, %v5095_v1 }
 0x212   : > { %vm4891_vm9 = vcmp.lt.s32.totalorder %v4890_v43, 0  ;;  %vm1823_vm10 = vc.u32 %v1815_v58, %v1819_v51  ;;  %v1825_v10 = vadd.s32 %v1819_v51, %v1815_v58  ;;  %v1848_v9 = vadd.s32 %v1846_v55, %v1840_v42 }
 0x213   : > { %v1563_v7 = vsel %vm4891_vm9, 0, %v4890_v43  ;;  %v1824_v20 = vsel %vm1823_vm10, 1, %v5095_v1  ;;  %vm1849_vm11 = vc.u32 %v1847_v12, %v1843_v25  ;;  %v1844_v30 = vshrl.u32 %v1839_v59, 16 }
 0x214   : > { %v1564_v0 = vsub.s32 32, %v1563_v7  ;;  %v1565_v23 = vshll.u32 %v1556_v28, %v1563_v7  ;;  %v1568_v22 = vsub.s32 4294967266, %v1563_v7  ;;  %v1826_v19 = vadd.s32 %v1824_v20, %v1818_v2 }
 0x215   : > { %vm1827_vm12 = vc.u32 %v1825_v10, %v1821_v36  ;;  %v1850_v16 = vsel %vm1849_vm11, 1, %v5095_v1  ;;  %v1738_v6 = vadd.f32 0.041655596, %v1737_v50  ;;  %v1822_v26 = vshrl.u32 %v1817_v49, 16 }
 0x216   : > { %v1566_v54 = vshrl.u32 %v1548_v62, %v1564_v0  ;;  %v1569_v48 = vadd.s32 127, %v1568_v22  ;;  %v1828_v41 = vsel %vm1827_vm12, 1, %v5095_v1  ;;  %v1852_v35 = vadd.s32 %v1850_v16, %v1848_v9 }
 0x217   : > { %v1830_v5 = vadd.s32 %v1828_v41, %v1826_v19  ;;  %v1739_v29 = vmul.f32 %v1738_v6, %v5704_v14  ;;  %v1431_v24 = vmul.f32 %v1430_v57, %v5643_v38  ;;  %v1801_v46 = vsel %vm1795_vm6, %v1798_v44, %v1800_v8 }
 0x218   : > { %v1567_v37 = vor.u32 %v1566_v54, %v1565_v23  ;;  %v1570_v28 = vshll.u32 %v1569_v48, 23  ;;  %v1853_v59 = vadd.s32 %v1852_v35, %v1842_v27  ;;  %vm1456_vm13 = vcmp.lt.s32.totalorder %v5568_v31, 0 }
 0x219   : > { %v1831_v17 = vadd.s32 %v1830_v5, %v1820_v56  ;;  %v5772_v62 = vadd.s32 %v1847_v12, %v1843_v25  ;;  %v1740_v53 = vadd.f32 -0.4999988, %v1739_v29  ;;  %v1432_v1 = vadd.f32 -0.4999988, %v1431_v24 }
 0x21a   : > { %v5775_v49 = vmul.f32 %v1749_v13, %v5698_v15  ;;  %vm5779_vm14 = vcmp.le.f32.partialorder %v1454_v60, 0.7853982  ;;  %v1571_v58 = vor.u32 4788187, %v1570_v28  ;;  %v1574_v52 = vcvt.s32.f32 %v1567_v37 }
 0x21b   : > { %v1854_v44 = vadd.s32 %v1853_v59, %v1844_v30  ;;  %vm1751_vm15 = vweird.f32 %v5477_v18  ;;  %vm1443_vm0 = vweird.f32 %v5471_v39  ;;  %v5785_v8 = vadd.s32 %v1831_v17, %v1822_v26 }
 0x21c   : > { %v1855_v40 = vmul.u32 %v5723_v61, %v1801_v46  ;;  %v1741_v15 = vmul.f32 %v1740_v53, %v5704_v14  ;;  %v1433_v13 = vmul.f32 %v1432_v1, %v5643_v38  ;;  %v1572_v47 = vand.u32 2147483647, %v1571_v58 }
 0x21d   : > { %v1858_v60 = vadd.s32 1, %v1854_v44  ;;  %vm2372_vm1 = vcmp.lt.s32.totalorder %v5731_v32, 2  ;;  %v1447_v2 = vxor.u32 2147483648, %v5728_v45  ;;  %vm1857_vm2 = vc.u32 %v5785_v8, %v5772_v62 }
 0x21e   : > { %v1742_v36 = vadd.f32 1.0, %v1741_v15  ;;  %vm2373_vm3 = vcmp.eq.s32.totalorder %v5731_v32, 0  ;;  %v1434_v42 = vadd.f32 1.0, %v1433_v13  ;;  %v1575_v25 = vmul.f32 %v1574_v52, %v1572_v47  ;;  %v2537_v47 = vld [vmem:[%s6803_s3 + $0x8] sm:$0xff] }
 0x21f   : > { %v1859_v43 = vsel %vm1857_vm2, %v1858_v60, %v1854_v44  ;;  %v1755_v61 = vxor.u32 2147483648, %v5775_v49  ;;  %vm2376_vm4 = vcmp.eq.s32.totalorder %v5731_v32, 2  ;;  %vm2063_vm5 = vcmp.eq.s32.totalorder %v5757_v11, 0 }
 0x220   : > { %v1860_v38 = vadd.s32 %v1859_v43, %v1855_v40  ;;  %v1758_v14 = vxor.u32 2147483648, %v1742_v36  ;;  %v1450_v51 = vxor.u32 2147483648, %v1434_v42  ;;  %v1576_v56 = vxor.u32 2147483648, %v1575_v25  ;;  %v2536_v40 = vld [vmem:[%s6803_s3] sm:$0xff] }
 0x221   : > { %v2375_v27 = vsel %vm2373_vm3, %v1742_v36, %v1755_v61  ;;  %v2065_v12 = vsel %vm2063_vm5, %v1434_v42, %v1447_v2  ;;  %vm2066_vm6 = vcmp.eq.s32.totalorder %v5757_v11, 2  ;;  %vm2062_vm7 = vcmp.lt.s32.totalorder %v5757_v11, 2 }
 0x222   : > { %v1861_v50 = vadd.s32 536870912, %v1860_v38  ;;  %v2378_v57 = vsel %vm2376_vm4, %v1758_v14, %v5775_v49  ;;  %v2068_v10 = vsel %vm2066_vm6, %v1450_v51, %v5728_v45  ;;  %v1577_v55 = vsel %vm1456_vm13, %v1576_v56, %v1575_v25 }
 0x223   : > { %v2379_v7 = vsel %vm2372_vm1, %v2375_v27, %v2378_v57  ;;  %v2069_v20 = vsel %vm2062_vm7, %v2065_v12, %v2068_v10  ;;  %v1752_v9 = vand.u32 3, %v5691_v21  ;;  %v5810_v0 = vsel %vm5779_vm14, %v5568_v31, %v1577_v55 }
 0x224   : > { %v5812_v23 = vshrl.u32 %v1861_v50, 30  ;;  %v2380_v11 = vsel %vm1751_vm15, nan, %v2379_v7  ;;  %v2070_v22 = vsel %vm1443_vm0, nan, %v2069_v20  ;;  %v5820_v32 = vmul.f32 %v5810_v0, %v5810_v0 }
 0x225   : > { %v5822_v19 = vand.u32 4294901760, %v2380_v11  ;;  %v1444_v21 = vand.u32 3, %v5721_v33  ;;  %v5829_v6 = vand.u32 4294901760, %v2070_v22  ;;  %vm1753_vm8 = vcmp.lt.s32.totalorder %v1752_v9, 2 }
 0x226   : > { %v1863_v30 = vshll.u32 %v5812_v23, 30  ;;  %v1590_v16 = vmul.f32 -0.00019511016, %v5820_v32  ;;  %vm1754_vm9 = vcmp.eq.s32.totalorder %v1752_v9, 0  ;;  %vm1757_vm10 = vcmp.eq.s32.totalorder %v1752_v9, 2 }
 0x227   : > { %2670 = vmatpush.msrb.mxu0 %v5822_v19  ;;  %2957 = vmatpush.msrb.mxu3 %v5822_v19  ;;  %vm1446_vm11 = vcmp.eq.s32.totalorder %v1444_v21, 0  ;;  %v1756_v41 = vsel %vm1754_vm9, %v1742_v36, %v1755_v61  ;;  %v1759_v35 = vsel %vm1757_vm10, %v1758_v14, %v5775_v49  ;;  %vm1449_vm1 = vcmp.eq.s32.totalorder %v1444_v21, 2 }
 0x228   : > { %v5831_v54 = vsub.s32 %v1860_v38, %v1863_v30  ;;  %v1591_v48 = vadd.f32 0.008332121, %v1590_v16  ;;  %v1760_v26 = vsel %vm1753_vm8, %v1756_v41, %v1759_v35  ;;  %v1448_v5 = vsel %vm1446_vm11, %v1434_v42, %v1447_v2 }
 0x229   : > { %2672 = vmatpush.msrb.mxu0 %v5829_v6  ;;  %2959 = vmatpush.msrb.mxu3 %v5829_v6  ;;  %v1761_v24 = vsel %vm1751_vm15, nan, %v1760_v26  ;;  %vm1445_vm2 = vcmp.lt.s32.totalorder %v1444_v21, 2  ;;  %v1451_v37 = vsel %vm1449_vm1, %v1450_v51, %v5728_v45  ;;  %v2787_v49 = vsub.f32 %v2380_v11, %v5822_v19 }
 0x22a   : > { %vm1865_vm12 = vcmp.lt.s32.totalorder %v5831_v54, 0  ;;  %v1866_v33 = vsub.s32 0, %v5831_v54  ;;  %v1592_v28 = vmul.f32 %v1591_v48, %v5820_v32  ;;  %v5843_v59 = vand.u32 4294901760, %v1761_v24 }
 0x22b   : > { %v1452_v17 = vsel %vm1445_vm2, %v1448_v5, %v1451_v37  ;;  %v1578_v45 = vsub.s32 4, %v5734_v4  ;;  %v1856_v58 = vadd.s32 %v5772_v62, %v5785_v8  ;;  %v2793_v52 = vsub.f32 %v2070_v22, %v5829_v6  ;;  %2873 = vmatpush.msrb.mxu2 %v2787_v49 }
 0x22c   : > { %v1867_v29 = vsel %vm1865_vm12, %v1866_v33, %v5831_v54  ;;  %v1453_v53 = vsel %vm1443_vm0, nan, %v1452_v17  ;;  %2674 = vmatpush.msrb.mxu0 %v5843_v59  ;;  %2961 = vmatpush.msrb.mxu3 %v5843_v59  ;;  %v1593_v44 = vadd.f32 -0.16666654, %v1592_v28  ;;  %v2799_v39 = vsub.f32 %v1761_v24, %v5843_v59 }
 0x22d   : > { %v1868_v46 = vclz %v1867_v29  ;;  %v5850_v18 = vand.u32 4294901760, %v1453_v53  ;;  %vm2620_vm0 = vcmask 261120   ;;  %v2788_v62 = vand.u32 4294901760, %v2787_v49  ;;  %2876 = vmatpush.msrb.mxu2 %v2793_v52 }
 0x22e   : > { %v2622_v13 = vsel %vm2620_vm0, %v2536_v40, 0  ;;  %v1583_v42 = vmul.f32 -0.001358992, %v5820_v32  ;;  %v2794_v61 = vand.u32 4294901760, %v2793_v52  ;;  %v2800_v38 = vand.u32 4294901760, %v2799_v39 }
 0x22f   : > { %v4896_v1 = vadd.s32 4294967294, %v1868_v46  ;;  %2676 = vmatpush.msrb.mxu0 %v5850_v18  ;;  %2963 = vmatpush.msrb.mxu3 %v5850_v18  ;;  %v2805_v8 = vsub.f32 %v1453_v53, %v5850_v18  ;;  %v5869_v25 = vand.u32 4294901760, %v2622_v13  ;;  %v2789_v43 = vsub.f32 %v2787_v49, %v2788_v62 }
 0x230   : > { %2879 = vmatpush.msrb.mxu2 %v2799_v39  ;;  %v2625_v27 = vsel %vm2620_vm0, %v2537_v47, 0  ;;  %v2795_v57 = vsub.f32 %v2793_v52, %v2794_v61  ;;  %v2801_v10 = vsub.f32 %v2799_v39, %v2800_v38  ;;  %v1594_v21 = vmul.f32 %v1593_v44, %v5820_v32  ;;  %v2539_v47 = vld [vmem:[%s6803_s3 + $0x18] sm:$0xff] }
 0x231   : > { %vm4897_vm15 = vcmp.lt.s32.totalorder %v4896_v1, 0  ;;  %3052 = vmatpush.msra.mxu0 %v2788_v62  ;;  %v2806_v56 = vand.u32 4294901760, %v2805_v8  ;;  %v5873_v12 = vsub.f32 %v2622_v13, %v5869_v25  ;;  %v2790_v50 = vand.u32 4294901760, %v2789_v43 }
 0x232   : > { %v1871_v15 = vsel %vm4897_vm15, 0, %v4896_v1  ;;  %2882 = vmatpush.msrb.mxu2 %v2805_v8  ;;  %v5875_v20 = vand.u32 4294901760, %v2625_v27  ;;  %v2796_v11 = vand.u32 4294901760, %v2795_v57  ;;  %v1579_v48 = vsel %vm1456_vm13, %v1578_v45, %v5734_v4  ;;  %v2538_v4 = vld [vmem:[%s6803_s3 + $0x10] sm:$0xff] }
 0x233   : > { %v1872_v60 = vsub.s32 32, %v1871_v15  ;;  %v1873_v2 = vshll.u32 %v5831_v54, %v1871_v15  ;;  %v1876_v36 = vsub.s32 4294967266, %v1871_v15  ;;  %3056 = vmatpush.msra.mxu0 %v2794_v61  ;;  %v5878_v9 = vand.u32 4294901760, %v5873_v12  ;;  %2791 = vmatpush.msrb.mxu1 %v2790_v50 }
 0x234   : > { %2885 = vmatmul.f32.vlgmr.msrb.gmra.mxu2 %v5873_v12  ;;  %v2807_v22 = vsub.f32 %v2805_v8, %v2806_v56  ;;  %v5883_v54 = vsub.f32 %v2625_v27, %v5875_v20  ;;  %v2802_v41 = vand.u32 4294901760, %v2801_v10  ;;  %v1584_v35 = vadd.f32 0.041655596, %v1583_v42 }
 0x235   : > { %v1874_v14 = vshrl.u32 %v1856_v58, %v1872_v60  ;;  %v1877_v51 = vadd.s32 127, %v1876_v36  ;;  %3060 = vmatpush.msra.mxu0 %v2800_v38  ;;  %v2680_v33 = vsub.f32 %v5873_v12, %v5878_v9  ;;  %2797 = vmatpush.msrb.mxu1 %v2796_v11  ;;  %v1581_v28 = vsel %vm5779_vm14, 0, %v1579_v48 }
 0x236   : > { %2967 = vmatmul.f32.vlgmr.msrb.gmra.mxu3 %v5878_v9  ;;  %v5892_v5 = vand.u32 4294901760, %v5883_v54  ;;  %v2808_v24 = vand.u32 4294901760, %v2807_v22  ;;  %v1585_v37 = vmul.f32 %v1584_v35, %v5820_v32  ;;  %v1595_v46 = vadd.f32 1.0, %v1594_v21  ;;  %v2540_v22 = vld [vmem:[%s6803_s3 + $0x20] sm:$0xff] }
 0x237   : > { %v1875_v55 = vor.u32 %v1874_v14, %v1873_v2  ;;  %v1878_v7 = vshll.u32 %v1877_v51, 23  ;;  %3064 = vmatpush.msra.mxu0 %v2806_v56  ;;  %v5894_v29 = vand.u32 4294901760, %v2680_v33  ;;  %2803 = vmatpush.msrb.mxu1 %v2802_v41  ;;  %v2628_v53 = vsel %vm2620_vm0, %v2538_v4, 0 }
 0x238   : > { %v2688_v1 = vsub.f32 %v5883_v54, %v5892_v5  ;;  %v1586_v49 = vadd.f32 -0.4999988, %v1585_v37  ;;  %v5906_v45 = vand.u32 4294901760, %v2628_v53  ;;  %vm1764_vm13 = vcmp.lt.s32.totalorder %v5632_v34, 0 }
 0x239   : > { %v1879_v30 = vor.u32 4788187, %v1878_v7  ;;  %v1882_v16 = vcvt.s32.f32 %v1875_v55  ;;  %2682 = vmatmul.f32.vlgmr.msrb.gmra.mxu0 %v5894_v29  ;;  %2809 = vmatpush.msrb.mxu1 %v2808_v24  ;;  %v2215_v52 = vadd.s32 3, %v1581_v28  ;;  %v1596_v39 = vmul.f32 %v1595_v46, %v5810_v0 }
 0x23a   : > { %2811 = vmatmul.f32.vlgmr.msrb.gmra.mxu1 %v5869_v25  ;;  %v1587_v63 = vmul.f32 %v1586_v49, %v5820_v32  ;;  %v5914_v44 = vsub.f32 %v2628_v53, %v5906_v45  ;;  %vm5919_vm14 = vcmp.le.f32.partialorder %v1762_v3, 0.7853982  ;;  %v5931_v13 = vand.u32 4294901760, %v2688_v1 }
 0x23b   : > { %v1880_v26 = vand.u32 2147483647, %v1879_v30  ;;  %3127 = vmatpush.msra.mxu1 %v5822_v19  ;;  %v1886_v19 = vsub.s32 4, %v5812_v23  ;;  %v2216_v8 = vand.u32 3, %v2215_v52  ;;  %v1601_v36 = vxor.u32 2147483648, %v1596_v39 }
 0x23c   : > { %2890 = vmatmul.f32.gmra.mxu2 %v5883_v54  ;;  %v5936_v3 = vand.u32 4294901760, %v5914_v44  ;;  %v1588_v62 = vadd.f32 1.0, %v1587_v63  ;;  %v1598_v51 = vand.u32 3, %v1581_v28  ;;  %vm1597_vm4 = vweird.f32 %v5568_v31 }
 0x23d   : > { %v1883_v17 = vmul.f32 %v1882_v16, %v1880_v26  ;;  %3129 = vmatpush.msra.mxu1 %v5829_v6  ;;  %v2631_v6 = vsel %vm2620_vm0, %v2539_v47, 0  ;;  %v1887_v42 = vsel %vm1764_vm13, %v1886_v19, %v5812_v23  ;;  %vm2218_vm3 = vcmp.eq.s32.totalorder %v2216_v8, 0 }
 0x23e   : > { %2973 = vmatmul.f32.gmra.mxu3 %v5892_v5  ;;  %v5952_v43 = vand.u32 4294901760, %v2631_v6  ;;  %v1604_v14 = vxor.u32 2147483648, %v1588_v62  ;;  %v2220_v50 = vsel %vm2218_vm3, %v1588_v62, %v1601_v36  ;;  %vm2221_vm5 = vcmp.eq.s32.totalorder %v2216_v8, 2 }
 0x23f   : > { %v1884_v58 = vxor.u32 2147483648, %v1883_v17  ;;  %3131 = vmatpush.msra.mxu1 %v5843_v59  ;;  %v2696_v59 = vsub.f32 %v5914_v44, %v5936_v3  ;;  %vm2217_vm6 = vcmp.lt.s32.totalorder %v2216_v8, 2  ;;  %vm1600_vm7 = vcmp.eq.s32.totalorder %v1598_v51, 0 }
 0x240   : > { %v5957_v23 = vsub.f32 %v2631_v6, %v5952_v43  ;;  %v2223_v11 = vsel %vm2221_vm5, %v1604_v14, %v1596_v39  ;;  %v2634_v16 = vsel %vm2620_vm0, %v2540_v22, 0  ;;  %vm1599_vm8 = vcmp.lt.s32.totalorder %v1598_v51, 2 }
 0x241   : > { %v1885_v15 = vsel %vm1764_vm13, %v1884_v58, %v1883_v17  ;;  %2690 = vmatmul.f32.gmra.mxu0 %v5931_v13  ;;  %3133 = vmatpush.msra.mxu1 %v5850_v18  ;;  %v1889_v18 = vsel %vm5919_vm14, 0, %v1887_v42  ;;  %v5962_v57 = vand.u32 4294901760, %v2696_v59  ;;  %v2224_v30 = vsel %vm2217_vm6, %v2220_v50, %v2223_v11  ;;  %v2541_v17 = vld [vmem:[%s6803_s3 + $0x28] sm:$0xff] }
 0x242   : > { %v5929_v32 = vsel %vm5919_vm14, %v5632_v34, %v1885_v15  ;;  %2815 = vmatmul.f32.gmra.mxu1 %v5875_v20  ;;  %v5966_v10 = vand.u32 4294901760, %v5957_v23  ;;  %v2525_v21 = vadd.s32 3, %v1889_v18  ;;  %v1602_v41 = vsel %vm1600_vm7, %v1588_v62, %v1601_v36 }
 0x243   : > { %v1890_v0 = vmul.f32 %v5929_v32, %v5929_v32  ;;  %v1906_v35 = vand.u32 3, %v1889_v18  ;;  %vm1603_vm9 = vcmp.eq.s32.totalorder %v1598_v51, 2  ;;  %v5975_v24 = vand.u32 4294901760, %v2634_v16  ;;  %v2559_v51 = vld [vmem:[%s6806_s6 + $0x58] sm:$0xff] }
 0x244   : > { %2895 = vmatmul.f32.gmra.mxu2 %v5914_v44  ;;  %v2704_v26 = vsub.f32 %v5957_v23, %v5966_v10  ;;  %v2225_v28 = vsel %vm1597_vm4, nan, %v2224_v30  ;;  %v1605_v46 = vsel %vm1603_vm9, %v1604_v14, %v1596_v39  ;;  %v2526_v53 = vand.u32 3, %v2525_v21  ;;  %2617 = vperm.xlu2 %4965, %v2559_v51  }
 0x245   : > { %v1898_v60 = vmul.f32 -0.00019511016, %v1890_v0  ;;  %v1891_v2 = vmul.f32 -0.001358992, %v1890_v0  ;;  %v1606_v1 = vsel %vm1599_vm8, %v1602_v41, %v1605_v46  ;;  %v5985_v49 = vsub.f32 %v2634_v16, %v5975_v24 }
 0x246   : > { %2979 = vmatmul.f32.gmra.mxu3 %v5936_v3  ;;  %v2637_v58 = vsel %vm2620_vm0, %v2541_v17, 0  ;;  %vm1905_vm10 = vweird.f32 %v5632_v34  ;;  %v5990_v39 = vand.u32 4294901760, %v2225_v28  ;;  %vm1907_vm11 = vcmp.lt.s32.totalorder %v1906_v35, 2 }
 0x247   : > { %v1899_v61 = vadd.f32 0.008332121, %v1898_v60  ;;  %v1892_v38 = vadd.f32 0.041655596, %v1891_v2  ;;  %vm1908_vm12 = vcmp.eq.s32.totalorder %v1906_v35, 0  ;;  %v5992_v40 = vand.u32 4294901760, %v2704_v26 }
 0x248   : > { %v1607_v19 = vsel %vm1597_vm4, nan, %v1606_v1  ;;  %v6000_v62 = vand.u32 4294901760, %v2637_v58  ;;  %vm2527_vm1 = vcmp.lt.s32.totalorder %v2526_v53, 2  ;;  %vm2528_vm2 = vcmp.eq.s32.totalorder %v2526_v53, 0  ;;  %v2542_v2 = vld [vmem:[%s6803_s3 + $0x30] sm:$0xff] }
 0x249   : > { %v1900_v56 = vmul.f32 %v1899_v61, %v1890_v0  ;;  %v1893_v27 = vmul.f32 %v1892_v38, %v1890_v0  ;;  %2698 = vmatmul.f32.gmra.mxu0 %v5962_v57  ;;  %vm2531_vm15 = vcmp.eq.s32.totalorder %v2526_v53, 2  ;;  %vm1911_vm13 = vcmp.eq.s32.totalorder %v1906_v35, 2 }
 0x24a   : > { %2819 = vmatmul.f32.gmra.mxu1 %v5906_v45  ;;  %v3319_v6 = vsub.f32 %v2225_v28, %v5990_v39  ;;  %v6007_v42 = vand.u32 4294901760, %v1607_v19  ;;  %v6018_v14 = vsub.f32 %v2637_v58, %v6000_v62  ;;  %v2640_v34 = vsel %vm2620_vm0, %v2542_v2, 0 }
 0x24b   : > { %v1901_v55 = vadd.f32 -0.16666654, %v1900_v56  ;;  %v1894_v7 = vadd.f32 -0.4999988, %v1893_v27  ;;  %v6035_v21 = vand.u32 4294901760, %v2640_v34 }
 0x24c   : > { %2900 = vmatmul.f32.gmra.mxu2 %v5957_v23  ;;  %v6033_v22 = vand.u32 4294901760, %v6018_v14 }
 0x24d   : > { %v1902_v48 = vmul.f32 %v1901_v55, %v1890_v0  ;;  %v1895_v33 = vmul.f32 %v1894_v7, %v1890_v0  ;;  %v5998_v0 = vand.u32 4294901760, %v5985_v49  ;;  %v3331_v55 = vsub.f32 %v1607_v19, %v6007_v42  ;;  %v2544_v19 = vld [vmem:[%s6803_s3 + $0x40] sm:$0xff] }
 0x24e   : > { %2985 = vmatmul.f32.gmra.mxu3 %v5966_v10  ;;  %v3320_v7 = vand.u32 4294901760, %v3319_v6  ;;  %v2720_v26 = vsub.f32 %v6018_v14, %v6033_v22 }
 0x24f   : > { %v1903_v37 = vadd.f32 1.0, %v1902_v48  ;;  %v1896_v4 = vadd.f32 1.0, %v1895_v33  ;;  %v2712_v38 = vsub.f32 %v5985_v49, %v5998_v0  ;;  %v2543_v48 = vld [vmem:[%s6803_s3 + $0x38] sm:$0xff]  ;;  %v3332_v35 = vand.u32 4294901760, %v3331_v55 }
 0x250   : > { %v3321_v41 = vsub.f32 %v3319_v6, %v3320_v7  ;;  %v2643_v46 = vsel %vm2620_vm0, %v2543_v48, 0  ;;  %v6053_v1 = vand.u32 4294901760, %v2720_v26 }
 0x251   : > { %v1904_v63 = vmul.f32 %v1903_v37, %v5929_v32  ;;  %v1912_v52 = vxor.u32 2147483648, %v1896_v4  ;;  %2706 = vmatmul.f32.gmra.mxu0 %v5992_v40  ;;  %v6029_v11 = vand.u32 4294901760, %v2712_v38  ;;  %v6048_v37 = vsub.f32 %v2640_v34, %v6035_v21 }
 0x252   : > { %2823 = vmatmul.f32.gmra.mxu1 %v5952_v43  ;;  %v3322_v17 = vand.u32 4294901760, %v3321_v41  ;;  %v3333_v53 = vsub.f32 %v3331_v55, %v3332_v35  ;;  %v2557_v41 = vld [vmem:[%s6806_s6 + $0x48] sm:$0xff] }
 0x253   : > { %v1909_v15 = vxor.u32 2147483648, %v1904_v63  ;;  %v2533_v8 = vsel %vm2531_vm15, %v1912_v52, %v1904_v63  ;;  %v1913_v60 = vsel %vm1911_vm13, %v1912_v52, %v1904_v63  ;;  %v6057_v58 = vand.u32 4294901760, %v6048_v37  ;;  %v2551_v52 = vld [vmem:[%s6806_s6 + $0x18] sm:$0xff] }
 0x254   : > { %2905 = vmatmul.f32.gmra.mxu2 %v5985_v49  ;;  %v6059_v63 = vand.u32 4294901760, %v2643_v46  ;;  %2577 = vperm.xlu2 %4965, %v2551_v52  }
 0x255   : > { %v2530_v32 = vsel %vm2528_vm2, %v1896_v4, %v1909_v15  ;;  %v1910_v47 = vsel %vm1908_vm12, %v1896_v4, %v1909_v15 }
 0x256   : > { %v2534_v36 = vsel %vm2527_vm1, %v2530_v32, %v2533_v8  ;;  %v1914_v31 = vsel %vm1907_vm11, %v1910_v47, %v1913_v60  ;;  %2991 = vmatmul.f32.gmra.mxu3 %v5998_v0  ;;  %v3334_v32 = vand.u32 4294901760, %v3333_v53  ;;  %v2728_v8 = vsub.f32 %v6048_v37, %v6057_v58  ;;  %v2556_v53 = vld [vmem:[%s6806_s6 + $0x40] sm:$0xff] }
 0x257   : > { %v2535_v59 = vsel %vm1905_vm10, nan, %v2534_v36  ;;  %v1915_v61 = vsel %vm1905_vm10, nan, %v1914_v31  ;;  %v6073_v47 = vsub.f32 %v2643_v46, %v6059_v63  ;;  %v2646_v60 = vsel %vm2620_vm0, %v2544_v19, 0 }
 0x258   : > { %v3195_v18 = vand.u32 4294901760, %v2535_v59  ;;  %v6023_v56 = vand.u32 4294901760, %v1915_v61  ;;  %v6077_v2 = vand.u32 4294901760, %v2728_v8  ;;  %v6083_v31 = vand.u32 4294901760, %v2646_v60  ;;  %v6187_v8 = vpop.permute.xlu0 %2572 }
 0x259   : > { %2714 = vmatmul.f32.gmra.mxu0 %v6029_v11  ;;  %v6081_v36 = vand.u32 4294901760, %v6073_v47 }
 0x25a   : > { %3196 = vmatpush.msra.mxu2 %v3195_v18  ;;  %v3313_v27 = vsub.f32 %v2535_v59, %v3195_v18  ;;  %3483 = vmatpush.msrb.mxu1 %v3195_v18  ;;  %v3325_v50 = vsub.f32 %v1915_v61, %v6023_v56  ;;  %v6096_v59 = vsub.f32 %v2646_v60, %v6083_v31 }
 0x25b   : > { %2827 = vmatmul.f32.gmra.mxu1 %v5975_v24 }
 0x25c   : > { %3198 = vmatpush.msra.mxu2 %v5990_v39  ;;  %3399 = vmatpush.msrb.mxu0 %v3313_v27  ;;  %v3314_v30 = vand.u32 4294901760, %v3313_v27  ;;  %v3326_v16 = vand.u32 4294901760, %v3325_v50  ;;  %v6103_v51 = vand.u32 4294901760, %v6096_v59 }
 0x25d   : > { %3485 = vmatpush.msrb.mxu1 %v5990_v39  ;;  %2910 = vmatmul.f32.gmra.mxu2 %v6018_v14 }
 0x25e   : > { %3200 = vmatpush.msra.mxu2 %v6023_v56  ;;  %3402 = vmatpush.msrb.mxu0 %v3319_v6  ;;  %v3315_v33 = vsub.f32 %v3313_v27, %v3314_v30  ;;  %v3327_v28 = vsub.f32 %v3325_v50, %v3326_v16  ;;  %v2545_v6 = vld [vmem:[%s6803_s3 + $0x48] sm:$0xff]  ;;  %v2558_v27 = vld [vmem:[%s6806_s6 + $0x50] sm:$0xff] }
 0x25f   : > { %3487 = vmatpush.msrb.mxu1 %v6023_v56  ;;  %2997 = vmatmul.f32.gmra.mxu3 %v6033_v22  ;;  %v2649_v61 = vsel %vm2620_vm0, %v2545_v6, 0 }
 0x260   : > { %3202 = vmatpush.msra.mxu2 %v6007_v42  ;;  %3405 = vmatpush.msrb.mxu0 %v3325_v50  ;;  %v3316_v4 = vand.u32 4294901760, %v3315_v33  ;;  %v3328_v15 = vand.u32 4294901760, %v3327_v28 }
 0x261   : > { %3489 = vmatpush.msrb.mxu1 %v6007_v42  ;;  %2722 = vmatmul.f32.gmra.mxu0 %v6053_v1 }
 0x262   : > { %3578 = vmatpush.msrb.mxu2 %v3314_v30  ;;  %3317 = vmatpush.msra.mxu3 %v3316_v4 }
 0x263   : > { %3408 = vmatpush.msrb.mxu0 %v3331_v55  ;;  %2831 = vmatmul.f32.gmra.mxu1 %v6000_v62 }
 0x264   : > { %3582 = vmatpush.msrb.mxu2 %v3320_v7  ;;  %3323 = vmatpush.msra.mxu3 %v3322_v17 }
 0x265   : > { %2915 = vmatmul.f32.gmra.mxu2 %v6048_v37  ;;  %2612 = vperm.xlu2 %4965, %v2558_v27  }
 0x266   : > { %3586 = vmatpush.msrb.mxu2 %v3326_v16  ;;  %3329 = vmatpush.msra.mxu3 %v3328_v15  ;;  %v2547_v16 = vld [vmem:[%s6803_s3 + $0x58] sm:$0xff] }
 0x267   : > { %3003 = vmatmul.f32.gmra.mxu3 %v6057_v58 }
 0x268   : > { %3590 = vmatpush.msrb.mxu2 %v3332_v35  ;;  %3335 = vmatpush.msra.mxu3 %v3334_v32  ;;  %v2655_v35 = vsel %vm2620_vm0, %v2547_v16, 0 }
 0x269   : > { %2730 = vmatmul.f32.gmra.mxu0 %v6077_v2  ;;  %v6151_v28 = vand.u32 4294901760, %v2655_v35 }
 0x26a   : > { %3653 = vmatpush.msrb.mxu3 %v3195_v18  ;;  %v6105_v18 = vand.u32 4294901760, %v2649_v61 }
 0x26b   : > { %2835 = vmatmul.f32.gmra.mxu1 %v6035_v21  ;;  %v6159_v17 = vsub.f32 %v2655_v35, %v6151_v28 }
 0x26c   : > { %3655 = vmatpush.msrb.mxu3 %v5990_v39  ;;  %v2736_v39 = vsub.f32 %v6073_v47, %v6081_v36  ;;  %v6116_v34 = vsub.f32 %v2649_v61, %v6105_v18 }
 0x26d   : > { %2920 = vmatmul.f32.gmra.mxu2 %v6073_v47  ;;  %2607 = vperm.xlu2 %4965, %v2557_v41   ;;  %v6168_v15 = vand.u32 4294901760, %v6159_v17 }
 0x26e   : > { %3657 = vmatpush.msrb.mxu3 %v6023_v56  ;;  %v6099_v38 = vand.u32 4294901760, %v2736_v39  ;;  %v2744_v56 = vsub.f32 %v6096_v59, %v6103_v51  ;;  %v6126_v7 = vand.u32 4294901760, %v6116_v34 }
 0x26f   : > { %3009 = vmatmul.f32.gmra.mxu3 %v6081_v36  ;;  %v2768_v19 = vsub.f32 %v6159_v17, %v6168_v15 }
 0x270   : > { %3659 = vmatpush.msrb.mxu3 %v6007_v42  ;;  %v2546_v42 = vld [vmem:[%s6803_s3 + $0x50] sm:$0xff]  ;;  %v6122_v55 = vand.u32 4294901760, %v2744_v56  ;;  %v2752_v48 = vsub.f32 %v6116_v34, %v6126_v7 }
 0x271   : > { %2738 = vmatmul.f32.gmra.mxu0 %v6099_v38  ;;  %v2652_v50 = vsel %vm2620_vm0, %v2546_v42, 0  ;;  %v6175_v32 = vand.u32 4294901760, %v2768_v19 }
 0x272   : > { %v6128_v30 = vand.u32 4294901760, %v2652_v50  ;;  %v6145_v26 = vand.u32 4294901760, %v2752_v48 }
 0x273   : > { %2839 = vmatmul.f32.gmra.mxu1 %v6059_v63 }
 0x274   : > { %v6139_v33 = vsub.f32 %v2652_v50, %v6128_v30 }
 0x275   : > { %2925 = vmatmul.f32.gmra.mxu2 %v6096_v59  ;;  %2602 = vperm.xlu2 %4965, %v2556_v53  }
 0x276   : > { %v6149_v4 = vand.u32 4294901760, %v6139_v33 }
 0x277   : > { %3015 = vmatmul.f32.gmra.mxu3 %v6103_v51 }
 0x278   : > { %v2760_v46 = vsub.f32 %v6139_v33, %v6149_v4 }
 0x279   : > { %2746 = vmatmul.f32.gmra.mxu0 %v6122_v55 }
 0x27a   : > { %v6164_v52 = vand.u32 4294901760, %v2760_v46 }
 0x27b   : > { %2843 = vmatmul.f32.gmra.mxu1 %v6083_v31 }
 0x27d   : > { %2930 = vmatmul.f32.gmra.mxu2 %v6116_v34 }
 0x27f   : > { %3021 = vmatmul.f32.gmra.mxu3 %v6126_v7 }
 0x281   : > { %2754 = vmatmul.f32.gmra.mxu0 %v6145_v26 }
 0x283   : > { %2847 = vmatmul.f32.gmra.mxu1 %v6105_v18 }
 0x285   : > { %2935 = vmatmul.f32.gmra.mxu2 %v6139_v33 }
 0x287   : > { %3027 = vmatmul.f32.gmra.mxu3 %v6149_v4 }
 0x289   : > { %2762 = vmatmul.f32.gmra.mxu0 %v6164_v52 }
 0x28b   : > { %2851 = vmatmul.f32.gmra.mxu1 %v6128_v30 }
 0x28d   : > { %2940 = vmatmul.f32.gmra.mxu2 %v6159_v17 }
 0x28f   : > { %3033 = vmatmul.f32.gmra.mxu3 %v6168_v15 }
 0x291   : > { %2770 = vmatmul.f32.gmra.mxu0 %v6175_v32 }
 0x293   : > { %2855 = vmatmul.f32.gmra.mxu1 %v6151_v28 }
 0x295   : > { %3208 = vmatmul.f32.vlgmr.msra.gmra.mxu2 %v5894_v29  ;;  %v6195_v29 = vpop.permute.xlu0 %2567 }
 0x296   : > { %6844 = vst [vmem:[#allocation5_spill] sm:$0xff] %v6195_v29 }
 0x297   : > { %3337 = vmatmul.f32.vlgmr.msra.gmra.mxu3 %v5869_v25 }
 0x299   : > { %3066 = vmatmul.f32.vlgmr.msra.gmra.mxu0 %v5869_v25 }
 0x29b   : > { %3135 = vmatmul.f32.vlgmr.msra.gmra.mxu1 %v5869_v25 }
 0x29d   : > { %3216 = vmatmul.f32.gmra.mxu2 %v5931_v13  ;;  %v6201_v13 = vpop.permute.xlu0 %2562 }
 0x29e   : > { %6845 = vst [vmem:[#allocation6_spill] sm:$0xff] %v6201_v13  ;;  %v6217_v46 = vpop.permute.xlu2 %2617 }
 0x29f   : > { %3341 = vmatmul.f32.gmra.mxu3 %v5875_v20  ;;  %6847 = vst [vmem:[#allocation8_spill] sm:$0xff] %v6217_v46 }
 0x2a1   : > { %3070 = vmatmul.f32.gmra.mxu0 %v5875_v20 }
 0x2a3   : > { %3139 = vmatmul.f32.gmra.mxu1 %v5875_v20 }
 0x2a5   : > { %3224 = vmatmul.f32.gmra.mxu2 %v5962_v57 }
 0x2a7   : > { %3345 = vmatmul.f32.gmra.mxu3 %v5906_v45 }
 0x2a9   : > { %3074 = vmatmul.f32.gmra.mxu0 %v5906_v45 }
 0x2ab   : > { %3143 = vmatmul.f32.gmra.mxu1 %v5906_v45 }
 0x2ad   : > { %3232 = vmatmul.f32.gmra.mxu2 %v5992_v40  ;;  %v6208_v40 = vpop.permute.xlu1 %2597 }
 0x2ae   : > { %6846 = vst [vmem:[#allocation7_spill] sm:$0xff] %v6208_v40 }
 0x2af   : > { %3349 = vmatmul.f32.gmra.mxu3 %v5952_v43 }
 0x2b1   : > { %3078 = vmatmul.f32.gmra.mxu0 %v5952_v43 }
 0x2b3   : > { %3147 = vmatmul.f32.gmra.mxu1 %v5952_v43 }
 0x2b5   : > { %3240 = vmatmul.f32.gmra.mxu2 %v6029_v11  ;;  %v6219_v19 = vpop.permute.xlu1 %2592 }
 0x2b6   : > { %v2683_v60 = vpop.f32.mrf.mxu0 }
 0x2b7   : > { %v2886_v57 = vpop.f32.mrf.mxu2  ;;  %v2684_v6 = vadd.f32 %v2683_v60, %v6201_v13  ;;  %v2812_v39 = vpop.f32.mrf.mxu1  ;;  %3353 = vmatmul.f32.gmra.mxu3 %v5975_v24 }
 0x2b9   : > { %v2968_v61 = vpop.f32.mrf.mxu3  ;;  %v2813_v42 = vadd.f32 %v2812_v39, %v2684_v6  ;;  %3082 = vmatmul.f32.gmra.mxu0 %v5975_v24 }
 0x2bb   : > { %v2887_v56 = vadd.f32 %v2886_v57, %v2813_v42  ;;  %3151 = vmatmul.f32.gmra.mxu1 %v5975_v24 }
 0x2bd   : > { %v6210_v27 = vadd.f32 %v2968_v61, %v2887_v56  ;;  %3248 = vmatmul.f32.gmra.mxu2 %v6053_v1 }
 0x2be   : > { %v2691_v50 = vpop.f32.mrf.mxu0 }
 0x2bf   : > { %v2891_v16 = vpop.f32.mrf.mxu2  ;;  %v2692_v48 = vadd.f32 %v2691_v50, %v6195_v29  ;;  %v2816_v11 = vpop.f32.mrf.mxu1  ;;  %3357 = vmatmul.f32.gmra.mxu3 %v6000_v62 }
 0x2c0   : > { %v6228_v50 = vpop.permute.xlu2 %2577 }
 0x2c1   : > { %v2974_v41 = vpop.f32.mrf.mxu3  ;;  %v2817_v35 = vadd.f32 %v2816_v11, %v2692_v48  ;;  %3086 = vmatmul.f32.gmra.mxu0 %v6000_v62 }
 0x2c3   : > { %v2892_v53 = vadd.f32 %v2891_v16, %v2817_v35  ;;  %3155 = vmatmul.f32.gmra.mxu1 %v6000_v62 }
 0x2c5   : > { %v6221_v60 = vadd.f32 %v2974_v41, %v2892_v53  ;;  %3256 = vmatmul.f32.gmra.mxu2 %v6077_v2  ;;  %v6233_v41 = vpop.permute.xlu1 %2587 }
 0x2c6   : > { %v2699_v57 = vpop.f32.mrf.mxu0 }
 0x2c7   : > { %v2896_v6 = vpop.f32.mrf.mxu2  ;;  %v2700_v1 = vadd.f32 %v2699_v57, %v6187_v8  ;;  %v2820_v39 = vpop.f32.mrf.mxu1  ;;  %3361 = vmatmul.f32.gmra.mxu3 %v6035_v21 }
 0x2c9   : > { %v2980_v61 = vpop.f32.mrf.mxu3  ;;  %v2821_v42 = vadd.f32 %v2820_v39, %v2700_v1  ;;  %3090 = vmatmul.f32.gmra.mxu0 %v6035_v21 }
 0x2cb   : > { %v2897_v56 = vadd.f32 %v2896_v6, %v2821_v42  ;;  %3159 = vmatmul.f32.gmra.mxu1 %v6035_v21 }
 0x2cd   : > { %v6230_v16 = vadd.f32 %v2980_v61, %v2897_v56  ;;  %3264 = vmatmul.f32.gmra.mxu2 %v6099_v38  ;;  %v6243_v42 = vpop.permute.xlu1 %2582 }
 0x2ce   : > { %v2707_v48 = vpop.f32.mrf.mxu0 }
 0x2cf   : > { %v2901_v11 = vpop.f32.mrf.mxu2  ;;  %v2708_v2 = vadd.f32 %v2707_v48, %v6228_v50  ;;  %v2824_v35 = vpop.f32.mrf.mxu1  ;;  %3365 = vmatmul.f32.gmra.mxu3 %v6059_v63 }
 0x2d1   : > { %v2986_v53 = vpop.f32.mrf.mxu3  ;;  %v2825_v57 = vadd.f32 %v2824_v35, %v2708_v2  ;;  %3094 = vmatmul.f32.gmra.mxu0 %v6059_v63 }
 0x2d3   : > { %v2902_v6 = vadd.f32 %v2901_v11, %v2825_v57  ;;  %3163 = vmatmul.f32.gmra.mxu1 %v6059_v63 }
 0x2d5   : > { %v6239_v1 = vadd.f32 %v2986_v53, %v2902_v6  ;;  %3272 = vmatmul.f32.gmra.mxu2 %v6122_v55  ;;  %v6253_v55 = vpop.permute.xlu2 %2612 }
 0x2d6   : > { %v2715_v39 = vpop.f32.mrf.mxu0  ;;  %6848 = vst [vmem:[#allocation9_spill] sm:$0xff] %v6253_v55 }
 0x2d7   : > { %v2906_v61 = vpop.f32.mrf.mxu2  ;;  %3369 = vmatmul.f32.gmra.mxu3 %v6083_v31  ;;  %v2716_v56 = vadd.f32 %v2715_v39, %v6243_v42 }
 0x2d8   : > { %v2828_v48 = vpop.f32.mrf.mxu1 }
 0x2d9   : > { %v2992_v38 = vpop.f32.mrf.mxu3  ;;  %3098 = vmatmul.f32.gmra.mxu0 %v6083_v31  ;;  %v2829_v2 = vadd.f32 %v2828_v48, %v2716_v56 }
 0x2db   : > { %v2907_v11 = vadd.f32 %v2906_v61, %v2829_v2  ;;  %3167 = vmatmul.f32.gmra.mxu1 %v6083_v31 }
 0x2dd   : > { %3280 = vmatmul.f32.gmra.mxu2 %v6145_v26  ;;  %v6250_v53 = vadd.f32 %v2992_v38, %v2907_v11  ;;  %v3772_v11 = vld [vmem:[%s6806_s6 + $0x78] sm:$0xff] }
 0x2de   : > { %v2723_v35 = vpop.f32.mrf.mxu0  ;;  %3790 = vperm.xlu2 %4965, %v3772_v11  }
 0x2df   : > { %3373 = vmatmul.f32.gmra.mxu3 %v6105_v18  ;;  %v2724_v57 = vadd.f32 %v2723_v35, %v6233_v41 }
 0x2e0   : > { %v2911_v6 = vpop.f32.mrf.mxu2  ;;  %v2832_v39 = vpop.f32.mrf.mxu1 }
 0x2e1   : > { %3102 = vmatmul.f32.gmra.mxu0 %v6105_v18  ;;  %v2833_v56 = vadd.f32 %v2832_v39, %v2724_v57  ;;  %v6267_v57 = vpop.permute.xlu2 %2607 }
 0x2e2   : > { %v2998_v13 = vpop.f32.mrf.mxu3 }
 0x2e3   : > { %v2912_v61 = vadd.f32 %v2911_v6, %v2833_v56  ;;  %3171 = vmatmul.f32.gmra.mxu1 %v6105_v18 }
 0x2e5   : > { %3288 = vmatmul.f32.gmra.mxu2 %v6164_v52  ;;  %v6259_v26 = vadd.f32 %v2998_v13, %v2912_v61 }
 0x2e6   : > { %v2731_v48 = vpop.f32.mrf.mxu0 }
 0x2e7   : > { %3377 = vmatmul.f32.gmra.mxu3 %v6128_v30  ;;  %v2732_v38 = vadd.f32 %v2731_v48, %v6219_v19 }
 0x2e8   : > { %v2916_v2 = vpop.f32.mrf.mxu2  ;;  %v2836_v35 = vpop.f32.mrf.mxu1 }
 0x2e9   : > { %3106 = vmatmul.f32.gmra.mxu0 %v6128_v30  ;;  %v2837_v6 = vadd.f32 %v2836_v35, %v2732_v38  ;;  %v3769_v38 = vld [vmem:[%s6806_s6 + $0x60] sm:$0xff] }
 0x2ea   : > { %v3004_v39 = vpop.f32.mrf.mxu3  ;;  %3775 = vperm.xlu2 %4965, %v3769_v38  }
 0x2eb   : > { %v2917_v52 = vadd.f32 %v2916_v2, %v2837_v6  ;;  %3175 = vmatmul.f32.gmra.mxu1 %v6128_v30  ;;  %v6279_v6 = vpop.permute.xlu2 %2602 }
 0x2ed   : > { %3296 = vmatmul.f32.gmra.mxu2 %v6175_v32  ;;  %v6271_v56 = vadd.f32 %v3004_v39, %v2917_v52 }
 0x2ee   : > { %v2739_v13 = vpop.f32.mrf.mxu0 }
 0x2ef   : > { %3381 = vmatmul.f32.gmra.mxu3 %v6151_v28  ;;  %v2740_v61 = vadd.f32 %v2739_v13, %v6208_v40 }
 0x2f0   : > { %v2921_v48 = vpop.f32.mrf.mxu2  ;;  %v2840_v11 = vpop.f32.mrf.mxu1 }
 0x2f1   : > { %3110 = vmatmul.f32.gmra.mxu0 %v6151_v28  ;;  %v2841_v2 = vadd.f32 %v2840_v11, %v2740_v61 }
 0x2f2   : > { %v3010_v35 = vpop.f32.mrf.mxu3 }
 0x2f3   : > { %v2922_v32 = vadd.f32 %v2921_v48, %v2841_v2  ;;  %3179 = vmatmul.f32.gmra.mxu1 %v6151_v28 }
 0x2f5   : > { %3592 = vmatmul.f32.vlgmr.msrb.gmra.mxu2 %v5869_v25  ;;  %v6283_v52 = vadd.f32 %v3010_v35, %v2922_v32 }
 0x2f6   : > { %v2747_v39 = vpop.f32.mrf.mxu0 }
 0x2f7   : > { %v2748_v13 = vadd.f32 %v2747_v39, %v6279_v6  ;;  %3661 = vmatmul.f32.vlgmr.msrb.gmra.mxu3 %v5869_v25 }
 0x2f8   : > { %v2926_v40 = vpop.f32.mrf.mxu2  ;;  %v2844_v38 = vpop.f32.mrf.mxu1 }
 0x2f9   : > { %3411 = vmatmul.f32.vlgmr.msrb.gmra.mxu0 %v5873_v12  ;;  %v2845_v61 = vadd.f32 %v2844_v38, %v2748_v13 }
 0x2fa   : > { %v3016_v11 = vpop.f32.mrf.mxu3 }
 0x2fb   : > { %v2927_v29 = vadd.f32 %v2926_v40, %v2845_v61  ;;  %3493 = vmatmul.f32.vlgmr.msrb.gmra.mxu1 %v5878_v9 }
 0x2fd   : > { %3596 = vmatmul.f32.gmra.mxu2 %v5875_v20  ;;  %v6291_v35 = vadd.f32 %v3016_v11, %v2927_v29 }
 0x2fe   : > { %v2755_v48 = vpop.f32.mrf.mxu0 }
 0x2ff   : > { %v2756_v2 = vadd.f32 %v2755_v48, %v6267_v57  ;;  %3665 = vmatmul.f32.gmra.mxu3 %v5875_v20 }
 0x300   : > { %v2931_v25 = vpop.f32.mrf.mxu2  ;;  %v2848_v12 = vpop.f32.mrf.mxu1 }
 0x301   : > { %3416 = vmatmul.f32.gmra.mxu0 %v5883_v54  ;;  %v2849_v32 = vadd.f32 %v2848_v12, %v2756_v2 }
 0x302   : > { %v3022_v39 = vpop.f32.mrf.mxu3 }
 0x303   : > { %v2932_v13 = vadd.f32 %v2931_v25, %v2849_v32  ;;  %3499 = vmatmul.f32.gmra.mxu1 %v5892_v5 }
 0x305   : > { %3600 = vmatmul.f32.gmra.mxu2 %v5906_v45  ;;  %v6298_v38 = vadd.f32 %v3022_v39, %v2932_v13 }
 0x306   : > { %v2763_v40 = vpop.f32.mrf.mxu0 }
 0x307   : > { %v2764_v9 = vadd.f32 %v2763_v40, %v6253_v55  ;;  %3669 = vmatmul.f32.gmra.mxu3 %v5906_v45 }
 0x308   : > { %v2936_v20 = vpop.f32.mrf.mxu2  ;;  %v2852_v54 = vpop.f32.mrf.mxu1 }
 0x309   : > { %3421 = vmatmul.f32.gmra.mxu0 %v5914_v44  ;;  %v2853_v29 = vadd.f32 %v2852_v54, %v2764_v9 }
 0x30a   : > { %v3028_v61 = vpop.f32.mrf.mxu3 }
 0x30b   : > { %v2937_v11 = vadd.f32 %v2936_v20, %v2853_v29  ;;  %3505 = vmatmul.f32.gmra.mxu1 %v5936_v3 }
 0x30d   : > { %3604 = vmatmul.f32.gmra.mxu2 %v5952_v43  ;;  %v6305_v2 = vadd.f32 %v3028_v61, %v2937_v11 }
 0x30e   : > { %v2771_v48 = vpop.f32.mrf.mxu0 }
 0x30f   : > { %v2772_v5 = vadd.f32 %v2771_v48, %v6217_v46  ;;  %3673 = vmatmul.f32.gmra.mxu3 %v5952_v43 }
 0x310   : > { %v2941_v45 = vpop.f32.mrf.mxu2  ;;  %v2856_v44 = vpop.f32.mrf.mxu1 }
 0x311   : > { %3426 = vmatmul.f32.gmra.mxu0 %v5957_v23  ;;  %v2857_v25 = vadd.f32 %v2856_v44, %v2772_v5 }
 0x312   : > { %v3034_v12 = vpop.f32.mrf.mxu3 }
 0x313   : > { %v2942_v32 = vadd.f32 %v2941_v45, %v2857_v25  ;;  %3511 = vmatmul.f32.gmra.mxu1 %v5966_v10 }
 0x315   : > { %3608 = vmatmul.f32.gmra.mxu2 %v5975_v24  ;;  %v6313_v3 = vadd.f32 %v3034_v12, %v2942_v32 }
 0x316   : > { %v6310_v39 = vpop.f32.mrf.mxu0 }
 0x317   : > { %3677 = vmatmul.f32.gmra.mxu3 %v5975_v24 }
 0x318   : > { %v6317_v43 = vpop.f32.mrf.mxu2  ;;  %v6319_v23 = vpop.f32.mrf.mxu1 }
 0x319   : > { %3431 = vmatmul.f32.gmra.mxu0 %v5985_v49 }
 0x31a   : > { %v6321_v13 = vpop.f32.mrf.mxu3 }
 0x31b   : > { %6849 = vst [vmem:[#allocation10_spill] sm:$0xff] %v6321_v13  ;;  %3517 = vmatmul.f32.gmra.mxu1 %v5998_v0 }
 0x31d   : > { %3612 = vmatmul.f32.gmra.mxu2 %v6000_v62 }
 0x31e   : > { %v6324_v40 = vpop.f32.mrf.mxu0 }
 0x31f   : > { %3681 = vmatmul.f32.gmra.mxu3 %v6000_v62 }
 0x320   : > { %v6329_v10 = vpop.f32.mrf.mxu2  ;;  %v6331_v24 = vpop.f32.mrf.mxu1 }
 0x321   : > { %3436 = vmatmul.f32.gmra.mxu0 %v6018_v14 }
 0x322   : > { %v6333_v49 = vpop.f32.mrf.mxu3 }
 0x323   : > { %6850 = vst [vmem:[#allocation11_spill] sm:$0xff] %v6333_v49  ;;  %3523 = vmatmul.f32.gmra.mxu1 %v6033_v22 }
 0x325   : > { %3616 = vmatmul.f32.gmra.mxu2 %v6035_v21 }
 0x326   : > { %v3075_v9 = vpop.f32.mrf.mxu0 }
 0x327   : > { %3685 = vmatmul.f32.gmra.mxu3 %v6035_v21 }
 0x328   : > { %v6339_v0 = vpop.f32.mrf.mxu2  ;;  %v3144_v62 = vpop.f32.mrf.mxu1 }
 0x329   : > { %3441 = vmatmul.f32.gmra.mxu0 %v6048_v37 }
 0x32a   : > { %v6341_v20 = vpop.f32.mrf.mxu3 }
 0x32b   : > { %3529 = vmatmul.f32.gmra.mxu1 %v6057_v58 }
 0x32d   : > { %3620 = vmatmul.f32.gmra.mxu2 %v6059_v63 }
 0x32e   : > { %v6344_v14 = vpop.f32.mrf.mxu0 }
 0x32f   : > { %3689 = vmatmul.f32.gmra.mxu3 %v6059_v63 }
 0x330   : > { %v6349_v22 = vpop.f32.mrf.mxu2  ;;  %v6351_v21 = vpop.f32.mrf.mxu1 }
 0x331   : > { %3446 = vmatmul.f32.gmra.mxu0 %v6073_v47 }
 0x332   : > { %v6353_v37 = vpop.f32.mrf.mxu3 }
 0x333   : > { %3535 = vmatmul.f32.gmra.mxu1 %v6081_v36 }
 0x335   : > { %3624 = vmatmul.f32.gmra.mxu2 %v6083_v31 }
 0x336   : > { %v3083_v54 = vpop.f32.mrf.mxu0 }
 0x337   : > { %3693 = vmatmul.f32.gmra.mxu3 %v6083_v31 }
 0x338   : > { %v6359_v58 = vpop.f32.mrf.mxu2  ;;  %v3152_v63 = vpop.f32.mrf.mxu1 }
 0x339   : > { %3451 = vmatmul.f32.gmra.mxu0 %v6096_v59 }
 0x33a   : > { %v6361_v29 = vpop.f32.mrf.mxu3 }
 0x33b   : > { %3541 = vmatmul.f32.gmra.mxu1 %v6103_v51 }
 0x33d   : > { %3628 = vmatmul.f32.gmra.mxu2 %v6105_v18 }
 0x33e   : > { %v3087_v47 = vpop.f32.mrf.mxu0 }
 0x33f   : > { %3697 = vmatmul.f32.gmra.mxu3 %v6105_v18  ;;  %v3088_v49 = vadd.f32 %v3087_v47, %v6259_v26 }
 0x340   : > { %v6367_v36 = vpop.f32.mrf.mxu2  ;;  %v3156_v61 = vpop.f32.mrf.mxu1 }
 0x341   : > { %3456 = vmatmul.f32.gmra.mxu0 %v6116_v34 }
 0x342   : > { %v6369_v31 = vpop.f32.mrf.mxu3 }
 0x343   : > { %6851 = vst [vmem:[#allocation12_spill] sm:$0xff] %v6369_v31  ;;  %3547 = vmatmul.f32.gmra.mxu1 %v6126_v7 }
 0x345   : > { %3632 = vmatmul.f32.gmra.mxu2 %v6128_v30 }
 0x346   : > { %v3091_v59 = vpop.f32.mrf.mxu0 }
 0x347   : > { %3701 = vmatmul.f32.gmra.mxu3 %v6128_v30  ;;  %v3092_v55 = vadd.f32 %v3091_v59, %v6271_v56 }
 0x348   : > { %v6375_v51 = vpop.f32.mrf.mxu2  ;;  %v3160_v11 = vpop.f32.mrf.mxu1 }
 0x349   : > { %3461 = vmatmul.f32.gmra.mxu0 %v6139_v33 }
 0x34a   : > { %v6377_v18 = vpop.f32.mrf.mxu3 }
 0x34b   : > { %6852 = vst [vmem:[#allocation13_spill] sm:$0xff] %v6377_v18  ;;  %3553 = vmatmul.f32.gmra.mxu1 %v6149_v4 }
 0x34d   : > { %3636 = vmatmul.f32.gmra.mxu2 %v6151_v28 }
 0x34e   : > { %v3095_v34 = vpop.f32.mrf.mxu0 }
 0x34f   : > { %3705 = vmatmul.f32.gmra.mxu3 %v6151_v28 }
 0x350   : > { %v6383_v7 = vpop.f32.mrf.mxu2  ;;  %v3164_v48 = vpop.f32.mrf.mxu1 }
 0x351   : > { %3466 = vmatmul.f32.gmra.mxu0 %v6159_v17  ;;  %6853 = vst [vmem:[#allocation14_spill] sm:$0xff] %v6383_v7 }
 0x352   : > { %v6385_v30 = vpop.f32.mrf.mxu3 }
 0x353   : > { %6854 = vst [vmem:[#allocation15_spill] sm:$0xff] %v6385_v30  ;;  %3559 = vmatmul.f32.gmra.mxu1 %v6168_v15  ;;  %v3076_v30 = vadd.f32 %v3075_v9, %v6230_v16  ;;  %v3161_v16 = vadd.f32 %v3160_v11, %v3092_v55 }
 0x355   : > { %v3145_v13 = vadd.f32 %v3144_v62, %v3076_v30 }
 0x356   : > { %v3099_v33 = vpop.f32.mrf.mxu0 }
 0x357   : > { %v3100_v32 = vadd.f32 %v3099_v33, %v6291_v35  ;;  %v3084_v33 = vadd.f32 %v3083_v54, %v6250_v53  ;;  %v3080_v53 = vadd.f32 %v6344_v14, %v6239_v1 }
 0x358   : > { %v6388_v5 = vpop.f32.mrf.mxu2  ;;  %v3168_v45 = vpop.f32.mrf.mxu1 }
 0x359   : > { %v3169_v7 = vadd.f32 %v3168_v45, %v3100_v32  ;;  %v3153_v56 = vadd.f32 %v3152_v63, %v3084_v33 }
 0x35a   : > { %v6390_v44 = vpop.f32.mrf.mxu3 }
 0x35e   : > { %v3103_v4 = vpop.f32.mrf.mxu0 }
 0x35f   : > { %v3104_v28 = vadd.f32 %v3103_v4, %v6298_v38  ;;  %v3072_v38 = vadd.f32 %v6324_v40, %v6221_v60  ;;  %v3157_v4 = vadd.f32 %v3156_v61, %v3088_v49 }
 0x360   : > { %v6392_v25 = vpop.f32.mrf.mxu2  ;;  %v3172_v12 = vpop.f32.mrf.mxu1 }
 0x361   : > { %v3173_v46 = vadd.f32 %v3172_v12, %v3104_v28  ;;  %v3141_v26 = vadd.f32 %v6331_v24, %v3072_v38  ;;  %v3096_v24 = vadd.f32 %v3095_v34, %v6283_v52 }
 0x362   : > { %v6395_v17 = vpop.f32.mrf.mxu3 }
 0x363   : > { %4966 = vtanh.f32 %v3173_v46  ;;  %v3068_v46 = vadd.f32 %v6310_v39, %v6210_v27  ;;  %v3765_v27 = vld [vmem:[%s6804_s4] sm:$0xff]  ;;  %v3165_v1 = vadd.f32 %v3164_v48, %v3096_v24 }
 0x364   : > { %4968 = vtanh.f32 %v3169_v7  ;;  %v3794_v11 = vsel %vm2620_vm0, %v3765_v27, 0 }
 0x365   : > { %4970 = vtanh.f32 %v3145_v13  ;;  %v3137_v40 = vadd.f32 %v6319_v23, %v3068_v46  ;;  %v3149_v23 = vadd.f32 %v6351_v21, %v3080_v53  ;;  %v6441_v12 = vand.u32 4294901760, %v3794_v11 }
 0x366   : > { %v3107_v15 = vpop.f32.mrf.mxu0 }
 0x367   : > { %v3108_v18 = vadd.f32 %v3107_v15, %v6305_v2 }
 0x368   : > { %v6402_v31 = vpop.f32.mrf.mxu2  ;;  %v3176_v35 = vpop.f32.mrf.mxu1 }
 0x369   : > { %v3177_v9 = vadd.f32 %v3176_v35, %v3108_v18  ;;  %v4967_v60 = vpop.eup %4966  ;;  %v3766_v35 = vld [vmem:[%s6804_s4 + $0x8] sm:$0xff] }
 0x36a   : > { %v6407_v62 = vpop.f32.mrf.mxu3  ;;  %v4969_v55 = vpop.eup %4968  ;;  %v3743_v54 = vsub.f32 1.0, %v4967_v60  ;;  %v3797_v24 = vsel %vm2620_vm0, %v3766_v35, 0 }
 0x36b   : > { %4972 = vtanh.f32 %v3177_v9  ;;  %v6422_v39 = vpop.eup %4970 }
 0x36c   : > { %4974 = vtanh.f32 %v3157_v4  ;;  %6855 = vst [vmem:[#allocation16_spill] sm:$0xff] %v6422_v39 }
 0x36d   : > { %4976 = vtanh.f32 %v3161_v16 }
 0x36e   : > { %v3111_v2 = vpop.f32.mrf.mxu0  ;;  %4978 = vtanh.f32 %v3141_v26 }
 0x36f   : > { %4980 = vtanh.f32 %v3153_v56  ;;  %v3112_v13 = vadd.f32 %v3111_v2, %v6313_v3  ;;  %v3741_v3 = vsub.f32 1.0, %v4969_v55  ;;  %v6458_v56 = vsub.f32 %v3794_v11, %v6441_v12  ;;  %v3767_v11 = vld [vmem:[%s6804_s4 + $0x10] sm:$0xff] }
 0x370   : > { %v6417_v49 = vpop.f32.mrf.mxu2  ;;  %v3180_v63 = vpop.f32.mrf.mxu1  ;;  %4982 = vtanh.f32 %v3137_v40 }
 0x371   : > { %v4973_v47 = vpop.eup %4972  ;;  %v3181_v14 = vadd.f32 %v3180_v63, %v3112_v13  ;;  %v6474_v63 = vand.u32 4294901760, %v6458_v56 }
 0x372   : > { %v6425_v61 = vpop.f32.mrf.mxu3  ;;  %v6427_v52 = vpop.eup %4974  ;;  %v3745_v59 = vsub.f32 1.0, %v4973_v47  ;;  %v3737_v7 = vmul.f32 %v4973_v47, %v6422_v39  ;;  %v6476_v47 = vand.u32 4294901760, %v3797_v24 }
 0x373   : > { %6856 = vst [vmem:[#allocation17_spill] sm:$0xff] %v6427_v52  ;;  %v6430_v18 = vpop.eup %4976  ;;  %4984 = vtanh.f32 %v3181_v14  ;;  %v3751_v21 = vmul.f32 %v6427_v52, %v3743_v54 }
 0x374   : > { %6857 = vst [vmem:[#allocation18_spill] sm:$0xff] %v6430_v18  ;;  %v6432_v34 = vpop.eup %4978  ;;  %4986 = vtanh.f32 %v3149_v23  ;;  %v3753_v48 = vmul.f32 %v6430_v18, %v3745_v59 }
 0x375   : > { %6858 = vst [vmem:[#allocation19_spill] sm:$0xff] %v6432_v34  ;;  %v6439_v45 = vpop.eup %4980  ;;  %4988 = vtanh.f32 %v3165_v1  ;;  %v3735_v32 = vmul.f32 %v6432_v34, %v4967_v60 }
 0x376   : > { %v6437_v30 = vpop.f32.mrf.mxu0  ;;  %6859 = vst [vmem:[#allocation20_spill] sm:$0xff] %v6439_v45  ;;  %v3749_v28 = vmul.f32 %v6439_v45, %v3741_v3  ;;  %v3761_v15 = vadd.f32 %v3753_v48, %v3737_v7  ;;  %v6445_v38 = vpop.eup %4982 }
 0x377   : > { %6860 = vst [vmem:[#allocation21_spill] sm:$0xff] %v6445_v38  ;;  %v3733_v33 = vmul.f32 %v6445_v38, %v4969_v55  ;;  %v3759_v9 = vadd.f32 %v3751_v21, %v3735_v32  ;;  %v3828_v32 = vsub.f32 %v6458_v56, %v6474_v63 }
 0x378   : > { %v6447_v4 = vpop.f32.mrf.mxu2  ;;  %v6453_v16 = vpop.f32.mrf.mxu1  ;;  %v6462_v40 = vand.u32 4294901760, %v3761_v15  ;;  %6864 = vst [vmem:[#allocation25_spill] sm:$0xff] %v6476_v47 }
 0x379   : > { %v4985_v26 = vpop.eup %4984  ;;  %v3757_v53 = vadd.f32 %v3749_v28, %v3733_v33  ;;  %v6471_v54 = vand.u32 4294901760, %v3759_v9 }
 0x37a   : > { %v6455_v46 = vpop.f32.mrf.mxu3  ;;  %v6460_v2 = vpop.eup %4986  ;;  %v3747_v60 = vsub.f32 1.0, %v4985_v26  ;;  %v3877_v14 = vsub.f32 %v3761_v15, %v6462_v40  ;;  %v6496_v15 = vsub.f32 %v3797_v24, %v6476_v47  ;;  %v6507_v24 = vand.u32 4294901760, %v3828_v32  ;;  %v3768_v32 = vld [vmem:[%s6804_s4 + $0x18] sm:$0xff] }
 0x37b   : > { %6861 = vst [vmem:[#allocation22_spill] sm:$0xff] %v6455_v46  ;;  %v6465_v13 = vpop.eup %4988  ;;  %v3739_v55 = vmul.f32 %v6460_v2, %v4985_v26  ;;  %v6479_v3 = vand.u32 4294901760, %v3757_v53  ;;  %v3883_v48 = vsub.f32 %v3759_v9, %v6471_v54 }
 0x37c   : > { %6862 = vst [vmem:[#allocation23_spill] sm:$0xff] %v6460_v2  ;;  %v3755_v27 = vmul.f32 %v6465_v13, %v3747_v60  ;;  %v3878_v26 = vand.u32 4294901760, %v3877_v14  ;;  %v3800_v60 = vsel %vm2620_vm0, %v3767_v11, 0 }
 0x37d   : > { %6863 = vst [vmem:[#allocation24_spill] sm:$0xff] %v6465_v13  ;;  %v3889_v33 = vsub.f32 %v3757_v53, %v6479_v3  ;;  %v6510_v13 = vand.u32 4294901760, %v6496_v15 }
 0x37e   : > { %v6469_v23 = vpop.f32.mrf.mxu0  ;;  %v3763_v1 = vadd.f32 %v3755_v27, %v3739_v55  ;;  %6866 = vst [vmem:[#allocation27_spill] sm:$0xff] %v6496_v15  ;;  %v3884_v27 = vand.u32 4294901760, %v3883_v48  ;;  %v3879_v11 = vsub.f32 %v3877_v14, %v3878_v26 }
 0x37f   : > { %6867 = vst [vmem:[#allocation28_spill] sm:$0xff] %v6507_v24  ;;  %v3890_v2 = vand.u32 4294901760, %v3889_v33  ;;  %v3836_v39 = vsub.f32 %v6496_v15, %v6510_v13 }
 0x380   : > { %v6481_v59 = vpop.f32.mrf.mxu2  ;;  %v6486_v21 = vpop.f32.mrf.mxu1  ;;  %v6488_v7 = vand.u32 4294901760, %v3763_v1  ;;  %6868 = vst [vmem:[#allocation29_spill] sm:$0xff] %v6510_v13  ;;  %v3885_v18 = vsub.f32 %v3883_v48, %v3884_v27  ;;  %v3880_v46 = vand.u32 4294901760, %v3879_v11 }
 0x382   : > { %v6491_v28 = vpop.f32.mrf.mxu3  ;;  %3818 = vmatpush.msra.mxu0 %v6488_v7  ;;  %3969 = vmatpush.msra.mxu3 %v6488_v7  ;;  %v3871_v35 = vsub.f32 %v3763_v1, %v6488_v7  ;;  %v6512_v1 = vand.u32 4294901760, %v3800_v60 }
 0x383   : > { %6865 = vst [vmem:[#allocation26_spill] sm:$0xff] %v6491_v28  ;;  %v6539_v28 = vand.u32 4294901760, %v3836_v39 }
 0x384   : > { %3820 = vmatpush.msra.mxu0 %v6462_v40  ;;  %3925 = vmatpush.msra.mxu2 %v3871_v35  ;;  %v3872_v55 = vand.u32 4294901760, %v3871_v35  ;;  %v6533_v52 = vsub.f32 %v3800_v60, %v6512_v1 }
 0x385   : > { %3971 = vmatpush.msra.mxu3 %v6462_v40 }
 0x386   : > { %v6503_v9 = vpop.f32.mrf.mxu0  ;;  %3822 = vmatpush.msra.mxu0 %v6471_v54  ;;  %3928 = vmatpush.msra.mxu2 %v3877_v14  ;;  %v3873_v53 = vsub.f32 %v3871_v35, %v3872_v55  ;;  %v3234_v35 = vadd.f32 %v6349_v22, %v6228_v50  ;;  %6869 = vst [vmem:[#allocation30_spill] sm:$0xff] %v6533_v52  ;;  %v3886_v22 = vand.u32 4294901760, %v3885_v18  ;;  %v6542_v60 = vand.u32 4294901760, %v6533_v52 }
 0x387   : > { %3973 = vmatpush.msra.mxu3 %v6471_v54 }
 0x388   : > { %v6516_v38 = vpop.f32.mrf.mxu2  ;;  %v6521_v34 = vpop.f32.mrf.mxu1  ;;  %3824 = vmatpush.msra.mxu0 %v6479_v3  ;;  %3931 = vmatpush.msra.mxu2 %v3883_v48  ;;  %v3874_v45 = vand.u32 4294901760, %v3873_v53  ;;  %v3891_v53 = vsub.f32 %v3889_v33, %v3890_v2  ;;  %v3803_v48 = vsel %vm2620_vm0, %v3768_v32, 0  ;;  %6870 = vst [vmem:[#allocation31_spill] sm:$0xff] %v6542_v60 }
 0x389   : > { %3975 = vmatpush.msra.mxu3 %v6479_v3  ;;  %3830 = vmatmul.f32.vlgmr.msra.gmra.mxu0 %v6507_v24  ;;  %v3351_v24 = vadd.f32 %v6353_v37, %v3234_v35 }
 0x38a   : > { %v6528_v14 = vpop.f32.mrf.mxu3  ;;  %4016 = vmatpush.msrb.mxu0 %v3872_v55  ;;  %3875 = vmatpush.msra.mxu1 %v3874_v45  ;;  %v6544_v45 = vand.u32 4294901760, %v3803_v48 }
 0x38b   : > { %3934 = vmatpush.msra.mxu2 %v3889_v33  ;;  %3979 = vmatmul.f32.vlgmr.msra.gmra.mxu3 %v6474_v63  ;;  %v3892_v33 = vand.u32 4294901760, %v3891_v53 }
 0x38c   : > { %4020 = vmatpush.msrb.mxu0 %v3878_v26  ;;  %3881 = vmatpush.msra.mxu1 %v3880_v46  ;;  %v3242_v46 = vadd.f32 %v6359_v58, %v6243_v42  ;;  %v3844_v26 = vsub.f32 %v6533_v52, %v6542_v60 }
 0x38d   : > { %3937 = vmatmul.f32.vlgmr.msra.gmra.mxu2 %v6458_v56 }
 0x38e   : > { %v3427_v50 = vpop.f32.mrf.mxu0  ;;  %4024 = vmatpush.msrb.mxu0 %v3884_v27  ;;  %3887 = vmatpush.msra.mxu1 %v3886_v22  ;;  %v6553_v27 = vsub.f32 %v3803_v48, %v6544_v45  ;;  %v3355_v58 = vadd.f32 %v6361_v29, %v3242_v46  ;;  %v6562_v32 = vand.u32 4294901760, %v3844_v26 }
 0x38f   : > { %v3428_v55 = vadd.f32 %v3427_v50, %v3351_v24 }
 0x390   : > { %v3605_v11 = vpop.f32.mrf.mxu2  ;;  %4028 = vmatpush.msrb.mxu0 %v3890_v2  ;;  %v3512_v18 = vpop.f32.mrf.mxu1  ;;  %3893 = vmatpush.msra.mxu1 %v3892_v33  ;;  %6871 = vst [vmem:[#allocation32_spill] sm:$0xff] %v6553_v27  ;;  %v6565_v35 = vand.u32 4294901760, %v6553_v27 }
 0x391   : > { %v3513_v37 = vadd.f32 %v3512_v18, %v3428_v55  ;;  %3838 = vmatmul.f32.gmra.mxu0 %v6539_v28  ;;  %3895 = vmatmul.f32.vlgmr.msra.gmra.mxu1 %v6441_v12  ;;  %6872 = vst [vmem:[#allocation33_spill] sm:$0xff] %v6562_v32 }
 0x392   : > { %v3674_v39 = vpop.f32.mrf.mxu3  ;;  %4059 = vmatpush.msrb.mxu1 %v6488_v7  ;;  %6873 = vst [vmem:[#allocation34_spill] sm:$0xff] %v6565_v35 }
 0x393   : > { %v3606_v24 = vadd.f32 %v3605_v11, %v3513_v37  ;;  %3985 = vmatmul.f32.gmra.mxu3 %v6510_v13  ;;  %v6878_v13 = vld [vmem:[#allocation13_spill] sm:$0xff] }
 0x394   : > { %4061 = vmatpush.msrb.mxu1 %v6462_v40  ;;  %v3852_v40 = vsub.f32 %v6553_v27, %v6565_v35 }
 0x395   : > { %v6559_v2 = vadd.f32 %v3674_v39, %v3606_v24  ;;  %3942 = vmatmul.f32.gmra.mxu2 %v6496_v15 }
 0x396   : > { %v3432_v42 = vpop.f32.mrf.mxu0  ;;  %4063 = vmatpush.msrb.mxu1 %v6471_v54  ;;  %v6577_v54 = vand.u32 4294901760, %v3852_v40  ;;  %v3282_v40 = vadd.f32 %v6392_v25, %v6267_v57  ;;  %v6875_v57 = vld [vmem:[#allocation5_spill] sm:$0xff] }
 0x397   : > { %v3433_v7 = vadd.f32 %v3432_v42, %v3355_v58  ;;  %v3218_v25 = vadd.f32 %v6329_v10, %v6875_v57 }
 0x398   : > { %v3609_v53 = vpop.f32.mrf.mxu2  ;;  %4065 = vmatpush.msrb.mxu1 %v6479_v3  ;;  %v3518_v48 = vpop.f32.mrf.mxu1  ;;  %6874 = vst [vmem:[#allocation35_spill] sm:$0xff] %v6577_v54 }
 0x399   : > { %v3519_v50 = vadd.f32 %v3518_v48, %v3433_v7  ;;  %3846 = vmatmul.f32.gmra.mxu0 %v6562_v32  ;;  %3899 = vmatmul.f32.gmra.mxu1 %v6476_v47 }
 0x39a   : > { %v3678_v29 = vpop.f32.mrf.mxu3 }
 0x39b   : > { %v3610_v22 = vadd.f32 %v3609_v53, %v3519_v50  ;;  %3991 = vmatmul.f32.gmra.mxu3 %v6542_v60 }
 0x39d   : > { %v6574_v55 = vadd.f32 %v3678_v29, %v3610_v22  ;;  %3947 = vmatmul.f32.gmra.mxu2 %v6533_v52  ;;  %v3274_v29 = vadd.f32 %v6388_v5, %v6279_v6  ;;  %v3375_v5 = vadd.f32 %v6395_v17, %v3282_v40 }
 0x39e   : > { %v3437_v33 = vpop.f32.mrf.mxu0 }
 0x39f   : > { %v3371_v6 = vadd.f32 %v6390_v44, %v3274_v29  ;;  %v6879_v29 = vld [vmem:[#allocation9_spill] sm:$0xff] }
 0x3a0   : > { %v6579_v3 = vpop.f32.mrf.mxu2  ;;  %v3524_v11 = vpop.f32.mrf.mxu1  ;;  %v3290_v17 = vadd.f32 %v6402_v31, %v6879_v29 }
 0x3a1   : > { %3854 = vmatmul.f32.gmra.mxu0 %v6577_v54  ;;  %3903 = vmatmul.f32.gmra.mxu1 %v6512_v1  ;;  %v3258_v54 = vadd.f32 %v6375_v51, %v6219_v19 }
 0x3a2   : > { %v6583_v46 = vpop.f32.mrf.mxu3 }
 0x3a3   : > { %3997 = vmatmul.f32.gmra.mxu3 %v6565_v35  ;;  %v3250_v35 = vadd.f32 %v6367_v36, %v6233_v41  ;;  %v6877_v41 = vld [vmem:[#allocation12_spill] sm:$0xff]  ;;  %v3363_v19 = vadd.f32 %v6878_v13, %v3258_v54  ;;  %v6881_v54 = vld [vmem:[#allocation10_spill] sm:$0xff] }
 0x3a5   : > { %3952 = vmatmul.f32.gmra.mxu2 %v6553_v27  ;;  %v3226_v27 = vadd.f32 %v6339_v0, %v6187_v8  ;;  %v6876_v8 = vld [vmem:[#allocation6_spill] sm:$0xff]  ;;  %v3359_v36 = vadd.f32 %v6877_v41, %v3250_v35  ;;  %v6884_v41 = vld [vmem:[#allocation8_spill] sm:$0xff] }
 0x3a6   : > { %v3442_v18 = vpop.f32.mrf.mxu0  ;;  %v3210_v0 = vadd.f32 %v6317_v43, %v6876_v8 }
 0x3a7   : > { %v3347_v60 = vadd.f32 %v6341_v20, %v3226_v27  ;;  %v3438_v35 = vadd.f32 %v3437_v33, %v3359_v36 }
 0x3a8   : > { %v6587_v37 = vpop.f32.mrf.mxu2  ;;  %v3530_v39 = vpop.f32.mrf.mxu1 }
 0x3a9   : > { %3907 = vmatmul.f32.gmra.mxu1 %v6544_v45  ;;  %4030 = vmatmul.f32.vlgmr.msrb.gmra.mxu0 %v6441_v12  ;;  %v3423_v51 = vadd.f32 %v6503_v9, %v3347_v60  ;;  %v3339_v9 = vadd.f32 %v6881_v54, %v3210_v0 }
 0x3aa   : > { %v6591_v26 = vpop.f32.mrf.mxu3 }
 0x3ab   : > { %v3507_v43 = vadd.f32 %v6521_v34, %v3423_v51 }
 0x3ad   : > { %v3602_v33 = vadd.f32 %v6516_v38, %v3507_v43 }
 0x3ae   : > { %v6593_v24 = vpop.f32.mrf.mxu0 }
 0x3b0   : > { %v6595_v42 = vpop.f32.mrf.mxu2  ;;  %v6597_v58 = vpop.f32.mrf.mxu1 }
 0x3b1   : > { %4034 = vmatmul.f32.gmra.mxu0 %v6476_v47  ;;  %4067 = vmatmul.f32.vlgmr.msrb.gmra.mxu1 %v6441_v12 }
 0x3b2   : > { %v6601_v7 = vpop.f32.mrf.mxu3 }
 0x3b6   : > { %v3452_v53 = vpop.f32.mrf.mxu0 }
 0x3b8   : > { %v3625_v48 = vpop.f32.mrf.mxu2  ;;  %v3542_v50 = vpop.f32.mrf.mxu1 }
 0x3b9   : > { %4038 = vmatmul.f32.gmra.mxu0 %v6512_v1  ;;  %4071 = vmatmul.f32.gmra.mxu1 %v6476_v47  ;;  %v3453_v47 = vadd.f32 %v3452_v53, %v3371_v6  ;;  %v3443_v53 = vadd.f32 %v3442_v18, %v3363_v19  ;;  %v3525_v6 = vadd.f32 %v3524_v11, %v3438_v35 }
 0x3ba   : > { %v3694_v22 = vpop.f32.mrf.mxu3 }
 0x3bb   : > { %v3543_v40 = vadd.f32 %v3542_v50, %v3453_v47  ;;  %v6882_v47 = vld [vmem:[#allocation7_spill] sm:$0xff]  ;;  %v3531_v57 = vadd.f32 %v3530_v39, %v3443_v53  ;;  %v3614_v36 = vadd.f32 %v6579_v3, %v3525_v6 }
 0x3bd   : > { %v3626_v8 = vadd.f32 %v3625_v48, %v3543_v40  ;;  %v3618_v48 = vadd.f32 %v6587_v37, %v3531_v57 }
 0x3be   : > { %v3457_v52 = vpop.f32.mrf.mxu0 }
 0x3bf   : > { %v3458_v32 = vadd.f32 %v3457_v52, %v3375_v5  ;;  %v6880_v52 = vld [vmem:[#allocation11_spill] sm:$0xff]  ;;  %v3379_v5 = vadd.f32 %v6407_v62, %v3290_v17  ;;  %v3683_v17 = vadd.f32 %v6583_v46, %v3614_v36 }
 0x3c0   : > { %v3629_v15 = vpop.f32.mrf.mxu2  ;;  %v3548_v44 = vpop.f32.mrf.mxu1  ;;  %v3343_v27 = vadd.f32 %v6880_v52, %v3218_v25  ;;  %v3413_v25 = vadd.f32 %v6437_v30, %v3339_v9  ;;  %v6885_v62 = vld [vmem:[#allocation15_spill] sm:$0xff]  ;;  %v3695_v30 = vadd.f32 %v3694_v22, %v3626_v8  ;;  %v3687_v22 = vadd.f32 %v6591_v26, %v3618_v48 }
 0x3c1   : > { %v3549_v10 = vadd.f32 %v3548_v44, %v3458_v32  ;;  %4042 = vmatmul.f32.gmra.mxu0 %v6544_v45  ;;  %4075 = vmatmul.f32.gmra.mxu1 %v6512_v1  ;;  %v6883_v32 = vld [vmem:[#allocation14_spill] sm:$0xff]  ;;  %v3671_v44 = vadd.f32 %v6528_v14, %v3602_v33 }
 0x3c2   : > { %v3698_v20 = vpop.f32.mrf.mxu3  ;;  %v3418_v60 = vadd.f32 %v6469_v23, %v3343_v27  ;;  %v3266_v50 = vadd.f32 %v6883_v32, %v6882_v47  ;;  %v3298_v23 = vadd.f32 %v6417_v49, %v6884_v41  ;;  %v3495_v11 = vadd.f32 %v6453_v16, %v3413_v25  ;;  %v6887_v27 = vld [vmem:[#allocation22_spill] sm:$0xff] }
 0x3c3   : > { %v3630_v13 = vadd.f32 %v3629_v15, %v3549_v10 }
 0x3c4   : > { %v3501_v34 = vadd.f32 %v6486_v21, %v3418_v60  ;;  %v3367_v39 = vadd.f32 %v6885_v62, %v3266_v50  ;;  %v3383_v3 = vadd.f32 %v6425_v61, %v3298_v23  ;;  %v3594_v29 = vadd.f32 %v6447_v4, %v3495_v11 }
 0x3c5   : > { %v3699_v18 = vadd.f32 %v3698_v20, %v3630_v13 }
 0x3c6   : > { %v3462_v31 = vpop.f32.mrf.mxu0  ;;  %v3598_v21 = vadd.f32 %v6481_v59, %v3501_v34  ;;  %v3448_v49 = vadd.f32 %v6593_v24, %v3367_v39  ;;  %v6886_v59 = vld [vmem:[#allocation26_spill] sm:$0xff]  ;;  %v3663_v4 = vadd.f32 %v6887_v27, %v3594_v29  ;;  %v6893_v27 = vld [vmem:[#allocation31_spill] sm:$0xff] }
 0x3c7   : > { %v3463_v15 = vadd.f32 %v3462_v31, %v3379_v5  ;;  %4990 = vtanh.f32 %v3699_v18 }
 0x3c8   : > { %v3633_v0 = vpop.f32.mrf.mxu2  ;;  %v3554_v19 = vpop.f32.mrf.mxu1  ;;  %v3537_v40 = vadd.f32 %v6597_v58, %v3448_v49  ;;  %4992 = vtanh.f32 %v3695_v30  ;;  %v3667_v20 = vadd.f32 %v6886_v59, %v3598_v21 }
 0x3c9   : > { %v3555_v51 = vadd.f32 %v3554_v19, %v3463_v15  ;;  %4079 = vmatmul.f32.gmra.mxu1 %v6544_v45  ;;  %4994 = vtanh.f32 %v3671_v44 }
 0x3ca   : > { %v3702_v38 = vpop.f32.mrf.mxu3  ;;  %v3622_v46 = vadd.f32 %v6595_v42, %v3537_v40 }
 0x3cb   : > { %v3634_v16 = vadd.f32 %v3633_v0, %v3555_v51 }
 0x3cc   : > { %v3691_v9 = vadd.f32 %v6601_v7, %v3622_v46  ;;  %v6895_v46 = vld [vmem:[#allocation35_spill] sm:$0xff] }
 0x3cd   : > { %v3703_v10 = vadd.f32 %v3702_v38, %v3634_v16  ;;  %v4991_v61 = vpop.eup %4990 }
 0x3ce   : > { %v3467_v37 = vpop.f32.mrf.mxu0  ;;  %v4993_v58 = vpop.eup %4992  ;;  %v3744_v13 = vsub.f32 1.0, %v4991_v61 }
 0x3cf   : > { %v3468_v14 = vadd.f32 %v3467_v37, %v3383_v3  ;;  %4996 = vtanh.f32 %v3703_v10  ;;  %v6658_v53 = vpop.eup %4994  ;;  %v3742_v31 = vsub.f32 1.0, %v4993_v58  ;;  %v6888_v10 = vld [vmem:[#allocation28_spill] sm:$0xff] }
 0x3d0   : > { %4998 = vtanh.f32 %v3683_v17  ;;  %v3560_v24 = vpop.f32.mrf.mxu1  ;;  %v3637_v52 = vpop.f32.mrf.mxu2 }
 0x3d1   : > { %5000 = vtanh.f32 %v3687_v22  ;;  %v3561_v43 = vadd.f32 %v3560_v24, %v3468_v14 }
 0x3d2   : > { %5002 = vtanh.f32 %v3667_v20  ;;  %v3706_v26 = vpop.f32.mrf.mxu3 }
 0x3d3   : > { %5004 = vtanh.f32 %v6574_v55  ;;  %v3638_v35 = vadd.f32 %v3637_v52, %v3561_v43  ;;  %v6889_v52 = vld [vmem:[#allocation29_spill] sm:$0xff]  ;;  %v6896_v43 = vld [vmem:[#allocation34_spill] sm:$0xff] }
 0x3d4   : > { %5006 = vtanh.f32 %v3663_v4  ;;  %v6894_v4 = vld [vmem:[#allocation30_spill] sm:$0xff] }
 0x3d5   : > { %v4997_v54 = vpop.eup %4996  ;;  %v3707_v60 = vadd.f32 %v3706_v26, %v3638_v35  ;;  %v6897_v26 = vld [vmem:[#allocation32_spill] sm:$0xff] }
 0x3d6   : > { %v6661_v6 = vpop.eup %4998  ;;  %v3746_v47 = vsub.f32 1.0, %v4997_v54  ;;  %v3738_v50 = vmul.f32 %v4997_v54, %v6658_v53 }
 0x3d7   : > { %v6663_v42 = vpop.eup %5000  ;;  %5008 = vtanh.f32 %v3707_v60  ;;  %v3752_v55 = vmul.f32 %v6661_v6, %v3744_v13 }
 0x3d8   : > { %v6665_v32 = vpop.eup %5002  ;;  %5010 = vtanh.f32 %v6559_v2  ;;  %v3754_v5 = vmul.f32 %v6663_v42, %v3746_v47  ;;  %v6705_v47 = vpop.permute.xlu2 %3790 }
 0x3d9   : > { %v6671_v57 = vpop.eup %5004  ;;  %5012 = vtanh.f32 %v3691_v9  ;;  %v3736_v8 = vmul.f32 %v6665_v32, %v4991_v61  ;;  %v6890_v61 = vld [vmem:[#allocation27_spill] sm:$0xff] }
 0x3da   : > { %v3750_v7 = vmul.f32 %v6671_v57, %v3742_v31  ;;  %v3762_v25 = vadd.f32 %v3754_v5, %v3738_v50  ;;  %v6675_v34 = vpop.eup %5006 }
 0x3db   : > { %v3734_v33 = vmul.f32 %v6675_v34, %v4993_v58  ;;  %v3760_v15 = vadd.f32 %v3752_v55, %v3736_v8 }
 0x3dc   : > { %v4097_v41 = vand.u32 4294901760, %v3762_v25 }
 0x3dd   : > { %v5009_v2 = vpop.eup %5008  ;;  %v3758_v23 = vadd.f32 %v3750_v7, %v3734_v33  ;;  %v4099_v62 = vand.u32 4294901760, %v3760_v15 }
 0x3de   : > { %v6678_v18 = vpop.eup %5010  ;;  %v3748_v0 = vsub.f32 1.0, %v5009_v2  ;;  %v4155_v48 = vsub.f32 %v3762_v25, %v4097_v41 }
 0x3df   : > { %v6680_v11 = vpop.eup %5012  ;;  %v3740_v36 = vmul.f32 %v6678_v18, %v5009_v2  ;;  %v4101_v30 = vand.u32 4294901760, %v3758_v23  ;;  %v4161_v38 = vsub.f32 %v3760_v15, %v4099_v62 }
 0x3e0   : > { %v3756_v19 = vmul.f32 %v6680_v11, %v3748_v0  ;;  %v4156_v49 = vand.u32 4294901760, %v4155_v48  ;;  %v6712_v25 = vpop.permute.xlu2 %3775 }
 0x3e1   : > { %v4167_v44 = vsub.f32 %v3758_v23, %v4101_v30  ;;  %v4162_v3 = vand.u32 4294901760, %v4161_v38 }
 0x3e2   : > { %v3764_v39 = vadd.f32 %v3756_v19, %v3740_v36  ;;  %v4157_v17 = vsub.f32 %v4155_v48, %v4156_v49  ;;  %v6716_v36 = vpop.permute.xlu0 %3785 }
 0x3e3   : > { %v4168_v37 = vand.u32 4294901760, %v4167_v44  ;;  %v4163_v40 = vsub.f32 %v4161_v38, %v4162_v3 }
 0x3e4   : > { %v4095_v51 = vand.u32 4294901760, %v3764_v39  ;;  %v4158_v59 = vand.u32 4294901760, %v4157_v17 }
 0x3e5   : > { %v4169_v20 = vsub.f32 %v4167_v44, %v4168_v37  ;;  %v4164_v14 = vand.u32 4294901760, %v4163_v40 }
 0x3e6   : > { %4096 = vmatpush.msrb.mxu2 %v4095_v51  ;;  %4247 = vmatpush.msra.mxu1 %v4095_v51  ;;  %v4149_v21 = vsub.f32 %v3764_v39, %v4095_v51 }
 0x3e7   : > { %v4170_v24 = vand.u32 4294901760, %v4169_v20 }
 0x3e8   : > { %4098 = vmatpush.msrb.mxu2 %v4097_v41  ;;  %4203 = vmatpush.msra.mxu0 %v4149_v21  ;;  %v4150_v16 = vand.u32 4294901760, %v4149_v21 }
 0x3e9   : > { %4249 = vmatpush.msra.mxu1 %v4097_v41 }
 0x3ea   : > { %4100 = vmatpush.msrb.mxu2 %v4099_v62  ;;  %4206 = vmatpush.msra.mxu0 %v4155_v48  ;;  %v4151_v29 = vsub.f32 %v4149_v21, %v4150_v16 }
 0x3eb   : > { %4251 = vmatpush.msra.mxu1 %v4099_v62 }
 0x3ec   : > { %4102 = vmatpush.msrb.mxu2 %v4101_v30  ;;  %4209 = vmatpush.msra.mxu0 %v4161_v38  ;;  %v4152_v22 = vand.u32 4294901760, %v4151_v29 }
 0x3ed   : > { %4253 = vmatpush.msra.mxu1 %v4101_v30  ;;  %4108 = vmatmul.f32.vlgmr.msrb.gmra.mxu2 %v6888_v10 }
 0x3ee   : > { %4294 = vmatpush.msra.mxu2 %v4150_v16  ;;  %4153 = vmatpush.msrb.mxu3 %v4152_v22 }
 0x3ef   : > { %4212 = vmatpush.msra.mxu0 %v4167_v44  ;;  %4257 = vmatmul.f32.vlgmr.msra.gmra.mxu1 %v6474_v63  ;;  %v6891_v63 = vld [vmem:[#allocation33_spill] sm:$0xff] }
 0x3f0   : > { %4298 = vmatpush.msra.mxu2 %v4156_v49  ;;  %4159 = vmatpush.msrb.mxu3 %v4158_v59 }
 0x3f1   : > { %4215 = vmatmul.f32.vlgmr.msra.gmra.mxu0 %v6458_v56  ;;  %v6892_v56 = vld [vmem:[#allocation25_spill] sm:$0xff] }
 0x3f2   : > { %4302 = vmatpush.msra.mxu2 %v4162_v3  ;;  %4165 = vmatpush.msrb.mxu3 %v4164_v14 }
 0x3f4   : > { %4306 = vmatpush.msra.mxu2 %v4168_v37  ;;  %4171 = vmatpush.msrb.mxu3 %v4170_v24 }
 0x3f5   : > { %4116 = vmatmul.f32.gmra.mxu2 %v6539_v28  ;;  %4173 = vmatmul.f32.vlgmr.msrb.gmra.mxu3 %v6441_v12 }
 0x3f6   : > { %4337 = vmatpush.msra.mxu3 %v4095_v51 }
 0x3f7   : > { %4263 = vmatmul.f32.gmra.mxu1 %v6889_v52 }
 0x3f8   : > { %4339 = vmatpush.msra.mxu3 %v4097_v41 }
 0x3f9   : > { %4220 = vmatmul.f32.gmra.mxu0 %v6890_v61 }
 0x3fa   : > { %4341 = vmatpush.msra.mxu3 %v4099_v62 }
 0x3fc   : > { %4343 = vmatpush.msra.mxu3 %v4101_v30 }
 0x3fd   : > { %4124 = vmatmul.f32.gmra.mxu2 %v6891_v63  ;;  %4177 = vmatmul.f32.gmra.mxu3 %v6892_v56 }
 0x3ff   : > { %4269 = vmatmul.f32.gmra.mxu1 %v6893_v27 }
 0x401   : > { %4225 = vmatmul.f32.gmra.mxu0 %v6894_v4  ;;  %v4402_v4 = vld [vmem:[%s6805_s5] sm:$0x1] }
 0x405   : > { %4132 = vmatmul.f32.gmra.mxu2 %v6895_v46  ;;  %4181 = vmatmul.f32.gmra.mxu3 %v6512_v1 }
 0x406   : > { %v3831_v28 = vpop.f32.mrf.mxu0 }
 0x407   : > { %4275 = vmatmul.f32.gmra.mxu1 %v6896_v43  ;;  %v3832_v15 = vadd.f32 %v3831_v28, %v6712_v25 }
 0x409   : > { %4230 = vmatmul.f32.gmra.mxu0 %v6897_v26 }
 0x40d   : > { %4185 = vmatmul.f32.gmra.mxu3 %v6544_v45  ;;  %4308 = vmatmul.f32.vlgmr.msra.gmra.mxu2 %v6441_v12 }
 0x40e   : > { %v3839_v58 = vpop.f32.mrf.mxu0  ;;  %v3896_v35 = vpop.f32.mrf.mxu1 }
 0x40f   : > { %v3980_v55 = vpop.f32.mrf.mxu3  ;;  %v3897_v23 = vadd.f32 %v3896_v35, %v3832_v15 }
 0x410   : > { %v3938_v9 = vpop.f32.mrf.mxu2 }
 0x411   : > { %v3939_v39 = vadd.f32 %v3938_v9, %v3897_v23 }
 0x413   : > { %v3981_v21 = vadd.f32 %v3980_v55, %v3939_v39  ;;  %v6900_v55 = vld [vmem:[#allocation18_spill] sm:$0xff] }
 0x415   : > { %4312 = vmatmul.f32.gmra.mxu2 %v6892_v56  ;;  %4345 = vmatmul.f32.vlgmr.msra.gmra.mxu3 %v6441_v12  ;;  %v6709_v12 = vpop.permute.xlu1 %3780 }
 0x416   : > { %v3847_v13 = vpop.f32.mrf.mxu0  ;;  %v3900_v54 = vpop.f32.mrf.mxu1  ;;  %v3840_v8 = vadd.f32 %v3839_v58, %v6709_v12 }
 0x417   : > { %v3986_v33 = vpop.f32.mrf.mxu3 }
 0x418   : > { %v3943_v7 = vpop.f32.mrf.mxu2  ;;  %v3901_v2 = vadd.f32 %v3900_v54, %v3840_v8  ;;  %v6898_v54 = vld [vmem:[#allocation17_spill] sm:$0xff] }
 0x41a   : > { %v3944_v19 = vadd.f32 %v3943_v7, %v3901_v2  ;;  %v6901_v7 = vld [vmem:[#allocation20_spill] sm:$0xff] }
 0x41c   : > { %v3987_v30 = vadd.f32 %v3986_v33, %v3944_v19  ;;  %v6902_v33 = vld [vmem:[#allocation19_spill] sm:$0xff] }
 0x41d   : > { %4316 = vmatmul.f32.gmra.mxu2 %v6512_v1  ;;  %4349 = vmatmul.f32.gmra.mxu3 %v6892_v56 }
 0x41e   : > { %v3855_v60 = vpop.f32.mrf.mxu0  ;;  %v3904_v31 = vpop.f32.mrf.mxu1 }
 0x41f   : > { %v3992_v51 = vpop.f32.mrf.mxu3 }
 0x420   : > { %v3948_v62 = vpop.f32.mrf.mxu2 }
 0x425   : > { %4320 = vmatmul.f32.gmra.mxu2 %v6544_v45  ;;  %4353 = vmatmul.f32.gmra.mxu3 %v6512_v1  ;;  %v3848_v1 = vadd.f32 %v3847_v13, %v6716_v36  ;;  %v4409_v13 = vsel %vm2620_vm0, %v4402_v4, 0  ;;  %vm4784_vm0 = vcmask 1040384  }
 0x426   : > { %v3908_v50 = vpop.f32.mrf.mxu1  ;;  %v4031_v5 = vpop.f32.mrf.mxu0 }
 0x427   : > { %v3905_v48 = vadd.f32 %v3904_v31, %v3848_v1  ;;  %v4032_v3 = vadd.f32 %v4031_v5, %v3981_v21  ;;  %v3998_v24 = vpop.f32.mrf.mxu3  ;;  %v6727_v5 = vand.u32 4294901760, %v4409_v13 }
 0x428   : > { %v3953_v40 = vpop.f32.mrf.mxu2 }
 0x429   : > { %v3949_v44 = vadd.f32 %v3948_v62, %v3905_v48  ;;  %v6733_v19 = vsub.f32 %v4409_v13, %v6727_v5 }
 0x42b   : > { %v3993_v17 = vadd.f32 %v3992_v51, %v3949_v44 }
 0x42d   : > { %4357 = vmatmul.f32.gmra.mxu3 %v6544_v45  ;;  %v3856_v45 = vadd.f32 %v3855_v60, %v6705_v47  ;;  %v6899_v60 = vld [vmem:[#allocation16_spill] sm:$0xff] }
 0x42e   : > { %v4035_v0 = vpop.f32.mrf.mxu0  ;;  %v4068_v41 = vpop.f32.mrf.mxu1 }
 0x42f   : > { %v4036_v49 = vadd.f32 %v4035_v0, %v3987_v30  ;;  %v3909_v37 = vadd.f32 %v3908_v50, %v3856_v45  ;;  %v4069_v22 = vadd.f32 %v4068_v41, %v4032_v3  ;;  %v6903_v0 = vld [vmem:[#allocation21_spill] sm:$0xff]  ;;  %v6904_v30 = vld [vmem:[#allocation23_spill] sm:$0xff] }
 0x431   : > { %v3954_v20 = vadd.f32 %v3953_v40, %v3909_v37 }
 0x433   : > { %v3999_v63 = vadd.f32 %v3998_v24, %v3954_v20 }
 0x436   : > { %v4072_v38 = vpop.f32.mrf.mxu1  ;;  %v4039_v16 = vpop.f32.mrf.mxu0 }
 0x437   : > { %v4073_v29 = vadd.f32 %v4072_v38, %v4036_v49  ;;  %v4040_v10 = vadd.f32 %v4039_v16, %v3993_v17  ;;  %v6905_v38 = vld [vmem:[#allocation24_spill] sm:$0xff]  ;;  %v6738_v49 = vand.u32 4294901760, %v6733_v19 }
 0x439   : > { %5014 = vtanh.f32 %v4073_v29  ;;  %v4434_v37 = vsub.f32 %v6733_v19, %v6738_v49 }
 0x43a   : > { %5016 = vtanh.f32 %v4069_v22 }
 0x43e   : > { %v4076_v59 = vpop.f32.mrf.mxu1  ;;  %v4043_v52 = vpop.f32.mrf.mxu0 }
 0x43f   : > { %v4077_v14 = vadd.f32 %v4076_v59, %v4040_v10  ;;  %v5015_v61 = vpop.eup %5014  ;;  %v4044_v27 = vadd.f32 %v4043_v52, %v3999_v63 }
 0x440   : > { %v5017_v56 = vpop.eup %5016  ;;  %v4379_v46 = vsub.f32 1.0, %v5015_v61  ;;  %v4371_v15 = vmul.f32 %v5015_v61, %v6902_v33 }
 0x441   : > { %5018 = vtanh.f32 %v4077_v14  ;;  %v4377_v58 = vsub.f32 1.0, %v5017_v56  ;;  %v4369_v41 = vmul.f32 %v5017_v56, %v6903_v0  ;;  %v6742_v14 = vand.u32 4294901760, %v4434_v37 }
 0x442   : > { %v4387_v9 = vmul.f32 %v6898_v54, %v4379_v46 }
 0x443   : > { %v4385_v8 = vmul.f32 %v6901_v7, %v4377_v58 }
 0x444   : > { %v4395_v23 = vadd.f32 %v4387_v9, %v4371_v15 }
 0x445   : > { %v4393_v48 = vadd.f32 %v4385_v8, %v4369_v41 }
 0x446   : > { %v4080_v28 = vpop.f32.mrf.mxu1  ;;  %v4427_v44 = vand.u32 4294901760, %v4395_v23 }
 0x447   : > { %v5019_v43 = vpop.eup %5018  ;;  %v4081_v26 = vadd.f32 %v4080_v28, %v4044_v27  ;;  %v4429_v3 = vand.u32 4294901760, %v4393_v48 }
 0x448   : > { %v4381_v35 = vsub.f32 1.0, %v5019_v43  ;;  %v4373_v31 = vmul.f32 %v5019_v43, %v6899_v60  ;;  %v4465_v17 = vsub.f32 %v4395_v23, %v4427_v44 }
 0x449   : > { %5020 = vtanh.f32 %v4081_v26  ;;  %v4471_v40 = vsub.f32 %v4393_v48, %v4429_v3 }
 0x44a   : > { %v4389_v50 = vmul.f32 %v6900_v55, %v4381_v35  ;;  %v4466_v20 = vand.u32 4294901760, %v4465_v17 }
 0x44b   : > { %v4472_v61 = vand.u32 4294901760, %v4471_v40 }
 0x44c   : > { %v4397_v2 = vadd.f32 %v4389_v50, %v4373_v31  ;;  %v4467_v56 = vsub.f32 %v4465_v17, %v4466_v20 }
 0x44d   : > { %v4473_v4 = vsub.f32 %v4471_v40, %v4472_v61 }
 0x44e   : > { %v4425_v39 = vand.u32 4294901760, %v4397_v2  ;;  %v4468_v46 = vand.u32 4294901760, %v4467_v56 }
 0x44f   : > { %v5021_v1 = vpop.eup %5020  ;;  %v4474_v28 = vand.u32 4294901760, %v4473_v4 }
 0x450   : > { %v4383_v62 = vsub.f32 1.0, %v5021_v1  ;;  %v4375_v51 = vmul.f32 %v5021_v1, %v6904_v30  ;;  %v4459_v45 = vsub.f32 %v4397_v2, %v4425_v39 }
 0x452   : > { %v4391_v21 = vmul.f32 %v6905_v38, %v4383_v62  ;;  %v4460_v10 = vand.u32 4294901760, %v4459_v45 }
 0x454   : > { %v4399_v16 = vadd.f32 %v4391_v21, %v4375_v51  ;;  %v4461_v52 = vsub.f32 %v4459_v45, %v4460_v10 }
 0x456   : > { %v4423_v29 = vand.u32 4294901760, %v4399_v16  ;;  %v4462_v27 = vand.u32 4294901760, %v4461_v52 }
 0x458   : > { %4424 = vmatpush.msrb.mxu0 %v4423_v29  ;;  %4524 = vmatpush.msrb.mxu3 %v4423_v29  ;;  %v4453_v22 = vsub.f32 %v4399_v16, %v4423_v29 }
 0x45a   : > { %4426 = vmatpush.msrb.mxu0 %v4425_v39  ;;  %4495 = vmatpush.msrb.mxu2 %v4453_v22  ;;  %v4454_v59 = vand.u32 4294901760, %v4453_v22 }
 0x45b   : > { %4526 = vmatpush.msrb.mxu3 %v4425_v39 }
 0x45c   : > { %4428 = vmatpush.msrb.mxu0 %v4427_v44  ;;  %4498 = vmatpush.msrb.mxu2 %v4459_v45  ;;  %v4455_v24 = vsub.f32 %v4453_v22, %v4454_v59 }
 0x45d   : > { %4528 = vmatpush.msrb.mxu3 %v4427_v44 }
 0x45e   : > { %4430 = vmatpush.msrb.mxu0 %v4429_v3  ;;  %4501 = vmatpush.msrb.mxu2 %v4465_v17  ;;  %v4456_v63 = vand.u32 4294901760, %v4455_v24 }
 0x45f   : > { %4530 = vmatpush.msrb.mxu3 %v4429_v3  ;;  %4436 = vmatmul.f32.vlgmr.msrb.gmra.mxu0 %v6742_v14 }
 0x460   : > { %4553 = vmatpush.msra.mxu0 %v4454_v59  ;;  %4457 = vmatpush.msrb.mxu1 %v4456_v63 }
 0x461   : > { %4504 = vmatpush.msrb.mxu2 %v4471_v40  ;;  %4534 = vmatmul.f32.vlgmr.msrb.gmra.mxu3 %v6738_v49 }
 0x462   : > { %4557 = vmatpush.msra.mxu0 %v4460_v10  ;;  %4463 = vmatpush.msrb.mxu1 %v4462_v27 }
 0x463   : > { %4507 = vmatmul.f32.vlgmr.msrb.gmra.mxu2 %v6733_v19 }
 0x464   : > { %4561 = vmatpush.msra.mxu0 %v4466_v20  ;;  %4469 = vmatpush.msrb.mxu1 %v4468_v46 }
 0x466   : > { %4565 = vmatpush.msra.mxu0 %v4472_v61  ;;  %4475 = vmatpush.msrb.mxu1 %v4474_v28 }
 0x467   : > { %4477 = vmatmul.f32.vlgmr.msrb.gmra.mxu1 %v6727_v5  ;;  %4567 = vmatmul.f32.vlgmr.msra.gmra.mxu0 %v6727_v5 }
 0x468   : > { %4584 = vmatpush.msra.mxu1 %v4423_v29 }
 0x46a   : > { %4586 = vmatpush.msra.mxu1 %v4425_v39 }
 0x46c   : > { %4588 = vmatpush.msra.mxu1 %v4427_v44  ;;  %v4258_v31 = vpop.f32.mrf.mxu1 }
 0x46e   : > { %4590 = vmatpush.msra.mxu1 %v4429_v3  ;;  %v4216_v54 = vpop.f32.mrf.mxu0 }
 0x46f   : > { %4592 = vmatmul.f32.vlgmr.msra.gmra.mxu1 %v6727_v5 }
 0x470   : > { %v4109_v43 = vpop.f32.mrf.mxu2 }
 0x471   : > { %v4110_v15 = vadd.f32 %v4109_v43, %v6712_v25 }
 0x474   : > { %v4264_v33 = vpop.f32.mrf.mxu1 }
 0x476   : > { %v4221_v7 = vpop.f32.mrf.mxu0 }
 0x478   : > { %v4117_v26 = vpop.f32.mrf.mxu2  ;;  %v4174_v58 = vpop.f32.mrf.mxu3 }
 0x479   : > { %v4118_v8 = vadd.f32 %v4117_v26, %v6709_v12  ;;  %v4175_v23 = vadd.f32 %v4174_v58, %v4110_v15 }
 0x47b   : > { %v4217_v48 = vadd.f32 %v4216_v54, %v4175_v23 }
 0x47c   : > { %v4270_v38 = vpop.f32.mrf.mxu1 }
 0x47d   : > { %v4259_v44 = vadd.f32 %v4258_v31, %v4217_v48 }
 0x47e   : > { %v4226_v39 = vpop.f32.mrf.mxu0 }
 0x480   : > { %v4125_v35 = vpop.f32.mrf.mxu2  ;;  %v4178_v13 = vpop.f32.mrf.mxu3 }
 0x481   : > { %v4179_v2 = vadd.f32 %v4178_v13, %v4118_v8  ;;  %v4126_v1 = vadd.f32 %v4125_v35, %v6716_v36 }
 0x483   : > { %v4222_v62 = vadd.f32 %v4221_v7, %v4179_v2 }
 0x484   : > { %v4276_v24 = vpop.f32.mrf.mxu1 }
 0x485   : > { %v4265_v51 = vadd.f32 %v4264_v33, %v4222_v62 }
 0x486   : > { %v4231_v40 = vpop.f32.mrf.mxu0 }
 0x488   : > { %v4133_v9 = vpop.f32.mrf.mxu2  ;;  %v4182_v60 = vpop.f32.mrf.mxu3 }
 0x489   : > { %v4183_v30 = vadd.f32 %v4182_v60, %v4126_v1  ;;  %v4134_v3 = vadd.f32 %v4133_v9, %v6705_v47 }
 0x48b   : > { %v4227_v16 = vadd.f32 %v4226_v39, %v4183_v30 }
 0x48d   : > { %v4271_v17 = vadd.f32 %v4270_v38, %v4227_v16 }
 0x490   : > { %v4186_v55 = vpop.f32.mrf.mxu3  ;;  %v4309_v50 = vpop.f32.mrf.mxu2 }
 0x491   : > { %v4310_v25 = vadd.f32 %v4309_v50, %v4259_v44  ;;  %v4187_v37 = vadd.f32 %v4186_v55, %v4134_v3 }
 0x493   : > { %v4232_v59 = vadd.f32 %v4231_v40, %v4187_v37 }
 0x495   : > { %v4277_v63 = vadd.f32 %v4276_v24, %v4232_v59 }
 0x498   : > { %v4313_v0 = vpop.f32.mrf.mxu2  ;;  %v4346_v41 = vpop.f32.mrf.mxu3 }
 0x499   : > { %v4314_v45 = vadd.f32 %v4313_v0, %v4265_v51  ;;  %v4347_v22 = vadd.f32 %v4346_v41, %v4310_v25 }
 0x4a0   : > { %v4350_v21 = vpop.f32.mrf.mxu3  ;;  %v4317_v12 = vpop.f32.mrf.mxu2 }
 0x4a1   : > { %v4351_v29 = vadd.f32 %v4350_v21, %v4314_v45  ;;  %v4318_v36 = vadd.f32 %v4317_v12, %v4271_v17 }
 0x4a3   : > { %5022 = vtanh.f32 %v4351_v29 }
 0x4a4   : > { %5024 = vtanh.f32 %v4347_v22 }
 0x4a8   : > { %v4354_v10 = vpop.f32.mrf.mxu3  ;;  %v4321_v52 = vpop.f32.mrf.mxu2 }
 0x4a9   : > { %v4355_v20 = vadd.f32 %v4354_v10, %v4318_v36  ;;  %v5023_v61 = vpop.eup %5022  ;;  %v4322_v27 = vadd.f32 %v4321_v52, %v4277_v63 }
 0x4aa   : > { %v5025_v56 = vpop.eup %5024  ;;  %v4380_v47 = vsub.f32 1.0, %v5023_v61  ;;  %v4372_v9 = vmul.f32 %v5023_v61, %v6665_v32 }
 0x4ab   : > { %5026 = vtanh.f32 %v4355_v20  ;;  %v4378_v43 = vsub.f32 1.0, %v5025_v56  ;;  %v4370_v31 = vmul.f32 %v5025_v56, %v6675_v34  ;;  %v4787_v56 = vlaneseq }
 0x4ac   : > { %v4388_v58 = vmul.f32 %v6661_v6, %v4380_v47 }
 0x4ad   : > { %v4386_v54 = vmul.f32 %v6671_v57, %v4378_v43  ;;  %vm4789_vm14 = vcmp.lt.s32.totalorder %v4787_v56, 256 }
 0x4ae   : > { %v4396_v55 = vadd.f32 %v4388_v58, %v4372_v9 }
 0x4af   : > { %v4394_v33 = vadd.f32 %v4386_v54, %v4370_v31 }
 0x4b0   : > { %v4358_v4 = vpop.f32.mrf.mxu3  ;;  %v4612_v2 = vand.u32 4294901760, %v4396_v55 }
 0x4b1   : > { %v5027_v46 = vpop.eup %5026  ;;  %v4359_v28 = vadd.f32 %v4358_v4, %v4322_v27 }
 0x4b2   : > { %v4382_v26 = vsub.f32 1.0, %v5027_v46  ;;  %v4374_v35 = vmul.f32 %v5027_v46, %v6658_v53  ;;  %v4650_v57 = vsub.f32 %v4396_v55, %v4612_v2 }
 0x4b3   : > { %5028 = vtanh.f32 %v4359_v28 }
 0x4b4   : > { %v4390_v13 = vmul.f32 %v6663_v42, %v4382_v26  ;;  %v4614_v42 = vand.u32 4294901760, %v4394_v33  ;;  %v4651_v62 = vand.u32 4294901760, %v4650_v57 }
 0x4b6   : > { %v4398_v60 = vadd.f32 %v4390_v13, %v4374_v35  ;;  %v4656_v23 = vsub.f32 %v4394_v33, %v4614_v42  ;;  %v4652_v30 = vsub.f32 %v4650_v57, %v4651_v62 }
 0x4b8   : > { %v4610_v8 = vand.u32 4294901760, %v4398_v60  ;;  %v4657_v39 = vand.u32 4294901760, %v4656_v23  ;;  %v4653_v21 = vand.u32 4294901760, %v4652_v30 }
 0x4b9   : > { %v5029_v50 = vpop.eup %5028 }
 0x4ba   : > { %v4384_v7 = vsub.f32 1.0, %v5029_v50  ;;  %v4376_v15 = vmul.f32 %v5029_v50, %v6678_v18  ;;  %v4644_v0 = vsub.f32 %v4398_v60, %v4610_v8  ;;  %v4658_v38 = vsub.f32 %v4656_v23, %v4657_v39 }
 0x4bc   : > { %v4392_v6 = vmul.f32 %v6680_v11, %v4384_v7  ;;  %v4645_v34 = vand.u32 4294901760, %v4644_v0  ;;  %v4659_v44 = vand.u32 4294901760, %v4658_v38 }
 0x4be   : > { %v4400_v53 = vadd.f32 %v4392_v6, %v4376_v15  ;;  %v4646_v11 = vsub.f32 %v4644_v0, %v4645_v34 }
 0x4c0   : > { %v4608_v41 = vand.u32 4294901760, %v4400_v53  ;;  %v4647_v51 = vand.u32 4294901760, %v4646_v11 }
 0x4c2   : > { %4609 = vmatpush.msra.mxu2 %v4608_v41  ;;  %4709 = vmatpush.msrb.mxu1 %v4608_v41  ;;  %v4638_v32 = vsub.f32 %v4400_v53, %v4608_v41 }
 0x4c4   : > { %4611 = vmatpush.msra.mxu2 %v4610_v8  ;;  %4680 = vmatpush.msrb.mxu0 %v4638_v32  ;;  %v4639_v1 = vand.u32 4294901760, %v4638_v32 }
 0x4c5   : > { %4711 = vmatpush.msrb.mxu1 %v4610_v8 }
 0x4c6   : > { %4613 = vmatpush.msra.mxu2 %v4612_v2  ;;  %4683 = vmatpush.msrb.mxu0 %v4644_v0  ;;  %v4640_v18 = vsub.f32 %v4638_v32, %v4639_v1 }
 0x4c7   : > { %4713 = vmatpush.msrb.mxu1 %v4612_v2 }
 0x4c8   : > { %4615 = vmatpush.msra.mxu2 %v4614_v42  ;;  %4686 = vmatpush.msrb.mxu0 %v4650_v57  ;;  %v4641_v48 = vand.u32 4294901760, %v4640_v18 }
 0x4c9   : > { %4715 = vmatpush.msrb.mxu1 %v4614_v42  ;;  %4621 = vmatmul.f32.vlgmr.msra.gmra.mxu2 %v6742_v14 }
 0x4ca   : > { %4738 = vmatpush.msrb.mxu2 %v4639_v1  ;;  %4642 = vmatpush.msra.mxu3 %v4641_v48 }
 0x4cb   : > { %4689 = vmatpush.msrb.mxu0 %v4656_v23  ;;  %4719 = vmatmul.f32.vlgmr.msrb.gmra.mxu1 %v6738_v49 }
 0x4cc   : > { %4742 = vmatpush.msrb.mxu2 %v4645_v34  ;;  %4648 = vmatpush.msra.mxu3 %v4647_v51 }
 0x4cd   : > { %4692 = vmatmul.f32.vlgmr.msrb.gmra.mxu0 %v6733_v19  ;;  %v4406_v19 = vpop.permute.xlu0 %4405 }
 0x4ce   : > { %4746 = vmatpush.msrb.mxu2 %v4651_v62  ;;  %4654 = vmatpush.msra.mxu3 %v4653_v21 }
 0x4d0   : > { %4750 = vmatpush.msrb.mxu2 %v4657_v39  ;;  %4660 = vmatpush.msra.mxu3 %v4659_v44 }
 0x4d1   : > { %4662 = vmatmul.f32.vlgmr.msra.gmra.mxu3 %v6727_v5  ;;  %4752 = vmatmul.f32.vlgmr.msrb.gmra.mxu2 %v6727_v5 }
 0x4d2   : > { %4769 = vmatpush.msrb.mxu3 %v4608_v41 }
 0x4d4   : > { %4771 = vmatpush.msrb.mxu3 %v4610_v8 }
 0x4d6   : > { %4773 = vmatpush.msrb.mxu3 %v4612_v2 }
 0x4d8   : > { %4775 = vmatpush.msrb.mxu3 %v4614_v42 }
 0x4d9   : > { %4777 = vmatmul.f32.vlgmr.msrb.gmra.mxu3 %v6727_v5 }
 0x4dc   : > { %v4437_v49 = vpop.f32.mrf.mxu0 }
 0x4dd   : > { %v4438_v3 = vadd.f32 %v4437_v49, %v4406_v19 }
 0x4e4   : > { %v4478_v14 = vpop.f32.mrf.mxu1  ;;  %v4535_v45 = vpop.f32.mrf.mxu3 }
 0x4e5   : > { %v4568_v12 = vpop.f32.mrf.mxu0  ;;  %v4479_v29 = vadd.f32 %v4478_v14, %v4438_v3 }
 0x4e6   : > { %v4508_v16 = vpop.f32.mrf.mxu2 }
 0x4e7   : > { %v4509_v37 = vadd.f32 %v4508_v16, %v4479_v29 }
 0x4e9   : > { %v4536_v20 = vadd.f32 %v4535_v45, %v4509_v37 }
 0x4eb   : > { %v4569_v61 = vadd.f32 %v4568_v12, %v4536_v20 }
 0x4ec   : > { %v4593_v25 = vpop.f32.mrf.mxu1 }
 0x4ed   : > { %v4594_v4 = vadd.f32 %v4593_v25, %v4569_v61 }
 0x548   : > { %v4720_v59 = vpop.f32.mrf.mxu1 }
 0x54a   : > { %v4693_v36 = vpop.f32.mrf.mxu0 }
 0x54c   : > { %v4622_v17 = vpop.f32.mrf.mxu2 }
 0x54d   : > { %v4623_v22 = vadd.f32 %v4622_v17, %v4406_v19 }
 0x554   : > { %v4663_v40 = vpop.f32.mrf.mxu3  ;;  %v4753_v24 = vpop.f32.mrf.mxu2 }
 0x555   : > { %v4664_v10 = vadd.f32 %v4663_v40, %v4623_v22 }
 0x557   : > { %v4694_v5 = vadd.f32 %v4693_v36, %v4664_v10 }
 0x559   : > { %v4721_v52 = vadd.f32 %v4720_v59, %v4694_v5 }
 0x55b   : > { %v4754_v63 = vadd.f32 %v4753_v24, %v4721_v52 }
 0x55c   : > { %v4778_v27 = vpop.f32.mrf.mxu3 }
 0x55d   : > { %v4779_v47 = vadd.f32 %v4778_v27, %v4754_v63 }
 0x55f   : > { %v4783_v46 = vrot.slane %v4779_v47, 7 }
 0x561   : > { %v4785_v28 = vsel %vm4784_vm0, %v4594_v4, %v4783_v46 }
 0x562   : > { %4791 = vst.msk [vmem:[%s272_s15] sm:$0x3] %vm4789_vm14, %v4785_v28 }
 0x563   : > { %5057 = shalt.err (!%p5054_p3)
}
 0x564   : > { %4914 = dma.vmem_to_hbm [thread:$0]  (%p5180_p5), %s4806_s16, 32, %s4808_s17, %s4793_s28  }
 0x565 PF: > { %p4920_p4 = scmp.ge.s32.totalorder %s5092_s27, 2  ;;  %s4819_s23 = sand.u32 1, %s5080_s24  }
 0x566   : > { %s4820_s9 = scalar_lea.sflag [#allocation3], %s4819_s23 }
 0x567   : > { %p4917_p7 = pnand %p4920_p4, %p5184_p6 }
 0x569   : > { %p4918_p8 = pneg %p4917_p7 }
 0x56b   : > { %5075 = dma.done.wait (%p4918_p8), %s4820_s9, 32  }
 0x56c   : > { %5077 = vsyncadd (%p4918_p8), %s4820_s9, 4294967264  ;;  %p17_p9 = scmp.ge.s32.totalorder %s5166_s30, 6   ;;  %s6906_s24 = smov %s5084_s25 }
 0x56d   : > { %s6907_s25 = smov %s5088_s26  ;;  %s6908_s26 = smov %s5178_s10 }
 0x56e   : > { %s6909_s27 = smov %s5166_s30  ;;  %19 = sbr.rel (!%p17_p9) target bundleno = 3 (0x3), region = 83 }
 0x573   :  { %4826 = vsyncpa [#allocation3], 1 }
 0x574   :  { %4828 = vsyncpa [#allocation3 + $0x1], 1 }

</bundles_post_ra>
